<compile_context>
chip_gen: v6e
topology: v6e:2x2x1
jax: 0.10.0
libtpu: 0.0.40
codegen_flags: <defaults>
</compile_context>

<pallas_src>
import functools

import numpy as np
import jax
import jax.numpy as jnp
from jax.experimental import pallas as pl
from jax.experimental.pallas import tpu as pltpu


# --------------------------------------------------------------------------- #
# Trace-time (numpy) geometry: which 3x3 tap maps input pixel p -> output
# pixel q for a stride-2 conv / conv-transpose.  At most one tap per (p, q)
# pair, so the fused layer matrix has single-weight entries (exact in bf16).
# --------------------------------------------------------------------------- #

def _tap_id(h, w, ho, wo, stride, pad, k, transposed):
    """(H*W, Ho*Wo) int map: tap index in [0, k*k), or k*k if no connection."""
    tid = np.full((h * w, ho * wo), k * k, np.int32)
    for dy in range(k):
        for dx in range(k):
            t = dy * k + dx
            if not transposed:
                # Conv2d: input (hi, wi) = (yo*s + dy - pad, xo*s + dx - pad)
                for yo in range(ho):
                    hi = yo * stride + dy - pad
                    if not (0 <= hi < h):
                        continue
                    for xo in range(wo):
                        wi = xo * stride + dx - pad
                        if 0 <= wi < w:
                            tid[hi * w + wi, yo * wo + xo] = t
            else:
                # ConvTranspose2d: output (yo, xo) = (hi*s - pad + dy, wi*s - pad + dx)
                for hi in range(h):
                    yo = hi * stride - pad + dy
                    if not (0 <= yo < ho):
                        continue
                    for wi in range(w):
                        xo = wi * stride - pad + dx
                        if 0 <= xo < wo:
                            tid[hi * w + wi, yo * wo + xo] = t
    return tid


def _fused_layer_matrix(w_taps, tap_id):
    """(Cout, Cin, 9) weights + (P, Q) tap map -> (Cin*P, Cout*Q) bf16 matrix."""
    cout, cin, _ = w_taps.shape
    p, q = tap_id.shape
    # Extra "tap 9" slot holds 0.0 for unconnected (p, q) pairs.
    w_ext = jnp.concatenate(
        [w_taps, jnp.zeros((cout, cin, 1), w_taps.dtype)], axis=-1)
    m = w_ext[:, :, tap_id]                       # (Cout, Cin, P, Q) gather, exact
    m = m.transpose(1, 2, 0, 3).reshape(cin * p, cout * q)
    return m.astype(jnp.bfloat16)


def _conv_taps(w):        # (Cout, Cin, 3, 3) -> (Cout, Cin, 9)
    return w.reshape(w.shape[0], w.shape[1], -1).astype(jnp.float32)


def _convT_taps(w):       # (Cin, Cout, 3, 3) -> (Cout, Cin, 9)
    return w.transpose(1, 0, 2, 3).reshape(
        w.shape[1], w.shape[0], -1).astype(jnp.float32)


def _bias_row(b, q):      # (Cout,) -> (1, Cout*Q) f32 matching o-major/q-minor cols
    return jnp.repeat(b.astype(jnp.float32), q)[None, :]


# --------------------------------------------------------------------------- #
# Fused Pallas kernel: the whole autoencoder for one batch tile.
# --------------------------------------------------------------------------- #

def _dae_fused_kernel(x_ref,
                      m1_ref, b1_ref, m2_ref, b2_ref,
                      m3_ref, b3_ref, m4_ref, b4_ref,
                      o_ref):

    def layer(a, m_ref, b_ref, act):
        # a: (bt, Cin*P) f32   m_ref: (Cin*P, Cout*Q) bf16   b_ref: (1, Cout*Q) f32
        z = jnp.dot(a.astype(jnp.bfloat16), m_ref[...],
                    preferred_element_type=jnp.float32)
        z = z + b_ref[...]                      # f32 bias add (broadcast over rows)
        if act == "relu":
            return jnp.maximum(z, 0.0)          # f32 elementwise (v5e-safe)
        return jax.nn.sigmoid(z)                # f32 EUP

    a = x_ref[...]                               # (bt, C0*H*W)
    a = layer(a, m1_ref, b1_ref, "relu")         # (bt, 16*8*8)
    a = layer(a, m2_ref, b2_ref, "relu")         # (bt, 32*4*4)
    a = layer(a, m3_ref, b3_ref, "relu")         # (bt, 16*8*8)
    a = layer(a, m4_ref, b4_ref, "sigmoid")      # (bt, 1*16*16)
    o_ref[...] = a.astype(o_ref.dtype)


# --------------------------------------------------------------------------- #
# Wrapper: build fused layer matrices (once per call) + single pallas_call.
# --------------------------------------------------------------------------- #

@functools.partial(jax.jit, static_argnames=("batch_tile",))
def denoising_autoencoder_forward(params, x, batch_tile=8):
    n, c0, h0, w0 = x.shape
    k, s, pad = 3, 2, 1
    bt = batch_tile
    assert n % bt == 0, "batch must be divisible by batch_tile"

    # Spatial sizes through the network.
    h1, wd1 = (h0 + 2 * pad - k) // s + 1, (w0 + 2 * pad - k) // s + 1
    h2, wd2 = (h1 + 2 * pad - k) // s + 1, (wd1 + 2 * pad - k) // s + 1
    h3, wd3 = (h2 - 1) * s - 2 * pad + k + 1, (wd2 - 1) * s - 2 * pad + k + 1
    h4, wd4 = (h3 - 1) * s - 2 * pad + k + 1, (wd3 - 1) * s - 2 * pad + k + 1

    c4 = params["dec2_w"].shape[1]

    # Batch-independent tap maps (numpy, trace time only).
    t1 = _tap_id(h0, w0, h1, wd1, s, pad, k, transposed=False)
    t2 = _tap_id(h1, wd1, h2, wd2, s, pad, k, transposed=False)
    t3 = _tap_id(h2, wd2, h3, wd3, s, pad, k, transposed=True)
    t4 = _tap_id(h3, wd3, h4, wd4, s, pad, k, transposed=True)

    # Per-layer fused (Cin*P, Cout*Q) bf16 matrices (one-time XLA gather/reshape).
    m1 = _fused_layer_matrix(_conv_taps(params["enc1_w"]), t1)
    m2 = _fused_layer_matrix(_conv_taps(params["enc2_w"]), t2)
    m3 = _fused_layer_matrix(_convT_taps(params["dec1_w"]), t3)
    m4 = _fused_layer_matrix(_convT_taps(params["dec2_w"]), t4)

    b1 = _bias_row(params["enc1_b"], h1 * wd1)
    b2 = _bias_row(params["enc2_b"], h2 * wd2)
    b3 = _bias_row(params["dec1_b"], h3 * wd3)
    b4 = _bias_row(params["dec2_b"], h4 * wd4)

    # (N, C, H, W) -> (N, C*H*W): batch on sublanes, channel*pixels on lanes.
    x2d = x.reshape(n, c0 * h0 * w0)
    m_out = c4 * h4 * wd4

    def full(a):  # grid-invariant constant: fetched once (constant index_map)
        return pl.BlockSpec(a.shape, lambda i: (0,) * a.ndim)

    out2d = pl.pallas_call(
        _dae_fused_kernel,
        out_shape=jax.ShapeDtypeStruct((n, m_out), jnp.float32),
        grid=(n // bt,),
        in_specs=[
            pl.BlockSpec((bt, c0 * h0 * w0), lambda i: (i, 0)),
            full(m1), full(b1), full(m2), full(b2),
            full(m3), full(b3), full(m4), full(b4),
        ],
        out_specs=pl.BlockSpec((bt, m_out), lambda i: (i, 0)),
        compiler_params=pltpu.CompilerParams(
            dimension_semantics=("parallel",),
            vmem_limit_bytes=32 * 1024 * 1024),
    )(x2d, m1, b1, m2, b2, m3, b3, m4, b4)

    # (N, C_out*H*W) -> (N, C_out, H, W)
    return out2d.reshape(n, c4, h4, wd4)


# --------------------------------------------------------------------------- #
# Pure-JAX reference (exact PyTorch semantics) for a numerical self-check.
# --------------------------------------------------------------------------- #

def _ref_conv2d(x, w, b, stride, pad):
    out = jax.lax.conv_general_dilated(
        x, w, window_strides=(stride, stride),
        padding=[(pad, pad), (pad, pad)],
        dimension_numbers=("NCHW", "OIHW", "NCHW"),
        precision=jax.lax.Precision.HIGHEST)
    return out + b[None, :, None, None]


def _ref_conv_transpose2d(x, w, b, stride, pad, out_pad):
    k = w.shape[2]
    w_conv = jnp.flip(w, axis=(2, 3)).transpose(1, 0, 2, 3)   # (Cout, Cin, k, k)
    lo = k - 1 - pad
    out = jax.lax.conv_general_dilated(
        x, w_conv, window_strides=(1, 1),
        padding=[(lo, lo + out_pad), (lo, lo + out_pad)],
        lhs_dilation=(stride, stride),
        dimension_numbers=("NCHW", "OIHW", "NCHW"),
        precision=jax.lax.Precision.HIGHEST)
    return out + b[None, :, None, None]


@jax.jit
def _reference_forward(params, x):
    h = jax.nn.relu(_ref_conv2d(x, params["enc1_w"], params["enc1_b"], 2, 1))
    h = jax.nn.relu(_ref_conv2d(h, params["enc2_w"], params["enc2_b"], 2, 1))
    h = jax.nn.relu(_ref_conv_transpose2d(h, params["dec1_w"], params["dec1_b"], 2, 1, 1))
    h = jax.nn.sigmoid(_ref_conv_transpose2d(h, params["dec2_w"], params["dec2_b"], 2, 1, 1))
    return h


# --------------------------------------------------------------------------- #
# Param init + main.
# --------------------------------------------------------------------------- #

def init_params(key):
    ks = jax.random.split(key, 8)

    def winit(k_, shape, fan_in):
        return jax.random.normal(k_, shape, jnp.float32) / np.sqrt(fan_in)

    return {
        "enc1_w": winit(ks[0], (16, 1, 3, 3), 1 * 9),
        "enc1_b": 0.1 * jax.random.normal(ks[1], (16,), jnp.float32),
        "enc2_w": winit(ks[2], (32, 16, 3, 3), 16 * 9),
        "enc2_b": 0.1 * jax.random.normal(ks[3], (32,), jnp.float32),
        # ConvTranspose2d weights are (Cin, Cout, kH, kW) in PyTorch
        "dec1_w": winit(ks[4], (32, 16, 3, 3), 32 * 9),
        "dec1_b": 0.1 * jax.random.normal(ks[5], (16,), jnp.float32),
        "dec2_w": winit(ks[6], (16, 1, 3, 3), 16 * 9),
        "dec2_b": 0.1 * jax.random.normal(ks[7], (1,), jnp.float32),
    }


if __name__ == "__main__":
    key = jax.random.PRNGKey(0)
    pkey, xkey = jax.random.split(key)
    params = init_params(pkey)
    # NCHW input, 1 channel (MNIST-like).  batch=16 with batch_tile=8 keeps a
    # full sublane tile per step and a 2-long "parallel" grid (v7x megacore).
    x = jax.random.uniform(xkey, (16, 1, 16, 16), jnp.float32)

    y = denoising_autoencoder_forward(params, x, batch_tile=8)
    y = jax.block_until_ready(y)

    assert y.shape == (16, 1, 16, 16), y.shape
    assert y.dtype == jnp.float32
    assert bool(jnp.all(y >= 0.0)) and bool(jnp.all(y <= 1.0))  # sigmoid range

    # Numerical check vs exact f32 reference (bf16 MXU operands -> small drift).
    y_ref = jax.block_until_ready(_reference_forward(params, x))
    err = float(jnp.max(jnp.abs(y - y_ref)))
    assert err < 3e-2, f"max abs error vs reference: {err}"

    print("KERNEL_OK")
</pallas_src>

<mosaic_0001>
module attributes {stable_mosaic.version = 11 : i64} {
  func.func @_dae_fused_kernel(%arg0: i32, %arg1: memref<8x256xf32, #tpu.memory_space<vmem>>, %arg2: memref<256x1024xbf16, #tpu.memory_space<vmem>>, %arg3: memref<1x1024xf32, #tpu.memory_space<vmem>>, %arg4: memref<1024x512xbf16, #tpu.memory_space<vmem>>, %arg5: memref<1x512xf32, #tpu.memory_space<vmem>>, %arg6: memref<512x1024xbf16, #tpu.memory_space<vmem>>, %arg7: memref<1x1024xf32, #tpu.memory_space<vmem>>, %arg8: memref<1024x256xbf16, #tpu.memory_space<vmem>>, %arg9: memref<1x256xf32, #tpu.memory_space<vmem>>, %arg10: memref<8x256xf32, #tpu.memory_space<vmem>>) attributes {dimension_semantics = [#tpu.dimension_semantics<parallel>], iteration_bounds = array<i64: 2>, scalar_prefetch = 0 : i64, scratch_operands = 0 : i64, tpu.core_type = #tpu.core_type<tc>, window_params = [{transform_indices = @transform_0, window_bounds = array<i64: 8, 256>}, {pipeline_mode = #tpu.pipeline_mode<synchronous>, transform_indices = @transform_1, window_bounds = array<i64: 256, 1024>}, {pipeline_mode = #tpu.pipeline_mode<synchronous>, transform_indices = @transform_2, window_bounds = array<i64: 1, 1024>}, {pipeline_mode = #tpu.pipeline_mode<synchronous>, transform_indices = @transform_3, window_bounds = array<i64: 1024, 512>}, {pipeline_mode = #tpu.pipeline_mode<synchronous>, transform_indices = @transform_4, window_bounds = array<i64: 1, 512>}, {pipeline_mode = #tpu.pipeline_mode<synchronous>, transform_indices = @transform_5, window_bounds = array<i64: 512, 1024>}, {pipeline_mode = #tpu.pipeline_mode<synchronous>, transform_indices = @transform_6, window_bounds = array<i64: 1, 1024>}, {pipeline_mode = #tpu.pipeline_mode<synchronous>, transform_indices = @transform_7, window_bounds = array<i64: 1024, 256>}, {pipeline_mode = #tpu.pipeline_mode<synchronous>, transform_indices = @transform_8, window_bounds = array<i64: 1, 256>}, {transform_indices = @transform_9, window_bounds = array<i64: 8, 256>}]} {
    %c0 = arith.constant 0 : index
    %c0_0 = arith.constant 0 : index
    %0 = vector.load %arg1[%c0, %c0_0] : memref<8x256xf32, #tpu.memory_space<vmem>>, vector<8x256xf32>
    %1 = arith.truncf %0 : vector<8x256xf32> to vector<8x256xbf16>
    %c0_1 = arith.constant 0 : index
    %c0_2 = arith.constant 0 : index
    %2 = vector.load %arg2[%c0_1, %c0_2] : memref<256x1024xbf16, #tpu.memory_space<vmem>>, vector<256x1024xbf16>
    %cst = arith.constant dense<0.000000e+00> : vector<8x1024xf32>
    %3 = tpu.matmul %1, %2, %cst {dimension_numbers = #tpu.dot_dimension_numbers<[1], [0], [0], [1], [0, 0, 1, 1], [], []>} : vector<8x256xbf16>, vector<256x1024xbf16>, vector<8x1024xf32> -> vector<8x1024xf32>
    %c0_3 = arith.constant 0 : index
    %c0_4 = arith.constant 0 : index
    %4 = vector.load %arg3[%c0_3, %c0_4] : memref<1x1024xf32, #tpu.memory_space<vmem>>, vector<1x1024xf32>
    %5 = vector.broadcast %4 : vector<1x1024xf32> to vector<8x1024xf32>
    %6 = arith.addf %3, %5 : vector<8x1024xf32>
    %cst_5 = arith.constant 0.000000e+00 : f32
    %7 = vector.broadcast %cst_5 : f32 to vector<8x1024xf32>
    %8 = arith.maximumf %6, %7 : vector<8x1024xf32>
    %9 = arith.truncf %8 : vector<8x1024xf32> to vector<8x1024xbf16>
    %c0_6 = arith.constant 0 : index
    %c0_7 = arith.constant 0 : index
    %10 = vector.load %arg4[%c0_6, %c0_7] : memref<1024x512xbf16, #tpu.memory_space<vmem>>, vector<1024x512xbf16>
    %cst_8 = arith.constant dense<0.000000e+00> : vector<8x512xf32>
    %11 = tpu.matmul %9, %10, %cst_8 {dimension_numbers = #tpu.dot_dimension_numbers<[1], [0], [0], [1], [0, 0, 1, 1], [], []>} : vector<8x1024xbf16>, vector<1024x512xbf16>, vector<8x512xf32> -> vector<8x512xf32>
    %c0_9 = arith.constant 0 : index
    %c0_10 = arith.constant 0 : index
    %12 = vector.load %arg5[%c0_9, %c0_10] : memref<1x512xf32, #tpu.memory_space<vmem>>, vector<1x512xf32>
    %13 = vector.broadcast %12 : vector<1x512xf32> to vector<8x512xf32>
    %14 = arith.addf %11, %13 : vector<8x512xf32>
    %cst_11 = arith.constant 0.000000e+00 : f32
    %15 = vector.broadcast %cst_11 : f32 to vector<8x512xf32>
    %16 = arith.maximumf %14, %15 : vector<8x512xf32>
    %17 = arith.truncf %16 : vector<8x512xf32> to vector<8x512xbf16>
    %c0_12 = arith.constant 0 : index
    %c0_13 = arith.constant 0 : index
    %18 = vector.load %arg6[%c0_12, %c0_13] : memref<512x1024xbf16, #tpu.memory_space<vmem>>, vector<512x1024xbf16>
    %cst_14 = arith.constant dense<0.000000e+00> : vector<8x1024xf32>
    %19 = tpu.matmul %17, %18, %cst_14 {dimension_numbers = #tpu.dot_dimension_numbers<[1], [0], [0], [1], [0, 0, 1, 1], [], []>} : vector<8x512xbf16>, vector<512x1024xbf16>, vector<8x1024xf32> -> vector<8x1024xf32>
    %c0_15 = arith.constant 0 : index
    %c0_16 = arith.constant 0 : index
    %20 = vector.load %arg7[%c0_15, %c0_16] : memref<1x1024xf32, #tpu.memory_space<vmem>>, vector<1x1024xf32>
    %21 = vector.broadcast %20 : vector<1x1024xf32> to vector<8x1024xf32>
    %22 = arith.addf %19, %21 : vector<8x1024xf32>
    %cst_17 = arith.constant 0.000000e+00 : f32
    %23 = vector.broadcast %cst_17 : f32 to vector<8x1024xf32>
    %24 = arith.maximumf %22, %23 : vector<8x1024xf32>
    %25 = arith.truncf %24 : vector<8x1024xf32> to vector<8x1024xbf16>
    %c0_18 = arith.constant 0 : index
    %c0_19 = arith.constant 0 : index
    %26 = vector.load %arg8[%c0_18, %c0_19] : memref<1024x256xbf16, #tpu.memory_space<vmem>>, vector<1024x256xbf16>
    %cst_20 = arith.constant dense<0.000000e+00> : vector<8x256xf32>
    %27 = tpu.matmul %25, %26, %cst_20 {dimension_numbers = #tpu.dot_dimension_numbers<[1], [0], [0], [1], [0, 0, 1, 1], [], []>} : vector<8x1024xbf16>, vector<1024x256xbf16>, vector<8x256xf32> -> vector<8x256xf32>
    %c0_21 = arith.constant 0 : index
    %c0_22 = arith.constant 0 : index
    %28 = vector.load %arg9[%c0_21, %c0_22] : memref<1x256xf32, #tpu.memory_space<vmem>>, vector<1x256xf32>
    %29 = vector.broadcast %28 : vector<1x256xf32> to vector<8x256xf32>
    %30 = arith.addf %27, %29 : vector<8x256xf32>
    %31 = arith.negf %30 : vector<8x256xf32>
    %32 = math.exp %31 : vector<8x256xf32>
    %cst_23 = arith.constant 1.000000e+00 : f32
    %33 = vector.broadcast %cst_23 : f32 to vector<8x256xf32>
    %34 = arith.addf %33, %32 : vector<8x256xf32>
    %35 = arith.divf %33, %34 : vector<8x256xf32>
    %c0_24 = arith.constant 0 : index
    %c0_25 = arith.constant 0 : index
    %36 = vector.load %arg10[%c0_24, %c0_25] : memref<8x256xf32, #tpu.memory_space<vmem>>, vector<8x256xf32>
    tpu.vector_store %arg10[%c0_24, %c0_25], %35 {strides = array<i32>} : memref<8x256xf32, #tpu.memory_space<vmem>>, vector<8x256xf32>,
    return
  }
  func.func @transform_0(%arg0: i32) -> (i32, i32) {
    %c0_i32 = arith.constant 0 : i32
    %c0_i32_0 = arith.constant 0 : i32
    return %arg0, %c0_i32 : i32, i32
  }
  func.func @transform_1(%arg0: i32) -> (i32, i32) {
    %c0_i32 = arith.constant 0 : i32
    %c0_i32_0 = arith.constant 0 : i32
    %c0_i32_1 = arith.constant 0 : i32
    return %c0_i32, %c0_i32_0 : i32, i32
  }
  func.func @transform_2(%arg0: i32) -> (i32, i32) {
    %c0_i32 = arith.constant 0 : i32
    %c0_i32_0 = arith.constant 0 : i32
    %c0_i32_1 = arith.constant 0 : i32
    return %c0_i32, %c0_i32_0 : i32, i32
  }
  func.func @transform_3(%arg0: i32) -> (i32, i32) {
    %c0_i32 = arith.constant 0 : i32
    %c0_i32_0 = arith.constant 0 : i32
    %c0_i32_1 = arith.constant 0 : i32
    return %c0_i32, %c0_i32_0 : i32, i32
  }
  func.func @transform_4(%arg0: i32) -> (i32, i32) {
    %c0_i32 = arith.constant 0 : i32
    %c0_i32_0 = arith.constant 0 : i32
    %c0_i32_1 = arith.constant 0 : i32
    return %c0_i32, %c0_i32_0 : i32, i32
  }
  func.func @transform_5(%arg0: i32) -> (i32, i32) {
    %c0_i32 = arith.constant 0 : i32
    %c0_i32_0 = arith.constant 0 : i32
    %c0_i32_1 = arith.constant 0 : i32
    return %c0_i32, %c0_i32_0 : i32, i32
  }
  func.func @transform_6(%arg0: i32) -> (i32, i32) {
    %c0_i32 = arith.constant 0 : i32
    %c0_i32_0 = arith.constant 0 : i32
    %c0_i32_1 = arith.constant 0 : i32
    return %c0_i32, %c0_i32_0 : i32, i32
  }
  func.func @transform_7(%arg0: i32) -> (i32, i32) {
    %c0_i32 = arith.constant 0 : i32
    %c0_i32_0 = arith.constant 0 : i32
    %c0_i32_1 = arith.constant 0 : i32
    return %c0_i32, %c0_i32_0 : i32, i32
  }
  func.func @transform_8(%arg0: i32) -> (i32, i32) {
    %c0_i32 = arith.constant 0 : i32
    %c0_i32_0 = arith.constant 0 : i32
    %c0_i32_1 = arith.constant 0 : i32
    return %c0_i32, %c0_i32_0 : i32, i32
  }
  func.func @transform_9(%arg0: i32) -> (i32, i32) {
    %c0_i32 = arith.constant 0 : i32
    %c0_i32_0 = arith.constant 0 : i32
    return %arg0, %c0_i32 : i32, i32
  }
}

</mosaic_0001>

<bundles_post_ra>
// kernel: denoising_autoencoder_forward.1
= control target key start
LH: loop header
LB: loop body
LE: loop exit
PB: predicated region body
PF: predicated region fallthrough
CT: control target
= control target key end

     0   :  { %s7589_s30 = smov 0   ;;  %s10146_s0 = inlined_call_operand.vmem [shape: f32[16,256], index: 0, kind: input, shape index: {}]   ;;  %s10147_s1 = inlined_call_operand.vmem [shape: bf16[256,1024], index: 1, kind: input, shape index: {}]   ;;  %s10148_s2 = inlined_call_operand.vmem [shape: f32[1,1024], index: 2, kind: input, shape index: {}]   ;;  %s10149_s3 = inlined_call_operand.vmem [shape: bf16[1024,512], index: 3, kind: input, shape index: {}]   ;;  %s10150_s4 = inlined_call_operand.vmem [shape: f32[1,512], index: 4, kind: input, shape index: {}]   ;;  %s10151_s5 = inlined_call_operand.vmem [shape: bf16[512,1024], index: 5, kind: input, shape index: {}]   ;;  %s10152_s6 = inlined_call_operand.vmem [shape: f32[1,1024], index: 6, kind: input, shape index: {}]   ;;  %s10153_s7 = inlined_call_operand.vmem [shape: bf16[1024,256], index: 7, kind: input, shape index: {}]   ;;  %s10154_s8 = inlined_call_operand.vmem [shape: f32[1,256], index: 8, kind: input, shape index: {}]   ;;  %s10155_s9 = inlined_call_operand.vmem [shape: f32[16,256], index: 9, kind: output, shape index: {}]  }
   0x1 LB: > { %s6156_s10 = sadd.s32 4294967295, %s7537_s30   ;;  %p6160_p0 = scmp.ge.s32.totalorder %s7537_s30, 1  ;;  %s7537_s30 = sphi %s7589_s30, %s19_s30  }
   0x2   : > { %p287_p1 = scmp.lt.s32.totalorder %s7537_s30, 3 }
   0x4   : > { %p288_p2 = pnand %p6160_p0, %p287_p1 }
   0x5   : > { %p323_p3 = scmp.lt.s32.totalorder (!%p288_p2), %s6156_s10, 1 }
   0x6   : > { %291 = sbr.rel (%p288_p2) target bundleno = 1301 (0x515), region = 56 }
   0xb   : > { %v393_v0 = vld [vmem:[%s10147_s1 + $0x1c0] sm:$0xff]  ;;  %v394_v2 = vld [vmem:[%s10147_s1 + $0x1c8] sm:$0xff]  ;;  %s10157_s10 = smov (!%p323_p3, %s6156_s10), 1 }
   0xc   : > { %v397_v1 = vld [vmem:[%s10147_s1 + $0x1e0] sm:$0xff]  ;;  %v398_v4 = vld [vmem:[%s10147_s1 + $0x1e8] sm:$0xff]  ;;  %s6937_s21 = sshll.u32 %s10157_s10, 4 }
   0xd   : > { %v6222_v3 = vcombine.high %v393_v0, %v397_v1  ;;  %v6221_v5 = vcombine.low %v393_v0, %v397_v1  ;;  %v385_v6 = vld [vmem:[%s10147_s1 + $0x180] sm:$0xff]  ;;  %v6224_v8 = vcombine.high %v394_v2, %v398_v4  ;;  %v6223_v9 = vcombine.low %v394_v2, %v398_v4  ;;  %v386_v11 = vld [vmem:[%s10147_s1 + $0x188] sm:$0xff]  ;;  %s7687_s28 = scalar_lea.vmem %s10146_s0, %s6937_s21 }
   0xe   : > { %v389_v7 = vld [vmem:[%s10147_s1 + $0x1a0] sm:$0xff]  ;;  %v390_v12 = vld [vmem:[%s10147_s1 + $0x1a8] sm:$0xff] }
   0xf   : > { %v6214_v10 = vcombine.high %v385_v6, %v389_v7  ;;  %v377_v13 = vld [vmem:[%s10147_s1 + $0x140] sm:$0xff]  ;;  %1147 = vmatprep.subr.bf16.mxu0 %v6222_v3  ;;  %v6216_v14 = vcombine.high %v386_v11, %v390_v12  ;;  %v378_v16 = vld [vmem:[%s10147_s1 + $0x148] sm:$0xff]  ;;  %1188 = vmatprep.subr.bf16.mxu1 %v6224_v8  ;;  %v6213_v18 = vcombine.low %v385_v6, %v389_v7 }
  0x10   : > { %v381_v15 = vld [vmem:[%s10147_s1 + $0x160] sm:$0xff]  ;;  %v382_v17 = vld [vmem:[%s10147_s1 + $0x168] sm:$0xff]  ;;  %1148 = vmatpush1.bf16.msra.mxu0 %v6221_v5  ;;  %1189 = vmatpush1.bf16.msra.mxu1 %v6223_v9  ;;  %v6215_v19 = vcombine.low %v386_v11, %v390_v12 }
  0x11   : > { %1149 = vmatprep.subr.bf16.mxu0 %v6214_v10  ;;  %v6206_v20 = vcombine.high %v377_v13, %v381_v15  ;;  %1190 = vmatprep.subr.bf16.mxu1 %v6216_v14  ;;  %v6208_v21 = vcombine.high %v378_v16, %v382_v17  ;;  %v369_v22 = vld [vmem:[%s10147_s1 + $0x100] sm:$0xff]  ;;  %v370_v24 = vld [vmem:[%s10147_s1 + $0x108] sm:$0xff]  ;;  %v6205_v26 = vcombine.low %v377_v13, %v381_v15 }
  0x12   : > { %v373_v23 = vld [vmem:[%s10147_s1 + $0x120] sm:$0xff]  ;;  %v374_v25 = vld [vmem:[%s10147_s1 + $0x128] sm:$0xff]  ;;  %v6207_v27 = vcombine.low %v378_v16, %v382_v17 }
  0x13   : > { %v6198_v28 = vcombine.high %v369_v22, %v373_v23  ;;  %v6200_v29 = vcombine.high %v370_v24, %v374_v25  ;;  %v361_v30 = vld [vmem:[%s10147_s1 + $0xc0] sm:$0xff]  ;;  %v362_v32 = vld [vmem:[%s10147_s1 + $0xc8] sm:$0xff]  ;;  %v6197_v34 = vcombine.low %v369_v22, %v373_v23  ;;  %v6199_v35 = vcombine.low %v370_v24, %v374_v25 }
  0x14   : > { %1150 = vmatpush1.bf16.msra.mxu0 %v6213_v18  ;;  %1191 = vmatpush1.bf16.msra.mxu1 %v6215_v19  ;;  %v365_v31 = vld [vmem:[%s10147_s1 + $0xe0] sm:$0xff]  ;;  %v366_v33 = vld [vmem:[%s10147_s1 + $0xe8] sm:$0xff] }
  0x15   : > { %1151 = vmatprep.subr.bf16.mxu0 %v6206_v20  ;;  %1192 = vmatprep.subr.bf16.mxu1 %v6208_v21  ;;  %v6190_v36 = vcombine.high %v361_v30, %v365_v31  ;;  %v6192_v37 = vcombine.high %v362_v32, %v366_v33  ;;  %v353_v38 = vld [vmem:[%s10147_s1 + $0x80] sm:$0xff]  ;;  %v354_v40 = vld [vmem:[%s10147_s1 + $0x88] sm:$0xff]  ;;  %v6189_v42 = vcombine.low %v361_v30, %v365_v31 }
  0x16   : > { %v357_v39 = vld [vmem:[%s10147_s1 + $0xa0] sm:$0xff]  ;;  %v358_v41 = vld [vmem:[%s10147_s1 + $0xa8] sm:$0xff]  ;;  %v6191_v43 = vcombine.low %v362_v32, %v366_v33 }
  0x17   : > { %v6182_v44 = vcombine.high %v353_v38, %v357_v39  ;;  %v6184_v45 = vcombine.high %v354_v40, %v358_v41  ;;  %v345_v46 = vld [vmem:[%s10147_s1 + $0x40] sm:$0xff]  ;;  %v346_v48 = vld [vmem:[%s10147_s1 + $0x48] sm:$0xff]  ;;  %v6181_v50 = vcombine.low %v353_v38, %v357_v39  ;;  %v6183_v51 = vcombine.low %v354_v40, %v358_v41 }
  0x18   : > { %1152 = vmatpush1.bf16.msra.mxu0 %v6205_v26  ;;  %1193 = vmatpush1.bf16.msra.mxu1 %v6207_v27  ;;  %v349_v47 = vld [vmem:[%s10147_s1 + $0x60] sm:$0xff]  ;;  %v350_v49 = vld [vmem:[%s10147_s1 + $0x68] sm:$0xff] }
  0x19   : > { %1153 = vmatprep.subr.bf16.mxu0 %v6198_v28  ;;  %1194 = vmatprep.subr.bf16.mxu1 %v6200_v29  ;;  %v6174_v52 = vcombine.high %v345_v46, %v349_v47  ;;  %v334_v53 = vld [vmem:[%s7687_s28 + $0x8] sm:$0xff]  ;;  %v6176_v54 = vcombine.high %v346_v48, %v350_v49  ;;  %v337_v55 = vld [vmem:[%s10147_s1] sm:$0xff]  ;;  %v6173_v60 = vcombine.low %v345_v46, %v349_v47 }
  0x1a   : > { %v341_v56 = vld [vmem:[%s10147_s1 + $0x20] sm:$0xff]  ;;  %v7702_v57 = vpack.c.bf16 %v334_v53, %v334_v53  ;;  %v338_v58 = vld [vmem:[%s10147_s1 + $0x8] sm:$0xff]  ;;  %v6175_v61 = vcombine.low %v346_v48, %v350_v49 }
  0x1b   : > { %v342_v59 = vld [vmem:[%s10147_s1 + $0x28] sm:$0xff]  ;;  %v6166_v62 = vcombine.high %v337_v55, %v341_v56  ;;  %v457_v0 = vld [vmem:[%s10147_s1 + $0x3c0] sm:$0xff]  ;;  %v6165_v4 = vcombine.low %v337_v55, %v341_v56 }
  0x1c   : > { %1154 = vmatpush1.bf16.msra.mxu0 %v6197_v34  ;;  %1195 = vmatpush1.bf16.msra.mxu1 %v6199_v35  ;;  %v6168_v63 = vcombine.high %v338_v58, %v342_v59  ;;  %v461_v1 = vld [vmem:[%s10147_s1 + $0x3e0] sm:$0xff]  ;;  %v458_v2 = vld [vmem:[%s10147_s1 + $0x3c8] sm:$0xff]  ;;  %v6167_v5 = vcombine.low %v338_v58, %v342_v59 }
  0x1d   : > { %1155 = vmatprep.subr.bf16.mxu0 %v6190_v36  ;;  %1196 = vmatprep.subr.bf16.mxu1 %v6192_v37  ;;  %v462_v3 = vld [vmem:[%s10147_s1 + $0x3e8] sm:$0xff]  ;;  %v6286_v6 = vcombine.high %v457_v0, %v461_v1  ;;  %v449_v8 = vld [vmem:[%s10147_s1 + $0x380] sm:$0xff]  ;;  %v6285_v12 = vcombine.low %v457_v0, %v461_v1  ;;  %v395_v0 = vld [vmem:[%s10147_s1 + $0x1d0] sm:$0xff] }
  0x1e   : > { %1179 = vmatprep.mubr.bf16.mxu0 %v7702_v57  ;;  %1220 = vmatprep.mubr.bf16.mxu1 %v7702_v57  ;;  %v6288_v7 = vcombine.high %v458_v2, %v462_v3  ;;  %v453_v9 = vld [vmem:[%s10147_s1 + $0x3a0] sm:$0xff]  ;;  %v450_v10 = vld [vmem:[%s10147_s1 + $0x388] sm:$0xff]  ;;  %v6287_v13 = vcombine.low %v458_v2, %v462_v3  ;;  %v399_v1 = vld [vmem:[%s10147_s1 + $0x1f0] sm:$0xff] }
  0x1f   : > { %v454_v11 = vld [vmem:[%s10147_s1 + $0x3a8] sm:$0xff]  ;;  %v6278_v14 = vcombine.high %v449_v8, %v453_v9  ;;  %v441_v16 = vld [vmem:[%s10147_s1 + $0x340] sm:$0xff]  ;;  %v6277_v20 = vcombine.low %v449_v8, %v453_v9  ;;  %v396_v3 = vld [vmem:[%s10147_s1 + $0x1d8] sm:$0xff]  ;;  %v6226_v8 = vcombine.high %v395_v0, %v399_v1 }
  0x20   : > { %1156 = vmatpush1.bf16.msra.mxu0 %v6189_v42  ;;  %1197 = vmatpush1.bf16.msra.mxu1 %v6191_v43  ;;  %v6280_v15 = vcombine.high %v450_v10, %v454_v11  ;;  %v445_v17 = vld [vmem:[%s10147_s1 + $0x360] sm:$0xff]  ;;  %v442_v18 = vld [vmem:[%s10147_s1 + $0x348] sm:$0xff]  ;;  %v6279_v21 = vcombine.low %v450_v10, %v454_v11  ;;  %v387_v9 = vld [vmem:[%s10147_s1 + $0x190] sm:$0xff] }
  0x21   : > { %1157 = vmatprep.subr.bf16.mxu0 %v6182_v44  ;;  %1198 = vmatprep.subr.bf16.mxu1 %v6184_v45  ;;  %v446_v19 = vld [vmem:[%s10147_s1 + $0x368] sm:$0xff]  ;;  %v6270_v22 = vcombine.high %v441_v16, %v445_v17  ;;  %v433_v24 = vld [vmem:[%s10147_s1 + $0x300] sm:$0xff]  ;;  %v6269_v28 = vcombine.low %v441_v16, %v445_v17  ;;  %v391_v10 = vld [vmem:[%s10147_s1 + $0x1b0] sm:$0xff] }
  0x22   : > { %v6272_v23 = vcombine.high %v442_v18, %v446_v19  ;;  %v437_v25 = vld [vmem:[%s10147_s1 + $0x320] sm:$0xff]  ;;  %v434_v26 = vld [vmem:[%s10147_s1 + $0x308] sm:$0xff]  ;;  %v6271_v29 = vcombine.low %v442_v18, %v446_v19  ;;  %v6218_v17 = vcombine.high %v387_v9, %v391_v10  ;;  %v379_v18 = vld [vmem:[%s10147_s1 + $0x150] sm:$0xff] }
  0x23   : > { %v438_v27 = vld [vmem:[%s10147_s1 + $0x328] sm:$0xff]  ;;  %v6262_v30 = vcombine.high %v433_v24, %v437_v25  ;;  %v425_v32 = vld [vmem:[%s10147_s1 + $0x2c0] sm:$0xff]  ;;  %v6261_v36 = vcombine.low %v433_v24, %v437_v25  ;;  %v383_v19 = vld [vmem:[%s10147_s1 + $0x170] sm:$0xff] }
  0x24   : > { %1158 = vmatpush1.bf16.msra.mxu0 %v6181_v50  ;;  %1199 = vmatpush1.bf16.msra.mxu1 %v6183_v51  ;;  %v6264_v31 = vcombine.high %v434_v26, %v438_v27  ;;  %v429_v33 = vld [vmem:[%s10147_s1 + $0x2e0] sm:$0xff]  ;;  %v426_v34 = vld [vmem:[%s10147_s1 + $0x2c8] sm:$0xff]  ;;  %v6263_v37 = vcombine.low %v434_v26, %v438_v27  ;;  %v6210_v25 = vcombine.high %v379_v18, %v383_v19  ;;  %v371_v26 = vld [vmem:[%s10147_s1 + $0x110] sm:$0xff] }
  0x25   : > { %1159 = vmatprep.subr.bf16.mxu0 %v6174_v52  ;;  %1200 = vmatprep.subr.bf16.mxu1 %v6176_v54  ;;  %v430_v35 = vld [vmem:[%s10147_s1 + $0x2e8] sm:$0xff]  ;;  %v6254_v38 = vcombine.high %v425_v32, %v429_v33  ;;  %v417_v39 = vld [vmem:[%s10147_s1 + $0x280] sm:$0xff]  ;;  %v6253_v44 = vcombine.low %v425_v32, %v429_v33  ;;  %v375_v27 = vld [vmem:[%s10147_s1 + $0x130] sm:$0xff] }
  0x26   : > { %v421_v40 = vld [vmem:[%s10147_s1 + $0x2a0] sm:$0xff]  ;;  %v6256_v41 = vcombine.high %v426_v34, %v430_v35  ;;  %v418_v42 = vld [vmem:[%s10147_s1 + $0x288] sm:$0xff]  ;;  %v6255_v45 = vcombine.low %v426_v34, %v430_v35  ;;  %v6202_v33 = vcombine.high %v371_v26, %v375_v27  ;;  %v363_v34 = vld [vmem:[%s10147_s1 + $0xd0] sm:$0xff] }
  0x27   : > { %v422_v43 = vld [vmem:[%s10147_s1 + $0x2a8] sm:$0xff]  ;;  %v6246_v46 = vcombine.high %v417_v39, %v421_v40  ;;  %v409_v47 = vld [vmem:[%s10147_s1 + $0x240] sm:$0xff]  ;;  %v6245_v52 = vcombine.low %v417_v39, %v421_v40  ;;  %v367_v35 = vld [vmem:[%s10147_s1 + $0xf0] sm:$0xff] }
  0x28   : > { %1160 = vmatpush1.bf16.msra.mxu0 %v6173_v60  ;;  %1201 = vmatpush1.bf16.msra.mxu1 %v6175_v61  ;;  %v413_v48 = vld [vmem:[%s10147_s1 + $0x260] sm:$0xff]  ;;  %v6248_v49 = vcombine.high %v418_v42, %v422_v43  ;;  %v410_v50 = vld [vmem:[%s10147_s1 + $0x248] sm:$0xff]  ;;  %v6247_v53 = vcombine.low %v418_v42, %v422_v43  ;;  %v6194_v40 = vcombine.high %v363_v34, %v367_v35  ;;  %v359_v42 = vld [vmem:[%s10147_s1 + $0xb0] sm:$0xff] }
  0x29   : > { %1161 = vmatprep.subr.bf16.mxu0 %v6166_v62  ;;  %1202 = vmatprep.subr.bf16.mxu1 %v6168_v63  ;;  %v414_v51 = vld [vmem:[%s10147_s1 + $0x268] sm:$0xff]  ;;  %v6238_v54 = vcombine.high %v409_v47, %v413_v48  ;;  %v401_v55 = vld [vmem:[%s10147_s1 + $0x200] sm:$0xff]  ;;  %v6237_v61 = vcombine.low %v409_v47, %v413_v48  ;;  %v347_v47 = vld [vmem:[%s10147_s1 + $0x50] sm:$0xff] }
  0x2a   : > { %v405_v56 = vld [vmem:[%s10147_s1 + $0x220] sm:$0xff]  ;;  %v6240_v58 = vcombine.high %v410_v50, %v414_v51  ;;  %v402_v59 = vld [vmem:[%s10147_s1 + $0x208] sm:$0xff]  ;;  %v6239_v62 = vcombine.low %v410_v50, %v414_v51  ;;  %v351_v48 = vld [vmem:[%s10147_s1 + $0x70] sm:$0xff] }
  0x2b   : > { %v406_v60 = vld [vmem:[%s10147_s1 + $0x228] sm:$0xff]  ;;  %v6230_v63 = vcombine.high %v401_v55, %v405_v56  ;;  %v348_v51 = vld [vmem:[%s10147_s1 + $0x58] sm:$0xff] }
  0x2c   : > { %1162 = vmatpush1.bf16.msra.mxu0 %v6165_v4  ;;  %1203 = vmatpush1.bf16.msra.mxu1 %v6167_v5  ;;  %v6232_v2 = vcombine.high %v402_v59, %v406_v60  ;;  %v400_v4 = vld [vmem:[%s10147_s1 + $0x1f8] sm:$0xff]  ;;  %v6229_v5 = vcombine.low %v401_v55, %v405_v56  ;;  %v339_v55 = vld [vmem:[%s10147_s1 + $0x10] sm:$0xff] }
  0x2d   : > { %1163 = vmatprep.subr.bf16.mxu0 %v6286_v6  ;;  %1204 = vmatprep.subr.bf16.mxu1 %v6288_v7  ;;  %v333_v6 = vld [vmem:[%s7687_s28] sm:$0xff]  ;;  %v6231_v7 = vcombine.low %v402_v59, %v406_v60  ;;  %v6228_v11 = vcombine.high %v396_v3, %v400_v4  ;;  %v6227_v16 = vcombine.low %v396_v3, %v400_v4  ;;  %v343_v56 = vld [vmem:[%s10147_s1 + $0x30] sm:$0xff]  ;;  %v340_v60 = vld [vmem:[%s10147_s1 + $0x18] sm:$0xff]  ;;  %s332_s28 = scalar_lea.vmem %s10155_s9, %s6937_s21 }
  0x2e   : > { %v6178_v59 = vcombine.high %v347_v47, %v351_v48  ;;  %v6170_v3 = vcombine.high %v339_v55, %v343_v56  ;;  %v460_v4 = vld [vmem:[%s10147_s1 + $0x3d8] sm:$0xff] }
  0x30   : > { %1164 = vmatpush2.bf16.msra.mxu0 %v6285_v12  ;;  %1205 = vmatpush2.bf16.msra.mxu1 %v6287_v13  ;;  %v388_v12 = vld [vmem:[%s10147_s1 + $0x198] sm:$0xff]  ;;  %v7830_v13 = vpack.c.bf16 %v333_v6, %v333_v6 }
  0x31   : > { %1165 = vmatprep.subr.bf16.mxu0 %v6278_v14  ;;  %1206 = vmatprep.subr.bf16.mxu1 %v6280_v15  ;;  %v392_v14 = vld [vmem:[%s10147_s1 + $0x1b8] sm:$0xff]  ;;  %v6225_v15 = vcombine.low %v395_v0, %v399_v1  ;;  %v459_v0 = vld [vmem:[%s10147_s1 + $0x3d0] sm:$0xff] }
  0x32   : > { %v6219_v24 = vcombine.low %v388_v12, %v392_v14  ;;  %v463_v1 = vld [vmem:[%s10147_s1 + $0x3f0] sm:$0xff] }
  0x34   : > { %1166 = vmatpush2.bf16.msra.mxu0 %v6277_v20  ;;  %1207 = vmatpush2.bf16.msra.mxu1 %v6279_v21  ;;  %v6220_v20 = vcombine.high %v388_v12, %v392_v14  ;;  %v380_v21 = vld [vmem:[%s10147_s1 + $0x158] sm:$0xff] }
  0x35   : > { %1167 = vmatprep.subr.bf16.mxu0 %v6270_v22  ;;  %1208 = vmatprep.subr.bf16.mxu1 %v6272_v23  ;;  %v384_v22 = vld [vmem:[%s10147_s1 + $0x178] sm:$0xff]  ;;  %v6217_v23 = vcombine.low %v387_v9, %v391_v10  ;;  %v455_v9 = vld [vmem:[%s10147_s1 + $0x3b0] sm:$0xff] }
  0x36   : > { %v6211_v32 = vcombine.low %v380_v21, %v384_v22  ;;  %v452_v12 = vld [vmem:[%s10147_s1 + $0x398] sm:$0xff] }
  0x37   : > { %v456_v14 = vld [vmem:[%s10147_s1 + $0x3b8] sm:$0xff] }
  0x38   : > { %1168 = vmatpush2.bf16.msra.mxu0 %v6269_v28  ;;  %1209 = vmatpush2.bf16.msra.mxu1 %v6271_v29  ;;  %v6212_v28 = vcombine.high %v380_v21, %v384_v22  ;;  %v372_v29 = vld [vmem:[%s10147_s1 + $0x118] sm:$0xff] }
  0x39   : > { %1169 = vmatprep.subr.bf16.mxu0 %v6262_v30  ;;  %1210 = vmatprep.subr.bf16.mxu1 %v6264_v31  ;;  %v376_v30 = vld [vmem:[%s10147_s1 + $0x138] sm:$0xff]  ;;  %v6209_v31 = vcombine.low %v379_v18, %v383_v19  ;;  %v447_v18 = vld [vmem:[%s10147_s1 + $0x370] sm:$0xff] }
  0x3a   : > { %v6203_v39 = vcombine.low %v372_v29, %v376_v30  ;;  %v444_v21 = vld [vmem:[%s10147_s1 + $0x358] sm:$0xff] }
  0x3b   : > { %v448_v22 = vld [vmem:[%s10147_s1 + $0x378] sm:$0xff] }
  0x3c   : > { %1170 = vmatpush2.bf16.msra.mxu0 %v6261_v36  ;;  %1211 = vmatpush2.bf16.msra.mxu1 %v6263_v37  ;;  %v6204_v36 = vcombine.high %v372_v29, %v376_v30  ;;  %v368_v37 = vld [vmem:[%s10147_s1 + $0xf8] sm:$0xff] }
  0x3d   : > { %1171 = vmatprep.subr.bf16.mxu0 %v6254_v38  ;;  %1212 = vmatprep.subr.bf16.mxu1 %v6256_v41  ;;  %v6201_v38 = vcombine.low %v371_v26, %v375_v27  ;;  %v355_v41 = vld [vmem:[%s10147_s1 + $0x90] sm:$0xff]  ;;  %v6283_v27 = vcombine.low %v452_v12, %v456_v14  ;;  %v436_v29 = vld [vmem:[%s10147_s1 + $0x318] sm:$0xff] }
  0x3e   : > { %v6186_v50 = vcombine.high %v355_v41, %v359_v42  ;;  %v439_v26 = vld [vmem:[%s10147_s1 + $0x330] sm:$0xff]  ;;  %v440_v30 = vld [vmem:[%s10147_s1 + $0x338] sm:$0xff] }
  0x40   : > { %1172 = vmatpush2.bf16.msra.mxu0 %v6253_v44  ;;  %1213 = vmatpush2.bf16.msra.mxu1 %v6255_v45  ;;  %v356_v44 = vld [vmem:[%s10147_s1 + $0x98] sm:$0xff] }
  0x41   : > { %1173 = vmatprep.subr.bf16.mxu0 %v6246_v46  ;;  %1214 = vmatprep.subr.bf16.mxu1 %v6248_v49  ;;  %v360_v45 = vld [vmem:[%s10147_s1 + $0xb8] sm:$0xff]  ;;  %v6193_v46 = vcombine.low %v363_v34, %v367_v35  ;;  %v431_v34 = vld [vmem:[%s10147_s1 + $0x2f0] sm:$0xff]  ;;  %v6275_v35 = vcombine.low %v444_v21, %v448_v22 }
  0x44   : > { %1174 = vmatpush2.bf16.msra.mxu0 %v6245_v52  ;;  %1215 = vmatpush2.bf16.msra.mxu1 %v6247_v53  ;;  %v352_v52 = vld [vmem:[%s10147_s1 + $0x78] sm:$0xff]  ;;  %v6188_v53 = vcombine.high %v356_v44, %v360_v45 }
  0x45   : > { %1175 = vmatprep.subr.bf16.mxu0 %v6238_v54  ;;  %1216 = vmatprep.subr.bf16.mxu1 %v6240_v58  ;;  %v6185_v54 = vcombine.low %v355_v41, %v359_v42  ;;  %v6187_v58 = vcombine.low %v356_v44, %v360_v45  ;;  %v423_v41 = vld [vmem:[%s10147_s1 + $0x2b0] sm:$0xff]  ;;  %v6267_v42 = vcombine.low %v436_v29, %v440_v30  ;;  %v420_v44 = vld [vmem:[%s10147_s1 + $0x298] sm:$0xff] }
  0x46   : > { %v424_v45 = vld [vmem:[%s10147_s1 + $0x2b8] sm:$0xff] }
  0x48   : > { %1176 = vmatpush2.bf16.msra.mxu0 %v6237_v61  ;;  %1217 = vmatpush2.bf16.msra.mxu1 %v6239_v62  ;;  %v344_v61 = vld [vmem:[%s10147_s1 + $0x38] sm:$0xff]  ;;  %v6180_v62 = vcombine.high %v348_v51, %v352_v52 }
  0x49   : > { %1177 = vmatprep.subr.bf16.mxu0 %v6230_v63  ;;  %1218 = vmatprep.subr.bf16.mxu1 %v6232_v2  ;;  %v6177_v63 = vcombine.low %v347_v47, %v351_v48  ;;  %v6179_v2 = vcombine.low %v348_v51, %v352_v52  ;;  %v6172_v6 = vcombine.high %v340_v60, %v344_v61  ;;  %v411_v48 = vld [vmem:[%s10147_s1 + $0x250] sm:$0xff]  ;;  %v412_v52 = vld [vmem:[%s10147_s1 + $0x258] sm:$0xff] }
  0x4a   : > { %v6171_v10 = vcombine.low %v340_v60, %v344_v61  ;;  %v404_v61 = vld [vmem:[%s10147_s1 + $0x218] sm:$0xff] }
  0x4c   : > { %1178 = vmatpush2.bf16.msra.mxu0 %v6229_v5  ;;  %1219 = vmatpush2.bf16.msra.mxu1 %v6231_v7  ;;  %v464_v5 = vld [vmem:[%s10147_s1 + $0x3f8] sm:$0xff]  ;;  %v6169_v7 = vcombine.low %v339_v55, %v343_v56  ;;  %v403_v56 = vld [vmem:[%s10147_s1 + $0x210] sm:$0xff] }
  0x4d   : > { %1229 = vmatprep.subr.bf16.mxu0 %v6226_v8  ;;  %1270 = vmatprep.subr.bf16.mxu1 %v6228_v11  ;;  %v451_v8 = vld [vmem:[%s10147_s1 + $0x390] sm:$0xff]  ;;  %v6290_v11 = vcombine.high %v459_v0, %v463_v1  ;;  %v6291_v19 = vcombine.low %v460_v4, %v464_v5 }
  0x4f   : > { %1180 = vmatmul.mubr.bf16.vlgmr.msra.gmra.mxu0 %v7830_v13  ;;  %1221 = vmatmul.mubr.bf16.vlgmr.msra.gmra.mxu1 %v7830_v13 }
  0x50   : > { %1230 = vmatpush1.bf16.msra.mxu0 %v6225_v15  ;;  %1271 = vmatpush1.bf16.msra.mxu1 %v6227_v16  ;;  %v6292_v15 = vcombine.high %v460_v4, %v464_v5  ;;  %v6289_v16 = vcombine.low %v459_v0, %v463_v1  ;;  %v6949_v4 = vld [vmem:[%s10149_s3 + $0xe4] ss:$16 sps:$4 sm:$0xff]  }
  0x51   : > { %1231 = vmatprep.subr.bf16.mxu0 %v6218_v17  ;;  %1272 = vmatprep.subr.bf16.mxu1 %v6220_v20  ;;  %v443_v17 = vld [vmem:[%s10147_s1 + $0x350] sm:$0xff]  ;;  %v6282_v20 = vcombine.high %v451_v8, %v455_v9 }
  0x52   : > { %1261 = vmatprep.mubr.bf16.mxu0 %v7702_v57  ;;  %1302 = vmatprep.mubr.bf16.mxu1 %v7702_v57  ;;  %v364_v57 = vld [vmem:[%s10147_s1 + $0xd8] sm:$0xff] }
  0x53   : > { %v6196_v43 = vcombine.high %v364_v57, %v368_v37  ;;  %v6195_v49 = vcombine.low %v364_v57, %v368_v37  ;;  %v428_v57 = vld [vmem:[%s10147_s1 + $0x2d8] sm:$0xff] }
  0x54   : > { %1232 = vmatpush1.bf16.msra.mxu0 %v6217_v23  ;;  %1273 = vmatpush1.bf16.msra.mxu1 %v6219_v24  ;;  %v6284_v23 = vcombine.high %v452_v12, %v456_v14  ;;  %v6281_v24 = vcombine.low %v451_v8, %v455_v9  ;;  %v432_v37 = vld [vmem:[%s10147_s1 + $0x2f8] sm:$0xff]  ;;  %v6947_v8 = vld [vmem:[%s10149_s3 + $0xe0] ss:$16 sps:$4 sm:$0xff]  }
  0x55   : > { %1233 = vmatprep.subr.bf16.mxu0 %v6210_v25  ;;  %1274 = vmatprep.subr.bf16.mxu1 %v6212_v28  ;;  %v435_v25 = vld [vmem:[%s10147_s1 + $0x310] sm:$0xff]  ;;  %v6274_v28 = vcombine.high %v443_v17, %v447_v18 }
  0x56   : > { %v6950_v9 = vld [vmem:[%s10149_s3 + $0x2e0] ss:$16 sps:$4 sm:$0xff]  }
  0x57   : > { %v6953_v12 = vld [vmem:[%s10149_s3 + $0xc0] ss:$16 sps:$4 sm:$0xff]  }
  0x58   : > { %1234 = vmatpush1.bf16.msra.mxu0 %v6209_v31  ;;  %1275 = vmatpush1.bf16.msra.mxu1 %v6211_v32  ;;  %v6276_v31 = vcombine.high %v444_v21, %v448_v22  ;;  %v6273_v32 = vcombine.low %v443_v17, %v447_v18  ;;  %v6956_v14 = vld [vmem:[%s10149_s3 + $0x2c0] ss:$16 sps:$4 sm:$0xff]   ;;  %v6967_v18 = vld [vmem:[%s10149_s3 + $0x84] ss:$16 sps:$4 sm:$0xff]  }
  0x59   : > { %1235 = vmatprep.subr.bf16.mxu0 %v6202_v33  ;;  %1276 = vmatprep.subr.bf16.mxu1 %v6204_v36  ;;  %v427_v33 = vld [vmem:[%s10147_s1 + $0x2d0] sm:$0xff]  ;;  %v6266_v36 = vcombine.high %v435_v25, %v439_v26 }
  0x5a   : > { %v6257_v47 = vcombine.low %v427_v33, %v431_v34  ;;  %v6959_v17 = vld [vmem:[%s10149_s3 + $0xa0] ss:$16 sps:$4 sm:$0xff]   ;;  %v6973_v22 = vld [vmem:[%s10149_s3 + $0x64] ss:$16 sps:$4 sm:$0xff]  }
  0x5b   : > { %v6968_v21 = vld [vmem:[%s10149_s3 + $0x280] ss:$16 sps:$4 sm:$0xff]  }
  0x5c   : > { %1236 = vmatpush1.bf16.msra.mxu0 %v6201_v38  ;;  %1277 = vmatpush1.bf16.msra.mxu1 %v6203_v39  ;;  %v6268_v38 = vcombine.high %v436_v29, %v440_v30  ;;  %v6265_v39 = vcombine.low %v435_v25, %v439_v26  ;;  %v6974_v25 = vld [vmem:[%s10149_s3 + $0x260] ss:$16 sps:$4 sm:$0xff]   ;;  %v6979_v26 = vld [vmem:[%s10149_s3 + $0x44] ss:$16 sps:$4 sm:$0xff]  }
  0x5d   : > { %1237 = vmatprep.subr.bf16.mxu0 %v6194_v40  ;;  %1278 = vmatprep.subr.bf16.mxu1 %v6196_v43  ;;  %v419_v40 = vld [vmem:[%s10147_s1 + $0x290] sm:$0xff]  ;;  %v6258_v43 = vcombine.high %v427_v33, %v431_v34 }
  0x5e   : > { %v6250_v51 = vcombine.high %v419_v40, %v423_v41  ;;  %v6249_v55 = vcombine.low %v419_v40, %v423_v41  ;;  %v6980_v29 = vld [vmem:[%s10149_s3 + $0x240] ss:$16 sps:$4 sm:$0xff]   ;;  %v6985_v30 = vld [vmem:[%s10149_s3 + $0x24] ss:$16 sps:$4 sm:$0xff]  }
  0x5f   : > { %v6986_v33 = vld [vmem:[%s10149_s3 + $0x220] ss:$16 sps:$4 sm:$0xff]   ;;  %v6991_v34 = vld [vmem:[%s10149_s3 + $0x4] ss:$16 sps:$4 sm:$0xff]  }
  0x60   : > { %1238 = vmatpush1.bf16.msra.mxu0 %v6193_v46  ;;  %1279 = vmatpush1.bf16.msra.mxu1 %v6195_v49  ;;  %v6260_v46 = vcombine.high %v428_v57, %v432_v37  ;;  %v415_v49 = vld [vmem:[%s10147_s1 + $0x270] sm:$0xff] }
  0x61   : > { %1239 = vmatprep.subr.bf16.mxu0 %v6186_v50  ;;  %1280 = vmatprep.subr.bf16.mxu1 %v6188_v53  ;;  %v6259_v50 = vcombine.low %v428_v57, %v432_v37  ;;  %v416_v53 = vld [vmem:[%s10147_s1 + $0x278] sm:$0xff]  ;;  %v6242_v60 = vcombine.high %v411_v48, %v415_v49  ;;  %v6241_v0 = vcombine.low %v411_v48, %v415_v49  ;;  %v6992_v57 = vld [vmem:[%s10149_s3 + $0x200] ss:$16 sps:$4 sm:$0xff]   ;;  %v6997_v37 = vld [vmem:[%s10149_s3 + $0x1e4] ss:$16 sps:$4 sm:$0xff]  }
  0x62   : > { %v6243_v1 = vcombine.low %v412_v52, %v416_v53  ;;  %v6998_v40 = vld [vmem:[%s10149_s3 + $0x3e0] ss:$16 sps:$4 sm:$0xff]   ;;  %v7003_v41 = vld [vmem:[%s10149_s3 + $0x1c4] ss:$16 sps:$4 sm:$0xff]  }
  0x63   : > { %v7010_v48 = vld [vmem:[%s10149_s3 + $0x3a0] ss:$16 sps:$4 sm:$0xff]   ;;  %v7015_v49 = vld [vmem:[%s10149_s3 + $0x184] ss:$16 sps:$4 sm:$0xff]  }
  0x64   : > { %1240 = vmatpush1.bf16.msra.mxu0 %v6185_v54  ;;  %1281 = vmatpush1.bf16.msra.mxu1 %v6187_v58  ;;  %v6252_v54 = vcombine.high %v420_v44, %v424_v45  ;;  %v407_v58 = vld [vmem:[%s10147_s1 + $0x230] sm:$0xff] }
  0x65   : > { %1241 = vmatprep.subr.bf16.mxu0 %v6178_v59  ;;  %1282 = vmatprep.subr.bf16.mxu1 %v6180_v62  ;;  %v6251_v59 = vcombine.low %v420_v44, %v424_v45  ;;  %v408_v62 = vld [vmem:[%s10147_s1 + $0x238] sm:$0xff]  ;;  %v6233_v5 = vcombine.low %v403_v56, %v407_v58  ;;  %v7004_v44 = vld [vmem:[%s10149_s3 + $0x3c0] ss:$16 sps:$4 sm:$0xff]   ;;  %v7009_v45 = vld [vmem:[%s10149_s3 + $0x1a4] ss:$16 sps:$4 sm:$0xff]  }
  0x68   : > { %1242 = vmatpush1.bf16.msra.mxu0 %v6177_v63  ;;  %1283 = vmatpush1.bf16.msra.mxu1 %v6179_v2  ;;  %v6244_v63 = vcombine.high %v412_v52, %v416_v53  ;;  %v6234_v2 = vcombine.high %v403_v56, %v407_v58  ;;  %v7016_v52 = vld [vmem:[%s10149_s3 + $0x380] ss:$16 sps:$4 sm:$0xff]   ;;  %v7021_v53 = vld [vmem:[%s10149_s3 + $0x164] ss:$16 sps:$4 sm:$0xff]  }
  0x69   : > { %1243 = vmatprep.subr.bf16.mxu0 %v6170_v3  ;;  %1284 = vmatprep.subr.bf16.mxu1 %v6172_v6  ;;  %v6236_v3 = vcombine.high %v404_v61, %v408_v62  ;;  %v6952_v6 = vld [vmem:[%s10149_s3 + $0x2e4] ss:$16 sps:$4 sm:$0xff]   ;;  %v7022_v56 = vld [vmem:[%s10149_s3 + $0x360] ss:$16 sps:$4 sm:$0xff]  }
  0x6a   : > { %v7027_v58 = vld [vmem:[%s10149_s3 + $0x144] ss:$16 sps:$4 sm:$0xff]  }
  0x6c   : > { %1244 = vmatpush1.bf16.msra.mxu0 %v6169_v7  ;;  %1285 = vmatpush1.bf16.msra.mxu1 %v6171_v10  ;;  %v6235_v7 = vcombine.low %v404_v61, %v408_v62  ;;  %v6955_v10 = vld [vmem:[%s10149_s3 + $0xc4] ss:$16 sps:$4 sm:$0xff]   ;;  %v7028_v61 = vld [vmem:[%s10149_s3 + $0x340] ss:$16 sps:$4 sm:$0xff]  }
  0x6d   : > { %1245 = vmatprep.subr.bf16.mxu0 %v6290_v11  ;;  %1286 = vmatprep.subr.bf16.mxu1 %v6292_v15  ;;  %v6958_v11 = vld [vmem:[%s10149_s3 + $0x2c4] ss:$16 sps:$4 sm:$0xff]  }
  0x6e   : > { %v6961_v15 = vld [vmem:[%s10149_s3 + $0xa4] ss:$16 sps:$4 sm:$0xff]  }
  0x6f   : > { %v7033_v62 = vld [vmem:[%s10149_s3 + $0x124] ss:$16 sps:$4 sm:$0xff]  }
  0x70   : > { %1246 = vmatpush2.bf16.msra.mxu0 %v6289_v16  ;;  %1287 = vmatpush2.bf16.msra.mxu1 %v6291_v19  ;;  %v6964_v16 = vld [vmem:[%s10149_s3 + $0x2a4] ss:$16 sps:$4 sm:$0xff]  }
  0x71   : > { %1247 = vmatprep.subr.bf16.mxu0 %v6282_v20  ;;  %1288 = vmatprep.subr.bf16.mxu1 %v6284_v23  ;;  %v6970_v19 = vld [vmem:[%s10149_s3 + $0x284] ss:$16 sps:$4 sm:$0xff]   ;;  %v6965_v20 = vld [vmem:[%s10149_s3 + $0x80] ss:$16 sps:$4 sm:$0xff]  }
  0x72   : > { %v6976_v23 = vld [vmem:[%s10149_s3 + $0x264] ss:$16 sps:$4 sm:$0xff]  }
  0x74   : > { %1248 = vmatpush2.bf16.msra.mxu0 %v6281_v24  ;;  %1289 = vmatpush2.bf16.msra.mxu1 %v6283_v27  ;;  %v6971_v24 = vld [vmem:[%s10149_s3 + $0x60] ss:$16 sps:$4 sm:$0xff]   ;;  %v6982_v27 = vld [vmem:[%s10149_s3 + $0x244] ss:$16 sps:$4 sm:$0xff]  }
  0x75   : > { %1249 = vmatprep.subr.bf16.mxu0 %v6274_v28  ;;  %1290 = vmatprep.subr.bf16.mxu1 %v6276_v31  ;;  %v6977_v28 = vld [vmem:[%s10149_s3 + $0x40] ss:$16 sps:$4 sm:$0xff]   ;;  %v6988_v31 = vld [vmem:[%s10149_s3 + $0x224] ss:$16 sps:$4 sm:$0xff]  }
  0x78   : > { %1250 = vmatpush2.bf16.msra.mxu0 %v6273_v32  ;;  %1291 = vmatpush2.bf16.msra.mxu1 %v6275_v35  ;;  %v6983_v32 = vld [vmem:[%s10149_s3 + $0x20] ss:$16 sps:$4 sm:$0xff]   ;;  %v6994_v35 = vld [vmem:[%s10149_s3 + $0x204] ss:$16 sps:$4 sm:$0xff]  }
  0x79   : > { %1251 = vmatprep.subr.bf16.mxu0 %v6266_v36  ;;  %1292 = vmatprep.subr.bf16.mxu1 %v6268_v38  ;;  %v6989_v36 = vld [vmem:[%s10149_s3] ss:$16 sps:$4 sm:$0xff]   ;;  %v7000_v38 = vld [vmem:[%s10149_s3 + $0x3e4] ss:$16 sps:$4 sm:$0xff]  }
  0x7c   : > { %1252 = vmatpush2.bf16.msra.mxu0 %v6265_v39  ;;  %1293 = vmatpush2.bf16.msra.mxu1 %v6267_v42  ;;  %v6995_v39 = vld [vmem:[%s10149_s3 + $0x1e0] ss:$16 sps:$4 sm:$0xff]   ;;  %v7006_v42 = vld [vmem:[%s10149_s3 + $0x3c4] ss:$16 sps:$4 sm:$0xff]  }
  0x7d   : > { %1253 = vmatprep.subr.bf16.mxu0 %v6258_v43  ;;  %1294 = vmatprep.subr.bf16.mxu1 %v6260_v46  ;;  %v7001_v43 = vld [vmem:[%s10149_s3 + $0x1c0] ss:$16 sps:$4 sm:$0xff]   ;;  %v7012_v46 = vld [vmem:[%s10149_s3 + $0x3a4] ss:$16 sps:$4 sm:$0xff]  }
  0x80   : > { %1254 = vmatpush2.bf16.msra.mxu0 %v6257_v47  ;;  %1295 = vmatpush2.bf16.msra.mxu1 %v6259_v50  ;;  %v7007_v47 = vld [vmem:[%s10149_s3 + $0x1a0] ss:$16 sps:$4 sm:$0xff]   ;;  %v7018_v50 = vld [vmem:[%s10149_s3 + $0x384] ss:$16 sps:$4 sm:$0xff]  }
  0x81   : > { %1255 = vmatprep.subr.bf16.mxu0 %v6250_v51  ;;  %1296 = vmatprep.subr.bf16.mxu1 %v6252_v54  ;;  %v7013_v51 = vld [vmem:[%s10149_s3 + $0x180] ss:$16 sps:$4 sm:$0xff]   ;;  %v7024_v54 = vld [vmem:[%s10149_s3 + $0x364] ss:$16 sps:$4 sm:$0xff]  }
  0x84   : > { %1256 = vmatpush2.bf16.msra.mxu0 %v6249_v55  ;;  %1297 = vmatpush2.bf16.msra.mxu1 %v6251_v59  ;;  %v7019_v55 = vld [vmem:[%s10149_s3 + $0x160] ss:$16 sps:$4 sm:$0xff]   ;;  %v7030_v59 = vld [vmem:[%s10149_s3 + $0x344] ss:$16 sps:$4 sm:$0xff]  }
  0x85   : > { %1257 = vmatprep.subr.bf16.mxu0 %v6242_v60  ;;  %1298 = vmatprep.subr.bf16.mxu1 %v6244_v63  ;;  %v7025_v60 = vld [vmem:[%s10149_s3 + $0x140] ss:$16 sps:$4 sm:$0xff]   ;;  %v7036_v63 = vld [vmem:[%s10149_s3 + $0x324] ss:$16 sps:$4 sm:$0xff]  }
  0x88   : > { %1258 = vmatpush2.bf16.msra.mxu0 %v6241_v0  ;;  %1299 = vmatpush2.bf16.msra.mxu1 %v6243_v1  ;;  %v7031_v0 = vld [vmem:[%s10149_s3 + $0x120] ss:$16 sps:$4 sm:$0xff]  }
  0x89   : > { %1259 = vmatprep.subr.bf16.mxu0 %v6234_v2  ;;  %1300 = vmatprep.subr.bf16.mxu1 %v6236_v3  ;;  %v7034_v1 = vld [vmem:[%s10149_s3 + $0x320] ss:$16 sps:$4 sm:$0xff]   ;;  %v7039_v2 = vld [vmem:[%s10149_s3 + $0x104] ss:$16 sps:$4 sm:$0xff]  }
  0x8a   : > { %v7042_v3 = vld [vmem:[%s10149_s3 + $0x304] ss:$16 sps:$4 sm:$0xff]  }
  0x8c   : > { %1260 = vmatpush2.bf16.msra.mxu0 %v6233_v5  ;;  %1301 = vmatpush2.bf16.msra.mxu1 %v6235_v7  ;;  %v7040_v5 = vld [vmem:[%s10149_s3 + $0x300] ss:$16 sps:$4 sm:$0xff]   ;;  %v7048_v7 = vld [vmem:[%s10149_s3 + $0x6e4] ss:$16 sps:$4 sm:$0xff]  }
  0x8d   : > { %2885 = vmatprep.subr.bf16.mxu0 %v6949_v4  ;;  %2926 = vmatprep.subr.bf16.mxu1 %v6952_v6  ;;  %v7037_v4 = vld [vmem:[%s10149_s3 + $0x100] ss:$16 sps:$4 sm:$0xff]   ;;  %v7045_v6 = vld [vmem:[%s10149_s3 + $0x4e4] ss:$16 sps:$4 sm:$0xff]  }
  0x8f   : > { %1262 = vmatmul.mubr.bf16.vlgmr.msra.gmra.mxu0 %v7830_v13  ;;  %1303 = vmatmul.mubr.bf16.vlgmr.msra.gmra.mxu1 %v7830_v13  ;;  %v6962_v13 = vld [vmem:[%s10149_s3 + $0x2a0] ss:$16 sps:$4 sm:$0xff]  }
  0x90   : > { %2886 = vmatpush1.bf16.msra.mxu0 %v6947_v8  ;;  %2927 = vmatpush1.bf16.msra.mxu1 %v6950_v9  ;;  %v467_v8 = vlaneseq }
  0x91   : > { %2887 = vmatprep.subr.bf16.mxu0 %v6955_v10  ;;  %2928 = vmatprep.subr.bf16.mxu1 %v6958_v11  ;;  %v8215_v11 = vld [vmem:[%s10148_s2] sm:$0xff] }
  0x92   : > { %v8207_v9 = vshrl.u32 %v467_v8, 7  ;;  %v7094_v8 = vld [vmem:[%s10149_s3 + $0x7e0] ss:$16 sps:$4 sm:$0xff]  }
  0x94   : > { %2888 = vmatpush1.bf16.msra.mxu0 %v6953_v12  ;;  %2929 = vmatpush1.bf16.msra.mxu1 %v6956_v14  ;;  %v8210_v10 = vsub.s32 0, %v8207_v9  ;;  %v8218_v12 = vsub.s32 2, %v8207_v9  ;;  %v8221_v14 = vsub.s32 1, %v8207_v9 }
  0x95   : > { %2889 = vmatprep.subr.bf16.mxu0 %v6961_v15  ;;  %2930 = vmatprep.subr.bf16.mxu1 %v6964_v16  ;;  %v8224_v15 = vsub.s32 3, %v8207_v9 }
  0x96   : > { %v470_v16 = vrot.slane %v8215_v11, %v8210_v10 }
  0x98   : > { %2890 = vmatpush1.bf16.msra.mxu0 %v6959_v17  ;;  %2931 = vmatpush1.bf16.msra.mxu1 %v6962_v13  ;;  %v478_v17 = vrot.slane %v8215_v11, %v8218_v12  ;;  %v474_v13 = vrot.slane %v8215_v11, %v8221_v14 }
  0x99   : > { %2891 = vmatprep.subr.bf16.mxu0 %v6967_v18  ;;  %2932 = vmatprep.subr.bf16.mxu1 %v6970_v19  ;;  %v482_v19 = vrot.slane %v8215_v11, %v8224_v15 }
  0x9c   : > { %2892 = vmatpush1.bf16.msra.mxu0 %v6965_v20  ;;  %2933 = vmatpush1.bf16.msra.mxu1 %v6968_v21 }
  0x9d   : > { %2893 = vmatprep.subr.bf16.mxu0 %v6973_v22  ;;  %2934 = vmatprep.subr.bf16.mxu1 %v6976_v23 }
  0xa0   : > { %2894 = vmatpush1.bf16.msra.mxu0 %v6971_v24  ;;  %2935 = vmatpush1.bf16.msra.mxu1 %v6974_v25 }
  0xa1   : > { %2895 = vmatprep.subr.bf16.mxu0 %v6979_v26  ;;  %2936 = vmatprep.subr.bf16.mxu1 %v6982_v27 }
  0xa4   : > { %2896 = vmatpush1.bf16.msra.mxu0 %v6977_v28  ;;  %2937 = vmatpush1.bf16.msra.mxu1 %v6980_v29 }
  0xa5   : > { %2897 = vmatprep.subr.bf16.mxu0 %v6985_v30  ;;  %2938 = vmatprep.subr.bf16.mxu1 %v6988_v31 }
  0xa8   : > { %2898 = vmatpush1.bf16.msra.mxu0 %v6983_v32  ;;  %2939 = vmatpush1.bf16.msra.mxu1 %v6986_v33 }
  0xa9   : > { %2899 = vmatprep.subr.bf16.mxu0 %v6991_v34  ;;  %2940 = vmatprep.subr.bf16.mxu1 %v6994_v35 }
  0xac   : > { %2900 = vmatpush1.bf16.msra.mxu0 %v6989_v36  ;;  %2941 = vmatpush1.bf16.msra.mxu1 %v6992_v57  ;;  %v7043_v57 = vld [vmem:[%s10149_s3 + $0x4e0] ss:$16 sps:$4 sm:$0xff]  }
  0xad   : > { %2901 = vmatprep.subr.bf16.mxu0 %v6997_v37  ;;  %2942 = vmatprep.subr.bf16.mxu1 %v7000_v38 }
  0xb0   : > { %2902 = vmatpush2.bf16.msra.mxu0 %v6995_v39  ;;  %2943 = vmatpush2.bf16.msra.mxu1 %v6998_v40  ;;  %v7046_v39 = vld [vmem:[%s10149_s3 + $0x6e0] ss:$16 sps:$4 sm:$0xff]   ;;  %v7051_v40 = vld [vmem:[%s10149_s3 + $0x4c4] ss:$16 sps:$4 sm:$0xff]  }
  0xb1   : > { %2903 = vmatprep.subr.bf16.mxu0 %v7003_v41  ;;  %2944 = vmatprep.subr.bf16.mxu1 %v7006_v42  ;;  %v7054_v41 = vld [vmem:[%s10149_s3 + $0x6c4] ss:$16 sps:$4 sm:$0xff]   ;;  %v7049_v42 = vld [vmem:[%s10149_s3 + $0x4c0] ss:$16 sps:$4 sm:$0xff]  }
  0xb4   : > { %2904 = vmatpush2.bf16.msra.mxu0 %v7001_v43  ;;  %2945 = vmatpush2.bf16.msra.mxu1 %v7004_v44  ;;  %v7052_v43 = vld [vmem:[%s10149_s3 + $0x6c0] ss:$16 sps:$4 sm:$0xff]   ;;  %v7057_v44 = vld [vmem:[%s10149_s3 + $0x4a4] ss:$16 sps:$4 sm:$0xff]  }
  0xb5   : > { %2905 = vmatprep.subr.bf16.mxu0 %v7009_v45  ;;  %2946 = vmatprep.subr.bf16.mxu1 %v7012_v46  ;;  %v7060_v45 = vld [vmem:[%s10149_s3 + $0x6a4] ss:$16 sps:$4 sm:$0xff]   ;;  %v7055_v46 = vld [vmem:[%s10149_s3 + $0x4a0] ss:$16 sps:$4 sm:$0xff]  }
  0xb8   : > { %2906 = vmatpush2.bf16.msra.mxu0 %v7007_v47  ;;  %2947 = vmatpush2.bf16.msra.mxu1 %v7010_v48  ;;  %v7058_v47 = vld [vmem:[%s10149_s3 + $0x6a0] ss:$16 sps:$4 sm:$0xff]   ;;  %v7063_v48 = vld [vmem:[%s10149_s3 + $0x484] ss:$16 sps:$4 sm:$0xff]  }
  0xb9   : > { %2907 = vmatprep.subr.bf16.mxu0 %v7015_v49  ;;  %2948 = vmatprep.subr.bf16.mxu1 %v7018_v50  ;;  %v7066_v49 = vld [vmem:[%s10149_s3 + $0x684] ss:$16 sps:$4 sm:$0xff]   ;;  %v7061_v50 = vld [vmem:[%s10149_s3 + $0x480] ss:$16 sps:$4 sm:$0xff]  }
  0xbc   : > { %2908 = vmatpush2.bf16.msra.mxu0 %v7013_v51  ;;  %2949 = vmatpush2.bf16.msra.mxu1 %v7016_v52  ;;  %v7064_v51 = vld [vmem:[%s10149_s3 + $0x680] ss:$16 sps:$4 sm:$0xff]   ;;  %v7069_v52 = vld [vmem:[%s10149_s3 + $0x464] ss:$16 sps:$4 sm:$0xff]  }
  0xbd   : > { %2909 = vmatprep.subr.bf16.mxu0 %v7021_v53  ;;  %2950 = vmatprep.subr.bf16.mxu1 %v7024_v54  ;;  %v7072_v53 = vld [vmem:[%s10149_s3 + $0x664] ss:$16 sps:$4 sm:$0xff]   ;;  %v7067_v54 = vld [vmem:[%s10149_s3 + $0x460] ss:$16 sps:$4 sm:$0xff]  }
  0xc0   : > { %2910 = vmatpush2.bf16.msra.mxu0 %v7019_v55  ;;  %2951 = vmatpush2.bf16.msra.mxu1 %v7022_v56  ;;  %v7070_v55 = vld [vmem:[%s10149_s3 + $0x660] ss:$16 sps:$4 sm:$0xff]   ;;  %v7075_v56 = vld [vmem:[%s10149_s3 + $0x444] ss:$16 sps:$4 sm:$0xff]  }
  0xc1   : > { %2911 = vmatprep.subr.bf16.mxu0 %v7027_v58  ;;  %2952 = vmatprep.subr.bf16.mxu1 %v7030_v59  ;;  %v7078_v58 = vld [vmem:[%s10149_s3 + $0x644] ss:$16 sps:$4 sm:$0xff]   ;;  %v7073_v59 = vld [vmem:[%s10149_s3 + $0x440] ss:$16 sps:$4 sm:$0xff]  }
  0xc4   : > { %2912 = vmatpush2.bf16.msra.mxu0 %v7025_v60  ;;  %2953 = vmatpush2.bf16.msra.mxu1 %v7028_v61  ;;  %v7076_v60 = vld [vmem:[%s10149_s3 + $0x640] ss:$16 sps:$4 sm:$0xff]   ;;  %v7081_v61 = vld [vmem:[%s10149_s3 + $0x424] ss:$16 sps:$4 sm:$0xff]  }
  0xc5   : > { %2913 = vmatprep.subr.bf16.mxu0 %v7033_v62  ;;  %2954 = vmatprep.subr.bf16.mxu1 %v7036_v63  ;;  %v7084_v62 = vld [vmem:[%s10149_s3 + $0x624] ss:$16 sps:$4 sm:$0xff]   ;;  %v7079_v63 = vld [vmem:[%s10149_s3 + $0x420] ss:$16 sps:$4 sm:$0xff]  }
  0xc8   : > { %2914 = vmatpush2.bf16.msra.mxu0 %v7031_v0  ;;  %2955 = vmatpush2.bf16.msra.mxu1 %v7034_v1  ;;  %v7082_v0 = vld [vmem:[%s10149_s3 + $0x620] ss:$16 sps:$4 sm:$0xff]   ;;  %v7087_v1 = vld [vmem:[%s10149_s3 + $0x404] ss:$16 sps:$4 sm:$0xff]  }
  0xc9   : > { %2915 = vmatprep.subr.bf16.mxu0 %v7039_v2  ;;  %2956 = vmatprep.subr.bf16.mxu1 %v7042_v3  ;;  %v7090_v2 = vld [vmem:[%s10149_s3 + $0x604] ss:$16 sps:$4 sm:$0xff]   ;;  %v7085_v3 = vld [vmem:[%s10149_s3 + $0x400] ss:$16 sps:$4 sm:$0xff]  }
  0xcc   : > { %2916 = vmatpush2.bf16.msra.mxu0 %v7037_v4  ;;  %2957 = vmatpush2.bf16.msra.mxu1 %v7040_v5  ;;  %v7088_v4 = vld [vmem:[%s10149_s3 + $0x600] ss:$16 sps:$4 sm:$0xff]   ;;  %v7093_v5 = vld [vmem:[%s10149_s3 + $0x5e4] ss:$16 sps:$4 sm:$0xff]  }
  0xcd   : > { %2967 = vmatprep.subr.bf16.mxu0 %v7045_v6  ;;  %3008 = vmatprep.subr.bf16.mxu1 %v7048_v7  ;;  %v7096_v6 = vld [vmem:[%s10149_s3 + $0x7e4] ss:$16 sps:$4 sm:$0xff]   ;;  %v7091_v7 = vld [vmem:[%s10149_s3 + $0x5e0] ss:$16 sps:$4 sm:$0xff]  }
 0x10f   : > { %v1181_v18 = vpop.f32.mrf.mxu0  ;;  %v1222_v21 = vpop.f32.mrf.mxu1 }
 0x110   : > { %v1182_v20 = vadd.f32 %v1181_v18, %v470_v16  ;;  %v1223_v22 = vadd.f32 %v1222_v21, %v478_v17  ;;  %v7099_v16 = vld [vmem:[%s10149_s3 + $0x5c4] ss:$16 sps:$4 sm:$0xff]   ;;  %v7100_v18 = vld [vmem:[%s10149_s3 + $0x7c0] ss:$16 sps:$4 sm:$0xff]  }
 0x111   : > { %v1183_v23 = vpop.f32.mrf.mxu0  ;;  %v1224_v25 = vpop.f32.mrf.mxu1  ;;  %v7102_v17 = vld [vmem:[%s10149_s3 + $0x7c4] ss:$16 sps:$4 sm:$0xff]   ;;  %v7103_v21 = vld [vmem:[%s10149_s3 + $0x5a0] ss:$16 sps:$4 sm:$0xff]  }
 0x112   : > { %v1184_v24 = vadd.f32 %v1183_v23, %v474_v13  ;;  %v1311_v26 = vmax.f32 %v1182_v20, 0.0  ;;  %v1313_v27 = vmax.f32 %v1223_v22, 0.0  ;;  %v1225_v28 = vadd.f32 %v1224_v25, %v482_v19  ;;  %v7097_v13 = vld [vmem:[%s10149_s3 + $0x5c0] ss:$16 sps:$4 sm:$0xff]   ;;  %v7105_v19 = vld [vmem:[%s10149_s3 + $0x5a4] ss:$16 sps:$4 sm:$0xff]  }
 0x113   : > { %v1185_v29 = vpop.f32.mrf.mxu0  ;;  %v1226_v31 = vpop.f32.mrf.mxu1  ;;  %v7108_v20 = vld [vmem:[%s10149_s3 + $0x7a4] ss:$16 sps:$4 sm:$0xff]   ;;  %v7106_v22 = vld [vmem:[%s10149_s3 + $0x7a0] ss:$16 sps:$4 sm:$0xff]  }
 0x114   : > { %v1312_v30 = vmax.f32 %v1184_v24, 0.0  ;;  %v1314_v32 = vmax.f32 %v1225_v28, 0.0  ;;  %v8234_v34 = vpack.c.bf16 %v1313_v27, %v1313_v27  ;;  %v8241_v37 = vpack.c.bf16 %v1311_v26, %v1311_v26  ;;  %v7111_v23 = vld [vmem:[%s10149_s3 + $0x584] ss:$16 sps:$4 sm:$0xff]   ;;  %v7109_v25 = vld [vmem:[%s10149_s3 + $0x580] ss:$16 sps:$4 sm:$0xff]  }
 0x115   : > { %v1186_v33 = vpop.f32.mrf.mxu0  ;;  %v1227_v36 = vpop.f32.mrf.mxu1  ;;  %v7114_v24 = vld [vmem:[%s10149_s3 + $0x784] ss:$16 sps:$4 sm:$0xff]   ;;  %v7112_v26 = vld [vmem:[%s10149_s3 + $0x780] ss:$16 sps:$4 sm:$0xff]  }
 0x116   : > { %v8236_v35 = vpack.c.bf16 %v1312_v30, %v1312_v30  ;;  %v8243_v38 = vpack.c.bf16 %v1314_v32, %v1314_v32  ;;  %v7117_v27 = vld [vmem:[%s10149_s3 + $0x564] ss:$16 sps:$4 sm:$0xff]   ;;  %v7115_v29 = vld [vmem:[%s10149_s3 + $0x560] ss:$16 sps:$4 sm:$0xff]   ;;  %v485_v33 = vsub.s32 4, %v8207_v9  ;;  %v493_v36 = vsub.s32 6, %v8207_v9 }
 0x117   : > { %v7120_v28 = vld [vmem:[%s10149_s3 + $0x764] ss:$16 sps:$4 sm:$0xff]   ;;  %v7118_v30 = vld [vmem:[%s10149_s3 + $0x760] ss:$16 sps:$4 sm:$0xff]  }
 0x118   : > { %2917 = vmatprep.mubr.bf16.mxu0 %v8236_v35  ;;  %2958 = vmatprep.mubr.bf16.mxu1 %v8243_v38  ;;  %v7123_v31 = vld [vmem:[%s10149_s3 + $0x544] ss:$16 sps:$4 sm:$0xff]  }
 0x119   : > { %2918 = vmatmul.mubr.bf16.vlgmr.msra.gmra.mxu0 %v8241_v37  ;;  %2959 = vmatmul.mubr.bf16.vlgmr.msra.gmra.mxu1 %v8234_v34  ;;  %v7126_v32 = vld [vmem:[%s10149_s3 + $0x744] ss:$16 sps:$4 sm:$0xff]  }
 0x11a   : > { %2968 = vmatpush1.bf16.msra.mxu0 %v7043_v57  ;;  %3009 = vmatpush1.bf16.msra.mxu1 %v7046_v39  ;;  %v7121_v57 = vld [vmem:[%s10149_s3 + $0x540] ss:$16 sps:$4 sm:$0xff]   ;;  %v489_v39 = vsub.s32 5, %v8207_v9 }
 0x11b   : > { %2969 = vmatprep.subr.bf16.mxu0 %v7051_v40  ;;  %3010 = vmatprep.subr.bf16.mxu1 %v7054_v41  ;;  %v7124_v40 = vld [vmem:[%s10149_s3 + $0x740] ss:$16 sps:$4 sm:$0xff]   ;;  %v7129_v41 = vld [vmem:[%s10149_s3 + $0x524] ss:$16 sps:$4 sm:$0xff]  }
 0x11e   : > { %2970 = vmatpush1.bf16.msra.mxu0 %v7049_v42  ;;  %3011 = vmatpush1.bf16.msra.mxu1 %v7052_v43  ;;  %v497_v42 = vsub.s32 7, %v8207_v9  ;;  %v486_v43 = vrot.slane %v8215_v11, %v485_v33 }
 0x11f   : > { %2971 = vmatprep.subr.bf16.mxu0 %v7057_v44  ;;  %3012 = vmatprep.subr.bf16.mxu1 %v7060_v45  ;;  %v7132_v44 = vld [vmem:[%s10149_s3 + $0x724] ss:$16 sps:$4 sm:$0xff]   ;;  %v494_v45 = vrot.slane %v8215_v11, %v493_v36 }
 0x122   : > { %2972 = vmatpush1.bf16.msra.mxu0 %v7055_v46  ;;  %3013 = vmatpush1.bf16.msra.mxu1 %v7058_v47  ;;  %v7127_v46 = vld [vmem:[%s10149_s3 + $0x520] ss:$16 sps:$4 sm:$0xff]   ;;  %v490_v47 = vrot.slane %v8215_v11, %v489_v39 }
 0x123   : > { %2973 = vmatprep.subr.bf16.mxu0 %v7063_v48  ;;  %3014 = vmatprep.subr.bf16.mxu1 %v7066_v49  ;;  %v7130_v49 = vld [vmem:[%s10149_s3 + $0x720] ss:$16 sps:$4 sm:$0xff]  }
 0x126   : > { %2974 = vmatpush1.bf16.msra.mxu0 %v7061_v50  ;;  %3015 = vmatpush1.bf16.msra.mxu1 %v7064_v51  ;;  %v498_v50 = vrot.slane %v8215_v11, %v497_v42  ;;  %v7135_v51 = vld [vmem:[%s10149_s3 + $0x504] ss:$16 sps:$4 sm:$0xff]   ;;  %v7133_v11 = vld [vmem:[%s10149_s3 + $0x500] ss:$16 sps:$4 sm:$0xff]  }
 0x127   : > { %2975 = vmatprep.subr.bf16.mxu0 %v7069_v52  ;;  %3016 = vmatprep.subr.bf16.mxu1 %v7072_v53 }
 0x12a   : > { %2976 = vmatpush1.bf16.msra.mxu0 %v7067_v54  ;;  %3017 = vmatpush1.bf16.msra.mxu1 %v7070_v55  ;;  %v7138_v54 = vld [vmem:[%s10149_s3 + $0x704] ss:$16 sps:$4 sm:$0xff]  }
 0x12b   : > { %2977 = vmatprep.subr.bf16.mxu0 %v7075_v56  ;;  %3018 = vmatprep.subr.bf16.mxu1 %v7078_v58 }
 0x12e   : > { %2978 = vmatpush1.bf16.msra.mxu0 %v7073_v59  ;;  %3019 = vmatpush1.bf16.msra.mxu1 %v7076_v60 }
 0x12f   : > { %2979 = vmatprep.subr.bf16.mxu0 %v7081_v61  ;;  %3020 = vmatprep.subr.bf16.mxu1 %v7084_v62 }
 0x132   : > { %2980 = vmatpush1.bf16.msra.mxu0 %v7079_v63  ;;  %3021 = vmatpush1.bf16.msra.mxu1 %v7082_v0  ;;  %v7136_v0 = vld [vmem:[%s10149_s3 + $0x700] ss:$16 sps:$4 sm:$0xff]  }
 0x133   : > { %2981 = vmatprep.subr.bf16.mxu0 %v7087_v1  ;;  %3022 = vmatprep.subr.bf16.mxu1 %v7090_v2  ;;  %v7141_v1 = vld [vmem:[%s10149_s3 + $0xec] ss:$16 sps:$4 sm:$0xff]  }
 0x136   : > { %2982 = vmatpush1.bf16.msra.mxu0 %v7085_v3  ;;  %3023 = vmatpush1.bf16.msra.mxu1 %v7088_v4  ;;  %v7144_v4 = vld [vmem:[%s10149_s3 + $0x2ec] ss:$16 sps:$4 sm:$0xff]  }
 0x137   : > { %2983 = vmatprep.subr.bf16.mxu0 %v7093_v5  ;;  %3024 = vmatprep.subr.bf16.mxu1 %v7096_v6 }
 0x13a   : > { %2984 = vmatpush2.bf16.msra.mxu0 %v7091_v7  ;;  %3025 = vmatpush2.bf16.msra.mxu1 %v7094_v8 }
 0x13b   : > { %2985 = vmatprep.subr.bf16.mxu0 %v7099_v16  ;;  %3026 = vmatprep.subr.bf16.mxu1 %v7102_v17  ;;  %v7139_v17 = vld [vmem:[%s10149_s3 + $0xe8] ss:$16 sps:$4 sm:$0xff]  }
 0x13e   : > { %2986 = vmatpush2.bf16.msra.mxu0 %v7097_v13  ;;  %3027 = vmatpush2.bf16.msra.mxu1 %v7100_v18 }
 0x13f   : > { %2987 = vmatprep.subr.bf16.mxu0 %v7105_v19  ;;  %3028 = vmatprep.subr.bf16.mxu1 %v7108_v20  ;;  %v7142_v19 = vld [vmem:[%s10149_s3 + $0x2e8] ss:$16 sps:$4 sm:$0xff]   ;;  %v7147_v20 = vld [vmem:[%s10149_s3 + $0xcc] ss:$16 sps:$4 sm:$0xff]  }
 0x142   : > { %2988 = vmatpush2.bf16.msra.mxu0 %v7103_v21  ;;  %3029 = vmatpush2.bf16.msra.mxu1 %v7106_v22  ;;  %v7150_v21 = vld [vmem:[%s10149_s3 + $0x2cc] ss:$16 sps:$4 sm:$0xff]   ;;  %v7145_v22 = vld [vmem:[%s10149_s3 + $0xc8] ss:$16 sps:$4 sm:$0xff]  }
 0x143   : > { %2989 = vmatprep.subr.bf16.mxu0 %v7111_v23  ;;  %3030 = vmatprep.subr.bf16.mxu1 %v7114_v24  ;;  %v7148_v23 = vld [vmem:[%s10149_s3 + $0x2c8] ss:$16 sps:$4 sm:$0xff]   ;;  %v7153_v24 = vld [vmem:[%s10149_s3 + $0xac] ss:$16 sps:$4 sm:$0xff]  }
 0x146   : > { %2990 = vmatpush2.bf16.msra.mxu0 %v7109_v25  ;;  %3031 = vmatpush2.bf16.msra.mxu1 %v7112_v26  ;;  %v7156_v25 = vld [vmem:[%s10149_s3 + $0x2ac] ss:$16 sps:$4 sm:$0xff]   ;;  %v7154_v26 = vld [vmem:[%s10149_s3 + $0x2a8] ss:$16 sps:$4 sm:$0xff]  }
 0x147   : > { %2991 = vmatprep.subr.bf16.mxu0 %v7117_v27  ;;  %3032 = vmatprep.subr.bf16.mxu1 %v7120_v28  ;;  %v7162_v27 = vld [vmem:[%s10149_s3 + $0x28c] ss:$16 sps:$4 sm:$0xff]   ;;  %v7157_v28 = vld [vmem:[%s10149_s3 + $0x88] ss:$16 sps:$4 sm:$0xff]  }
 0x14a   : > { %2992 = vmatpush2.bf16.msra.mxu0 %v7115_v29  ;;  %3033 = vmatpush2.bf16.msra.mxu1 %v7118_v30  ;;  %v7160_v29 = vld [vmem:[%s10149_s3 + $0x288] ss:$16 sps:$4 sm:$0xff]   ;;  %v7165_v30 = vld [vmem:[%s10149_s3 + $0x6c] ss:$16 sps:$4 sm:$0xff]  }
 0x14b   : > { %2993 = vmatprep.subr.bf16.mxu0 %v7123_v31  ;;  %3034 = vmatprep.subr.bf16.mxu1 %v7126_v32  ;;  %v7168_v31 = vld [vmem:[%s10149_s3 + $0x26c] ss:$16 sps:$4 sm:$0xff]   ;;  %v7163_v32 = vld [vmem:[%s10149_s3 + $0x68] ss:$16 sps:$4 sm:$0xff]  }
 0x14e   : > { %2994 = vmatpush2.bf16.msra.mxu0 %v7121_v57  ;;  %3035 = vmatpush2.bf16.msra.mxu1 %v7124_v40  ;;  %v7166_v57 = vld [vmem:[%s10149_s3 + $0x268] ss:$16 sps:$4 sm:$0xff]   ;;  %v7171_v40 = vld [vmem:[%s10149_s3 + $0x4c] ss:$16 sps:$4 sm:$0xff]  }
 0x14f   : > { %v1263_v48 = vpop.f32.mrf.mxu0  ;;  %2995 = vmatprep.subr.bf16.mxu0 %v7129_v41  ;;  %v1304_v53 = vpop.f32.mrf.mxu1  ;;  %3036 = vmatprep.subr.bf16.mxu1 %v7132_v44  ;;  %v7174_v41 = vld [vmem:[%s10149_s3 + $0x24c] ss:$16 sps:$4 sm:$0xff]   ;;  %v7172_v44 = vld [vmem:[%s10149_s3 + $0x248] ss:$16 sps:$4 sm:$0xff]  }
 0x150   : > { %v1264_v52 = vadd.f32 %v1263_v48, %v486_v43  ;;  %v1305_v55 = vadd.f32 %v1304_v53, %v494_v45  ;;  %v7169_v43 = vld [vmem:[%s10149_s3 + $0x48] ss:$16 sps:$4 sm:$0xff]   ;;  %v7177_v45 = vld [vmem:[%s10149_s3 + $0x2c] ss:$16 sps:$4 sm:$0xff]  }
 0x151   : > { %v1265_v56 = vpop.f32.mrf.mxu0  ;;  %v1306_v59 = vpop.f32.mrf.mxu1  ;;  %v7178_v48 = vld [vmem:[%s10149_s3 + $0x228] ss:$16 sps:$4 sm:$0xff]   ;;  %v7189_v53 = vld [vmem:[%s10149_s3 + $0x1ec] ss:$16 sps:$4 sm:$0xff]  }
 0x152   : > { %v1266_v58 = vadd.f32 %v1265_v56, %v490_v47  ;;  %2996 = vmatpush2.bf16.msra.mxu0 %v7127_v46  ;;  %v1315_v60 = vmax.f32 %v1264_v52, 0.0  ;;  %v1317_v61 = vmax.f32 %v1305_v55, 0.0  ;;  %v1307_v62 = vadd.f32 %v1306_v59, %v498_v50  ;;  %3037 = vmatpush2.bf16.msra.mxu1 %v7130_v49  ;;  %v7180_v46 = vld [vmem:[%s10149_s3 + $0x22c] ss:$16 sps:$4 sm:$0xff]   ;;  %v7175_v47 = vld [vmem:[%s10149_s3 + $0x28] ss:$16 sps:$4 sm:$0xff]  }
 0x153   : > { %v1267_v63 = vpop.f32.mrf.mxu0  ;;  %2997 = vmatprep.subr.bf16.mxu0 %v7135_v51  ;;  %v1308_v3 = vpop.f32.mrf.mxu1  ;;  %3038 = vmatprep.subr.bf16.mxu1 %v7138_v54  ;;  %v7183_v49 = vld [vmem:[%s10149_s3 + $0xc] ss:$16 sps:$4 sm:$0xff]   ;;  %v7181_v51 = vld [vmem:[%s10149_s3 + $0x8] ss:$16 sps:$4 sm:$0xff]  }
 0x154   : > { %v1316_v2 = vmax.f32 %v1266_v58, 0.0  ;;  %v1318_v5 = vmax.f32 %v1307_v62, 0.0  ;;  %v8454_v7 = vpack.c.bf16 %v1317_v61, %v1317_v61  ;;  %v8461_v13 = vpack.c.bf16 %v1315_v60, %v1315_v60  ;;  %v7186_v50 = vld [vmem:[%s10149_s3 + $0x20c] ss:$16 sps:$4 sm:$0xff]   ;;  %v7184_v52 = vld [vmem:[%s10149_s3 + $0x208] ss:$16 sps:$4 sm:$0xff]  }
 0x155   : > { %v1268_v6 = vpop.f32.mrf.mxu0  ;;  %v1309_v16 = vpop.f32.mrf.mxu1  ;;  %v7192_v54 = vld [vmem:[%s10149_s3 + $0x3ec] ss:$16 sps:$4 sm:$0xff]   ;;  %v7187_v55 = vld [vmem:[%s10149_s3 + $0x1e8] ss:$16 sps:$4 sm:$0xff]  }
 0x156   : > { %v8456_v8 = vpack.c.bf16 %v1316_v2, %v1316_v2  ;;  %2998 = vmatpush2.bf16.msra.mxu0 %v7133_v11  ;;  %v8463_v18 = vpack.c.bf16 %v1318_v5, %v1318_v5  ;;  %3039 = vmatpush2.bf16.msra.mxu1 %v7136_v0  ;;  %v7190_v56 = vld [vmem:[%s10149_s3 + $0x3e8] ss:$16 sps:$4 sm:$0xff]   ;;  %v7195_v58 = vld [vmem:[%s10149_s3 + $0x1cc] ss:$16 sps:$4 sm:$0xff]  }
 0x157   : > { %3049 = vmatprep.subr.bf16.mxu0 %v7141_v1  ;;  %3090 = vmatprep.subr.bf16.mxu1 %v7144_v4  ;;  %v7198_v59 = vld [vmem:[%s10149_s3 + $0x3cc] ss:$16 sps:$4 sm:$0xff]   ;;  %v7193_v11 = vld [vmem:[%s10149_s3 + $0x1c8] ss:$16 sps:$4 sm:$0xff]  }
 0x158   : > { %2999 = vmatprep.mubr.bf16.mxu0 %v8456_v8  ;;  %3040 = vmatprep.mubr.bf16.mxu1 %v8463_v18  ;;  %v7196_v60 = vld [vmem:[%s10149_s3 + $0x3c8] ss:$16 sps:$4 sm:$0xff]   ;;  %v7201_v61 = vld [vmem:[%s10149_s3 + $0x1ac] ss:$16 sps:$4 sm:$0xff]  }
 0x159   : > { %3000 = vmatmul.mubr.bf16.vlgmr.msra.gmra.mxu0 %v8461_v13  ;;  %3041 = vmatmul.mubr.bf16.vlgmr.msra.gmra.mxu1 %v8454_v7  ;;  %v7204_v62 = vld [vmem:[%s10149_s3 + $0x3ac] ss:$16 sps:$4 sm:$0xff]   ;;  %v7199_v63 = vld [vmem:[%s10149_s3 + $0x1a8] ss:$16 sps:$4 sm:$0xff]  }
 0x15a   : > { %3050 = vmatpush1.bf16.msra.mxu0 %v7139_v17  ;;  %3091 = vmatpush1.bf16.msra.mxu1 %v7142_v19  ;;  %v7202_v0 = vld [vmem:[%s10149_s3 + $0x3a8] ss:$16 sps:$4 sm:$0xff]   ;;  %v7207_v1 = vld [vmem:[%s10149_s3 + $0x18c] ss:$16 sps:$4 sm:$0xff]  }
 0x15b   : > { %3081 = vmatprep.mubr.bf16.mxu0 %v8236_v35  ;;  %3122 = vmatprep.mubr.bf16.mxu1 %v8243_v38  ;;  %v7151_v35 = vld [vmem:[%s10149_s3 + $0xa8] ss:$16 sps:$4 sm:$0xff]   ;;  %v7159_v38 = vld [vmem:[%s10149_s3 + $0x8c] ss:$16 sps:$4 sm:$0xff]  }
 0x15c   : > { %3051 = vmatprep.subr.bf16.mxu0 %v7147_v20  ;;  %3092 = vmatprep.subr.bf16.mxu1 %v7150_v21  ;;  %v7210_v2 = vld [vmem:[%s10149_s3 + $0x38c] ss:$16 sps:$4 sm:$0xff]   ;;  %v7205_v3 = vld [vmem:[%s10149_s3 + $0x188] ss:$16 sps:$4 sm:$0xff]  }
 0x15d   : > { %v7208_v4 = vld [vmem:[%s10149_s3 + $0x388] ss:$16 sps:$4 sm:$0xff]   ;;  %v7213_v5 = vld [vmem:[%s10149_s3 + $0x16c] ss:$16 sps:$4 sm:$0xff]  }
 0x15e   : > { %3052 = vmatpush1.bf16.msra.mxu0 %v7145_v22  ;;  %3093 = vmatpush1.bf16.msra.mxu1 %v7148_v23  ;;  %v7216_v6 = vld [vmem:[%s10149_s3 + $0x36c] ss:$16 sps:$4 sm:$0xff]   ;;  %v7211_v16 = vld [vmem:[%s10149_s3 + $0x168] ss:$16 sps:$4 sm:$0xff]  }
 0x15f   : > { %3053 = vmatprep.subr.bf16.mxu0 %v7153_v24  ;;  %3094 = vmatprep.subr.bf16.mxu1 %v7156_v25  ;;  %v7214_v17 = vld [vmem:[%s10149_s3 + $0x368] ss:$16 sps:$4 sm:$0xff]   ;;  %v7219_v19 = vld [vmem:[%s10149_s3 + $0x14c] ss:$16 sps:$4 sm:$0xff]  }
 0x160   : > { %v7222_v20 = vld [vmem:[%s10149_s3 + $0x34c] ss:$16 sps:$4 sm:$0xff]   ;;  %v7217_v21 = vld [vmem:[%s10149_s3 + $0x148] ss:$16 sps:$4 sm:$0xff]  }
 0x161   : > { %v7220_v22 = vld [vmem:[%s10149_s3 + $0x348] ss:$16 sps:$4 sm:$0xff]   ;;  %v7225_v23 = vld [vmem:[%s10149_s3 + $0x12c] ss:$16 sps:$4 sm:$0xff]  }
 0x162   : > { %3054 = vmatpush1.bf16.msra.mxu0 %v7151_v35  ;;  %3095 = vmatpush1.bf16.msra.mxu1 %v7154_v26  ;;  %v7228_v24 = vld [vmem:[%s10149_s3 + $0x32c] ss:$16 sps:$4 sm:$0xff]   ;;  %v7223_v25 = vld [vmem:[%s10149_s3 + $0x128] ss:$16 sps:$4 sm:$0xff]  }
 0x163   : > { %3055 = vmatprep.subr.bf16.mxu0 %v7159_v38  ;;  %3096 = vmatprep.subr.bf16.mxu1 %v7162_v27  ;;  %v7226_v35 = vld [vmem:[%s10149_s3 + $0x328] ss:$16 sps:$4 sm:$0xff]   ;;  %v7231_v26 = vld [vmem:[%s10149_s3 + $0x10c] ss:$16 sps:$4 sm:$0xff]  }
 0x164   : > { %v7234_v38 = vld [vmem:[%s10149_s3 + $0x30c] ss:$16 sps:$4 sm:$0xff]   ;;  %v7229_v27 = vld [vmem:[%s10149_s3 + $0x108] ss:$16 sps:$4 sm:$0xff]  }
 0x166   : > { %3056 = vmatpush1.bf16.msra.mxu0 %v7157_v28  ;;  %3097 = vmatpush1.bf16.msra.mxu1 %v7160_v29  ;;  %v7232_v28 = vld [vmem:[%s10149_s3 + $0x308] ss:$16 sps:$4 sm:$0xff]   ;;  %v7237_v29 = vld [vmem:[%s10149_s3 + $0x4ec] ss:$16 sps:$4 sm:$0xff]  }
 0x167   : > { %3057 = vmatprep.subr.bf16.mxu0 %v7165_v30  ;;  %3098 = vmatprep.subr.bf16.mxu1 %v7168_v31  ;;  %v7240_v30 = vld [vmem:[%s10149_s3 + $0x6ec] ss:$16 sps:$4 sm:$0xff]   ;;  %v7235_v31 = vld [vmem:[%s10149_s3 + $0x4e8] ss:$16 sps:$4 sm:$0xff]  }
 0x16a   : > { %3058 = vmatpush1.bf16.msra.mxu0 %v7163_v32  ;;  %3099 = vmatpush1.bf16.msra.mxu1 %v7166_v57  ;;  %v7238_v32 = vld [vmem:[%s10149_s3 + $0x6e8] ss:$16 sps:$4 sm:$0xff]   ;;  %v7243_v57 = vld [vmem:[%s10149_s3 + $0x4cc] ss:$16 sps:$4 sm:$0xff]  }
 0x16b   : > { %3059 = vmatprep.subr.bf16.mxu0 %v7171_v40  ;;  %3100 = vmatprep.subr.bf16.mxu1 %v7174_v41  ;;  %v7246_v40 = vld [vmem:[%s10149_s3 + $0x6cc] ss:$16 sps:$4 sm:$0xff]   ;;  %v7241_v41 = vld [vmem:[%s10149_s3 + $0x4c8] ss:$16 sps:$4 sm:$0xff]  }
 0x16e   : > { %3060 = vmatpush1.bf16.msra.mxu0 %v7169_v43  ;;  %3101 = vmatpush1.bf16.msra.mxu1 %v7172_v44  ;;  %v7244_v43 = vld [vmem:[%s10149_s3 + $0x6c8] ss:$16 sps:$4 sm:$0xff]  }
 0x16f   : > { %3061 = vmatprep.subr.bf16.mxu0 %v7177_v45  ;;  %3102 = vmatprep.subr.bf16.mxu1 %v7180_v46  ;;  %v7250_v44 = vld [vmem:[%s10149_s3 + $0x6a8] ss:$16 sps:$4 sm:$0xff]   ;;  %v7258_v45 = vld [vmem:[%s10149_s3 + $0x68c] ss:$16 sps:$4 sm:$0xff]  }
 0x170   : > { %v7253_v46 = vld [vmem:[%s10149_s3 + $0x488] ss:$16 sps:$4 sm:$0xff]  }
 0x172   : > { %3062 = vmatpush1.bf16.msra.mxu0 %v7175_v47  ;;  %3103 = vmatpush1.bf16.msra.mxu1 %v7178_v48  ;;  %v7256_v47 = vld [vmem:[%s10149_s3 + $0x688] ss:$16 sps:$4 sm:$0xff]   ;;  %v7261_v48 = vld [vmem:[%s10149_s3 + $0x46c] ss:$16 sps:$4 sm:$0xff]  }
 0x173   : > { %3063 = vmatprep.subr.bf16.mxu0 %v7183_v49  ;;  %3104 = vmatprep.subr.bf16.mxu1 %v7186_v50  ;;  %v7264_v49 = vld [vmem:[%s10149_s3 + $0x66c] ss:$16 sps:$4 sm:$0xff]   ;;  %v7259_v50 = vld [vmem:[%s10149_s3 + $0x468] ss:$16 sps:$4 sm:$0xff]  }
 0x176   : > { %3064 = vmatpush1.bf16.msra.mxu0 %v7181_v51  ;;  %3105 = vmatpush1.bf16.msra.mxu1 %v7184_v52  ;;  %v7262_v51 = vld [vmem:[%s10149_s3 + $0x668] ss:$16 sps:$4 sm:$0xff]   ;;  %v7267_v52 = vld [vmem:[%s10149_s3 + $0x44c] ss:$16 sps:$4 sm:$0xff]  }
 0x177   : > { %3065 = vmatprep.subr.bf16.mxu0 %v7189_v53  ;;  %3106 = vmatprep.subr.bf16.mxu1 %v7192_v54  ;;  %v7270_v53 = vld [vmem:[%s10149_s3 + $0x64c] ss:$16 sps:$4 sm:$0xff]   ;;  %v7265_v54 = vld [vmem:[%s10149_s3 + $0x448] ss:$16 sps:$4 sm:$0xff]  }
 0x17a   : > { %3066 = vmatpush2.bf16.msra.mxu0 %v7187_v55  ;;  %3107 = vmatpush2.bf16.msra.mxu1 %v7190_v56  ;;  %v7268_v55 = vld [vmem:[%s10149_s3 + $0x648] ss:$16 sps:$4 sm:$0xff]   ;;  %v7273_v56 = vld [vmem:[%s10149_s3 + $0x42c] ss:$16 sps:$4 sm:$0xff]  }
 0x17b   : > { %3067 = vmatprep.subr.bf16.mxu0 %v7195_v58  ;;  %3108 = vmatprep.subr.bf16.mxu1 %v7198_v59  ;;  %v7276_v58 = vld [vmem:[%s10149_s3 + $0x62c] ss:$16 sps:$4 sm:$0xff]   ;;  %v7271_v59 = vld [vmem:[%s10149_s3 + $0x428] ss:$16 sps:$4 sm:$0xff]  }
 0x17e   : > { %3068 = vmatpush2.bf16.msra.mxu0 %v7193_v11  ;;  %3109 = vmatpush2.bf16.msra.mxu1 %v7196_v60  ;;  %v7274_v11 = vld [vmem:[%s10149_s3 + $0x628] ss:$16 sps:$4 sm:$0xff]   ;;  %v7279_v60 = vld [vmem:[%s10149_s3 + $0x40c] ss:$16 sps:$4 sm:$0xff]  }
 0x17f   : > { %3069 = vmatprep.subr.bf16.mxu0 %v7201_v61  ;;  %3110 = vmatprep.subr.bf16.mxu1 %v7204_v62  ;;  %v7282_v61 = vld [vmem:[%s10149_s3 + $0x60c] ss:$16 sps:$4 sm:$0xff]   ;;  %v7277_v62 = vld [vmem:[%s10149_s3 + $0x408] ss:$16 sps:$4 sm:$0xff]  }
 0x182   : > { %3070 = vmatpush2.bf16.msra.mxu0 %v7199_v63  ;;  %3111 = vmatpush2.bf16.msra.mxu1 %v7202_v0  ;;  %v7280_v63 = vld [vmem:[%s10149_s3 + $0x608] ss:$16 sps:$4 sm:$0xff]   ;;  %v7285_v0 = vld [vmem:[%s10149_s3 + $0x5ec] ss:$16 sps:$4 sm:$0xff]  }
 0x183   : > { %3071 = vmatprep.subr.bf16.mxu0 %v7207_v1  ;;  %3112 = vmatprep.subr.bf16.mxu1 %v7210_v2  ;;  %v7288_v1 = vld [vmem:[%s10149_s3 + $0x7ec] ss:$16 sps:$4 sm:$0xff]   ;;  %v7283_v2 = vld [vmem:[%s10149_s3 + $0x5e8] ss:$16 sps:$4 sm:$0xff]  }
 0x186   : > { %3072 = vmatpush2.bf16.msra.mxu0 %v7205_v3  ;;  %3113 = vmatpush2.bf16.msra.mxu1 %v7208_v4  ;;  %v7286_v3 = vld [vmem:[%s10149_s3 + $0x7e8] ss:$16 sps:$4 sm:$0xff]   ;;  %v7291_v4 = vld [vmem:[%s10149_s3 + $0x5cc] ss:$16 sps:$4 sm:$0xff]  }
 0x187   : > { %3073 = vmatprep.subr.bf16.mxu0 %v7213_v5  ;;  %3114 = vmatprep.subr.bf16.mxu1 %v7216_v6  ;;  %v7294_v5 = vld [vmem:[%s10149_s3 + $0x7cc] ss:$16 sps:$4 sm:$0xff]   ;;  %v7289_v6 = vld [vmem:[%s10149_s3 + $0x5c8] ss:$16 sps:$4 sm:$0xff]  }
 0x18a   : > { %3074 = vmatpush2.bf16.msra.mxu0 %v7211_v16  ;;  %3115 = vmatpush2.bf16.msra.mxu1 %v7214_v17  ;;  %v7292_v16 = vld [vmem:[%s10149_s3 + $0x7c8] ss:$16 sps:$4 sm:$0xff]   ;;  %v7297_v17 = vld [vmem:[%s10149_s3 + $0x5ac] ss:$16 sps:$4 sm:$0xff]  }
 0x18b   : > { %3075 = vmatprep.subr.bf16.mxu0 %v7219_v19  ;;  %3116 = vmatprep.subr.bf16.mxu1 %v7222_v20  ;;  %v7300_v19 = vld [vmem:[%s10149_s3 + $0x7ac] ss:$16 sps:$4 sm:$0xff]   ;;  %v7295_v20 = vld [vmem:[%s10149_s3 + $0x5a8] ss:$16 sps:$4 sm:$0xff]  }
 0x18e   : > { %3076 = vmatpush2.bf16.msra.mxu0 %v7217_v21  ;;  %3117 = vmatpush2.bf16.msra.mxu1 %v7220_v22  ;;  %v7298_v21 = vld [vmem:[%s10149_s3 + $0x7a8] ss:$16 sps:$4 sm:$0xff]   ;;  %v7303_v22 = vld [vmem:[%s10149_s3 + $0x58c] ss:$16 sps:$4 sm:$0xff]  }
 0x18f   : > { %3077 = vmatprep.subr.bf16.mxu0 %v7225_v23  ;;  %3118 = vmatprep.subr.bf16.mxu1 %v7228_v24  ;;  %v7306_v23 = vld [vmem:[%s10149_s3 + $0x78c] ss:$16 sps:$4 sm:$0xff]   ;;  %v7301_v24 = vld [vmem:[%s10149_s3 + $0x588] ss:$16 sps:$4 sm:$0xff]  }
 0x192   : > { %3078 = vmatpush2.bf16.msra.mxu0 %v7223_v25  ;;  %3119 = vmatpush2.bf16.msra.mxu1 %v7226_v35  ;;  %v7304_v25 = vld [vmem:[%s10149_s3 + $0x788] ss:$16 sps:$4 sm:$0xff]   ;;  %v7309_v35 = vld [vmem:[%s10149_s3 + $0x56c] ss:$16 sps:$4 sm:$0xff]  }
 0x193   : > { %3079 = vmatprep.subr.bf16.mxu0 %v7231_v26  ;;  %3120 = vmatprep.subr.bf16.mxu1 %v7234_v38  ;;  %v7312_v26 = vld [vmem:[%s10149_s3 + $0x76c] ss:$16 sps:$4 sm:$0xff]   ;;  %v7307_v38 = vld [vmem:[%s10149_s3 + $0x568] ss:$16 sps:$4 sm:$0xff]  }
 0x196   : > { %3080 = vmatpush2.bf16.msra.mxu0 %v7229_v27  ;;  %3121 = vmatpush2.bf16.msra.mxu1 %v7232_v28  ;;  %v7310_v27 = vld [vmem:[%s10149_s3 + $0x768] ss:$16 sps:$4 sm:$0xff]   ;;  %v7315_v28 = vld [vmem:[%s10149_s3 + $0x54c] ss:$16 sps:$4 sm:$0xff]  }
 0x197   : > { %3131 = vmatprep.subr.bf16.mxu0 %v7237_v29  ;;  %3172 = vmatprep.subr.bf16.mxu1 %v7240_v30  ;;  %v7318_v29 = vld [vmem:[%s10149_s3 + $0x74c] ss:$16 sps:$4 sm:$0xff]   ;;  %v7313_v30 = vld [vmem:[%s10149_s3 + $0x548] ss:$16 sps:$4 sm:$0xff]  }
 0x199   : > { %3082 = vmatmul.mubr.bf16.vlgmr.msra.gmra.mxu0 %v8241_v37  ;;  %3123 = vmatmul.mubr.bf16.vlgmr.msra.gmra.mxu1 %v8234_v34  ;;  %v7249_v37 = vld [vmem:[%s10149_s3 + $0x4ac] ss:$16 sps:$4 sm:$0xff]  }
 0x19a   : > { %3132 = vmatpush1.bf16.msra.mxu0 %v7235_v31  ;;  %3163 = vmatprep.mubr.bf16.mxu0 %v8456_v8  ;;  %v7252_v34 = vld [vmem:[%s10149_s3 + $0x6ac] ss:$16 sps:$4 sm:$0xff]   ;;  %v7247_v8 = vld [vmem:[%s10149_s3 + $0x4a8] ss:$16 sps:$4 sm:$0xff]  }
 0x19b   : > { %3173 = vmatpush1.bf16.msra.mxu1 %v7238_v32  ;;  %3204 = vmatprep.mubr.bf16.mxu1 %v8463_v18  ;;  %v7255_v18 = vld [vmem:[%s10149_s3 + $0x48c] ss:$16 sps:$4 sm:$0xff]   ;;  %v7316_v31 = vld [vmem:[%s10149_s3 + $0x748] ss:$16 sps:$4 sm:$0xff]  }
 0x19c   : > { %3133 = vmatprep.subr.bf16.mxu0 %v7243_v57  ;;  %3174 = vmatprep.subr.bf16.mxu1 %v7246_v40  ;;  %v7321_v32 = vld [vmem:[%s10149_s3 + $0x52c] ss:$16 sps:$4 sm:$0xff]   ;;  %v7319_v40 = vld [vmem:[%s10149_s3 + $0x528] ss:$16 sps:$4 sm:$0xff]  }
 0x19d   : > { %v7324_v57 = vld [vmem:[%s10149_s3 + $0x72c] ss:$16 sps:$4 sm:$0xff]  }
 0x19e   : > { %3134 = vmatpush1.bf16.msra.mxu0 %v7241_v41  ;;  %v7322_v41 = vld [vmem:[%s10149_s3 + $0x728] ss:$16 sps:$4 sm:$0xff]  }
 0x19f   : > { %3175 = vmatpush1.bf16.msra.mxu1 %v7244_v43  ;;  %3135 = vmatprep.subr.bf16.mxu0 %v7249_v37  ;;  %v7327_v43 = vld [vmem:[%s10149_s3 + $0x50c] ss:$16 sps:$4 sm:$0xff]  }
 0x1a0   : > { %3176 = vmatprep.subr.bf16.mxu1 %v7252_v34  ;;  %v7330_v37 = vld [vmem:[%s10149_s3 + $0x70c] ss:$16 sps:$4 sm:$0xff]   ;;  %v3277_v34 = vld [vmem:[%s10151_s5 + $0x1c0] sm:$0xff] }
 0x1a2   : > { %3136 = vmatpush1.bf16.msra.mxu0 %v7247_v8  ;;  %v3281_v8 = vld [vmem:[%s10151_s5 + $0x1e0] sm:$0xff] }
 0x1a3   : > { %3177 = vmatpush1.bf16.msra.mxu1 %v7250_v44  ;;  %3137 = vmatprep.subr.bf16.mxu0 %v7255_v18  ;;  %v7325_v44 = vld [vmem:[%s10149_s3 + $0x508] ss:$16 sps:$4 sm:$0xff]  }
 0x1a4   : > { %3178 = vmatprep.subr.bf16.mxu1 %v7258_v45  ;;  %v7328_v18 = vld [vmem:[%s10149_s3 + $0x708] ss:$16 sps:$4 sm:$0xff]   ;;  %v6606_v45 = vcombine.high %v3277_v34, %v3281_v8 }
 0x1a6   : > { %3138 = vmatpush1.bf16.msra.mxu0 %v7253_v46  ;;  %v3269_v46 = vld [vmem:[%s10151_s5 + $0x180] sm:$0xff] }
 0x1a7   : > { %3179 = vmatpush1.bf16.msra.mxu1 %v7256_v47  ;;  %3139 = vmatprep.subr.bf16.mxu0 %v7261_v48  ;;  %v3273_v47 = vld [vmem:[%s10151_s5 + $0x1a0] sm:$0xff]  ;;  %v6605_v48 = vcombine.low %v3277_v34, %v3281_v8 }
 0x1a8   : > { %3180 = vmatprep.subr.bf16.mxu1 %v7264_v49  ;;  %v6598_v49 = vcombine.high %v3269_v46, %v3273_v47 }
 0x1aa   : > { %3140 = vmatpush1.bf16.msra.mxu0 %v7259_v50  ;;  %v3261_v50 = vld [vmem:[%s10151_s5 + $0x140] sm:$0xff] }
 0x1ab   : > { %3181 = vmatpush1.bf16.msra.mxu1 %v7262_v51  ;;  %3141 = vmatprep.subr.bf16.mxu0 %v7267_v52  ;;  %v3265_v51 = vld [vmem:[%s10151_s5 + $0x160] sm:$0xff] }
 0x1ac   : > { %3182 = vmatprep.subr.bf16.mxu1 %v7270_v53 }
 0x1ae   : > { %3142 = vmatpush1.bf16.msra.mxu0 %v7265_v54  ;;  %v6597_v54 = vcombine.low %v3269_v46, %v3273_v47  ;;  %v3373_v46 = vld [vmem:[%s10151_s5 + $0x4c0] sm:$0xff] }
 0x1af   : > { %3183 = vmatpush1.bf16.msra.mxu1 %v7268_v55  ;;  %3143 = vmatprep.subr.bf16.mxu0 %v7273_v56  ;;  %v6590_v56 = vcombine.high %v3261_v50, %v3265_v51  ;;  %v3377_v47 = vld [vmem:[%s10151_s5 + $0x4e0] sm:$0xff] }
 0x1b0   : > { %3184 = vmatprep.subr.bf16.mxu1 %v7276_v58 }
 0x1b2   : > { %3144 = vmatpush1.bf16.msra.mxu0 %v7271_v59  ;;  %v3253_v59 = vld [vmem:[%s10151_s5 + $0x100] sm:$0xff] }
 0x1b3   : > { %3185 = vmatpush1.bf16.msra.mxu1 %v7274_v11  ;;  %3145 = vmatprep.subr.bf16.mxu0 %v7279_v60  ;;  %v6589_v60 = vcombine.low %v3261_v50, %v3265_v51  ;;  %v6702_v50 = vcombine.high %v3373_v46, %v3377_v47  ;;  %v3333_v51 = vld [vmem:[%s10151_s5 + $0x380] sm:$0xff] }
 0x1b4   : > { %3186 = vmatprep.subr.bf16.mxu1 %v7282_v61 }
 0x1b6   : > { %3146 = vmatpush1.bf16.msra.mxu0 %v7277_v62 }
 0x1b7   : > { %3187 = vmatpush1.bf16.msra.mxu1 %v7280_v63  ;;  %3147 = vmatprep.subr.bf16.mxu0 %v7285_v0  ;;  %v3245_v0 = vld [vmem:[%s10151_s5 + $0xc0] sm:$0xff] }
 0x1b8   : > { %3188 = vmatprep.subr.bf16.mxu1 %v7288_v1  ;;  %v3249_v1 = vld [vmem:[%s10151_s5 + $0xe0] sm:$0xff] }
 0x1ba   : > { %3148 = vmatpush2.bf16.msra.mxu0 %v7283_v2 }
 0x1bb   : > { %3189 = vmatpush2.bf16.msra.mxu1 %v7286_v3  ;;  %3149 = vmatprep.subr.bf16.mxu0 %v7291_v4  ;;  %v3405_v3 = vld [vmem:[%s10151_s5 + $0x5c0] sm:$0xff] }
 0x1bc   : > { %3190 = vmatprep.subr.bf16.mxu1 %v7294_v5  ;;  %v3409_v4 = vld [vmem:[%s10151_s5 + $0x5e0] sm:$0xff]  ;;  %v6574_v5 = vcombine.high %v3245_v0, %v3249_v1 }
 0x1be   : > { %3150 = vmatpush2.bf16.msra.mxu0 %v7289_v6  ;;  %v6733_v6 = vcombine.low %v3405_v3, %v3409_v4 }
 0x1bf   : > { %3191 = vmatpush2.bf16.msra.mxu1 %v7292_v16  ;;  %3151 = vmatprep.subr.bf16.mxu0 %v7297_v17  ;;  %v6734_v16 = vcombine.high %v3405_v3, %v3409_v4  ;;  %v3237_v17 = vld [vmem:[%s10151_s5 + $0x80] sm:$0xff] }
 0x1c0   : > { %3192 = vmatprep.subr.bf16.mxu1 %v7300_v19  ;;  %v3241_v19 = vld [vmem:[%s10151_s5 + $0xa0] sm:$0xff] }
 0x1c2   : > { %3152 = vmatpush2.bf16.msra.mxu0 %v7295_v20  ;;  %v6573_v20 = vcombine.low %v3245_v0, %v3249_v1  ;;  %v3357_v0 = vld [vmem:[%s10151_s5 + $0x440] sm:$0xff] }
 0x1c3   : > { %3193 = vmatpush2.bf16.msra.mxu1 %v7298_v21  ;;  %3153 = vmatprep.subr.bf16.mxu0 %v7303_v22  ;;  %v3397_v21 = vld [vmem:[%s10151_s5 + $0x580] sm:$0xff] }
 0x1c4   : > { %3194 = vmatprep.subr.bf16.mxu1 %v7306_v23  ;;  %v3401_v22 = vld [vmem:[%s10151_s5 + $0x5a0] sm:$0xff]  ;;  %v6566_v23 = vcombine.high %v3237_v17, %v3241_v19 }
 0x1c5   : > { %v3361_v1 = vld [vmem:[%s10151_s5 + $0x460] sm:$0xff] }
 0x1c6   : > { %3154 = vmatpush2.bf16.msra.mxu0 %v7301_v24  ;;  %v6725_v24 = vcombine.low %v3397_v21, %v3401_v22  ;;  %v6685_v3 = vcombine.low %v3357_v0, %v3361_v1  ;;  %v6686_v4 = vcombine.high %v3357_v0, %v3361_v1  ;;  %v3437_v0 = vld [vmem:[%s10151_s5 + $0x6c0] sm:$0xff] }
 0x1c7   : > { %3195 = vmatpush2.bf16.msra.mxu1 %v7304_v25  ;;  %3155 = vmatprep.subr.bf16.mxu0 %v7309_v35  ;;  %v6726_v25 = vcombine.high %v3397_v21, %v3401_v22  ;;  %v3229_v35 = vld [vmem:[%s10151_s5 + $0x40] sm:$0xff] }
 0x1c8   : > { %3196 = vmatprep.subr.bf16.mxu1 %v7312_v26  ;;  %v3233_v26 = vld [vmem:[%s10151_s5 + $0x60] sm:$0xff] }
 0x1c9   : > { %v3441_v1 = vld [vmem:[%s10151_s5 + $0x6e0] sm:$0xff] }
 0x1ca   : > { %3156 = vmatpush2.bf16.msra.mxu0 %v7307_v38  ;;  %v6565_v38 = vcombine.low %v3237_v17, %v3241_v19  ;;  %v3349_v17 = vld [vmem:[%s10151_s5 + $0x400] sm:$0xff] }
 0x1cb   : > { %3197 = vmatpush2.bf16.msra.mxu1 %v7310_v27  ;;  %3157 = vmatprep.subr.bf16.mxu0 %v7315_v28  ;;  %v3389_v27 = vld [vmem:[%s10151_s5 + $0x540] sm:$0xff] }
 0x1cc   : > { %3198 = vmatprep.subr.bf16.mxu1 %v7318_v29  ;;  %v3393_v28 = vld [vmem:[%s10151_s5 + $0x560] sm:$0xff]  ;;  %v6558_v29 = vcombine.high %v3229_v35, %v3233_v26 }
 0x1cd   : > { %v3353_v19 = vld [vmem:[%s10151_s5 + $0x420] sm:$0xff] }
 0x1ce   : > { %3158 = vmatpush2.bf16.msra.mxu0 %v7313_v30  ;;  %v6717_v30 = vcombine.low %v3389_v27, %v3393_v28  ;;  %v6677_v21 = vcombine.low %v3349_v17, %v3353_v19  ;;  %v6678_v22 = vcombine.high %v3349_v17, %v3353_v19  ;;  %v3433_v17 = vld [vmem:[%s10151_s5 + $0x6a0] sm:$0xff] }
 0x1cf   : > { %3199 = vmatpush2.bf16.msra.mxu1 %v7316_v31  ;;  %3159 = vmatprep.subr.bf16.mxu0 %v7321_v32  ;;  %v6718_v31 = vcombine.high %v3389_v27, %v3393_v28  ;;  %v3221_v32 = vld [vmem:[%s10151_s5] sm:$0xff] }
 0x1d0   : > { %3200 = vmatprep.subr.bf16.mxu1 %v7324_v57  ;;  %v3225_v57 = vld [vmem:[%s10151_s5 + $0x20] sm:$0xff] }
 0x1d2   : > { %3160 = vmatpush2.bf16.msra.mxu0 %v7319_v40  ;;  %v6557_v40 = vcombine.low %v3229_v35, %v3233_v26  ;;  %v3469_v35 = vld [vmem:[%s10151_s5 + $0x7c0] sm:$0xff] }
 0x1d3   : > { %3201 = vmatpush2.bf16.msra.mxu1 %v7322_v41  ;;  %3161 = vmatprep.subr.bf16.mxu0 %v7327_v43  ;;  %v3381_v41 = vld [vmem:[%s10151_s5 + $0x500] sm:$0xff] }
 0x1d4   : > { %3202 = vmatprep.subr.bf16.mxu1 %v7330_v37  ;;  %v3385_v43 = vld [vmem:[%s10151_s5 + $0x520] sm:$0xff]  ;;  %v6550_v37 = vcombine.high %v3221_v32, %v3225_v57 }
 0x1d5   : > { %v6709_v34 = vcombine.low %v3381_v41, %v3385_v43  ;;  %v6710_v8 = vcombine.high %v3381_v41, %v3385_v43  ;;  %v3473_v26 = vld [vmem:[%s10151_s5 + $0x7e0] sm:$0xff] }
 0x1d6   : > { %3162 = vmatpush2.bf16.msra.mxu0 %v7325_v44  ;;  %v3341_v44 = vld [vmem:[%s10151_s5 + $0x3c0] sm:$0xff]  ;;  %v6797_v27 = vcombine.low %v3469_v35, %v3473_v26  ;;  %v6798_v28 = vcombine.high %v3469_v35, %v3473_v26 }
 0x1d7   : > { %3203 = vmatpush2.bf16.msra.mxu1 %v7328_v18  ;;  %4799 = vmatprep.subr.bf16.mxu0 %v6606_v45  ;;  %v3345_v18 = vld [vmem:[%s10151_s5 + $0x3e0] sm:$0xff]  ;;  %v6549_v45 = vcombine.low %v3221_v32, %v3225_v57 }
 0x1d8   : > { %4840 = vmatprep.subr.bf16.mxu1 %v6734_v16  ;;  %v3461_v32 = vld [vmem:[%s10151_s5 + $0x780] sm:$0xff] }
 0x1d9   : > { %3164 = vmatmul.mubr.bf16.vlgmr.msra.gmra.mxu0 %v8461_v13  ;;  %v8869_v52 = vpop.f32.mrf.mxu0  ;;  %v8872_v53 = vpop.f32.mrf.mxu1  ;;  %v3257_v13 = vld [vmem:[%s10151_s5 + $0x120] sm:$0xff] }
 0x1da   : > { %3205 = vmatmul.mubr.bf16.vlgmr.msra.gmra.mxu1 %v8454_v7  ;;  %4800 = vmatpush1.bf16.msra.mxu0 %v6605_v48  ;;  %v6582_v62 = vcombine.high %v3253_v59, %v3257_v13  ;;  %v6581_v2 = vcombine.low %v3253_v59, %v3257_v13  ;;  %v6670_v48 = vcombine.high %v3341_v44, %v3345_v18  ;;  %v3365_v59 = vld [vmem:[%s10151_s5 + $0x480] sm:$0xff] }
 0x1db   : > { %v8874_v55 = vpop.f32.mrf.mxu0  ;;  %4801 = vmatprep.subr.bf16.mxu0 %v6598_v49  ;;  %v8876_v58 = vpop.f32.mrf.mxu1  ;;  %4841 = vmatpush1.bf16.msra.mxu1 %v6733_v6  ;;  %v6701_v49 = vcombine.low %v3373_v46, %v3377_v47  ;;  %v3369_v13 = vld [vmem:[%s10151_s5 + $0x4a0] sm:$0xff] }
 0x1dc   : > { %4842 = vmatprep.subr.bf16.mxu1 %v6726_v25  ;;  %v3321_v6 = vld [vmem:[%s10151_s5 + $0x320] sm:$0xff] }
 0x1dd   : > { %v2923_v11 = vpop.f32.mrf.mxu0  ;;  %v2964_v7 = vpop.f32.mrf.mxu1  ;;  %v3465_v57 = vld [vmem:[%s10151_s5 + $0x7a0] sm:$0xff] }
 0x1de   : > { %4802 = vmatpush1.bf16.msra.mxu0 %v6597_v54  ;;  %v3337_v54 = vld [vmem:[%s10151_s5 + $0x3a0] sm:$0xff]  ;;  %v6693_v7 = vcombine.low %v3365_v59, %v3369_v13  ;;  %v6789_v41 = vcombine.low %v3461_v32, %v3465_v57  ;;  %v6790_v43 = vcombine.high %v3461_v32, %v3465_v57 }
 0x1df   : > { %v2924_v61 = vpop.f32.mrf.mxu0  ;;  %4803 = vmatprep.subr.bf16.mxu0 %v6590_v56  ;;  %v2965_v63 = vpop.f32.mrf.mxu1  ;;  %4843 = vmatpush1.bf16.msra.mxu1 %v6725_v24  ;;  %v6669_v56 = vcombine.low %v3341_v44, %v3345_v18  ;;  %v6662_v11 = vcombine.high %v3333_v51, %v3337_v54  ;;  %v3313_v24 = vld [vmem:[%s10151_s5 + $0x2e0] sm:$0xff] }
 0x1e0   : > { %4844 = vmatprep.subr.bf16.mxu1 %v6718_v31  ;;  %v3325_v61 = vld [vmem:[%s10151_s5 + $0x340] sm:$0xff]  ;;  %v6661_v63 = vcombine.low %v3333_v51, %v3337_v54 }
 0x1e1   : > { %v3453_v44 = vld [vmem:[%s10151_s5 + $0x740] sm:$0xff] }
 0x1e2   : > { %4804 = vmatpush1.bf16.msra.mxu0 %v6589_v60  ;;  %v6694_v60 = vcombine.high %v3365_v59, %v3369_v13  ;;  %v3457_v18 = vld [vmem:[%s10151_s5 + $0x760] sm:$0xff] }
 0x1e3   : > { %4805 = vmatprep.subr.bf16.mxu0 %v6582_v62  ;;  %4845 = vmatpush1.bf16.msra.mxu1 %v6717_v30  ;;  %v3329_v62 = vld [vmem:[%s10151_s5 + $0x360] sm:$0xff]  ;;  %v6781_v46 = vcombine.low %v3453_v44, %v3457_v18  ;;  %v6782_v47 = vcombine.high %v3453_v44, %v3457_v18 }
 0x1e4   : > { %4846 = vmatprep.subr.bf16.mxu1 %v6710_v8  ;;  %v6653_v16 = vcombine.low %v3325_v61, %v3329_v62  ;;  %v3305_v30 = vld [vmem:[%s10151_s5 + $0x2a0] sm:$0xff] }
 0x1e5   : > { %v3445_v54 = vld [vmem:[%s10151_s5 + $0x700] sm:$0xff] }
 0x1e6   : > { %4806 = vmatpush1.bf16.msra.mxu0 %v6581_v2  ;;  %v6654_v2 = vcombine.high %v3325_v61, %v3329_v62  ;;  %v9043_v61 = vld [vmem:[%s10151_s5 + $0x1e8] sm:$0xff]  ;;  %v3425_v35 = vld [vmem:[%s10151_s5 + $0x660] sm:$0xff] }
 0x1e7   : > { %4807 = vmatprep.subr.bf16.mxu0 %v6574_v5  ;;  %4847 = vmatpush1.bf16.msra.mxu1 %v6709_v34  ;;  %v3317_v5 = vld [vmem:[%s10151_s5 + $0x300] sm:$0xff] }
 0x1e8   : > { %4848 = vmatprep.subr.bf16.mxu1 %v6702_v50  ;;  %v6645_v25 = vcombine.low %v3317_v5, %v3321_v6  ;;  %v3297_v34 = vld [vmem:[%s10151_s5 + $0x260] sm:$0xff] }
 0x1e9   : > { %v9025_v50 = vld [vmem:[%s10150_s4] sm:$0xf] }
 0x1ea   : > { %4808 = vmatpush1.bf16.msra.mxu0 %v6573_v20  ;;  %v6646_v20 = vcombine.high %v3317_v5, %v3321_v6  ;;  %v1592_v62 = vrot.slane %v9025_v50, %v8221_v14  ;;  %v3413_v57 = vld [vmem:[%s10151_s5 + $0x600] sm:$0xff] }
 0x1eb   : > { %4809 = vmatprep.subr.bf16.mxu0 %v6566_v23  ;;  %4849 = vmatpush1.bf16.msra.mxu1 %v6701_v49  ;;  %v3309_v23 = vld [vmem:[%s10151_s5 + $0x2c0] sm:$0xff] }
 0x1ec   : > { %4850 = vmatprep.subr.bf16.mxu1 %v6694_v60  ;;  %v6637_v31 = vcombine.low %v3309_v23, %v3313_v24  ;;  %v3289_v49 = vld [vmem:[%s10151_s5 + $0x220] sm:$0xff]  ;;  %v9038_v60 = vld [vmem:[%s10151_s5 + $0x1c8] sm:$0xff]  ;;  %v2922_v6 = vadd.f32 %v8874_v55, %v1592_v62 }
 0x1ee   : > { %4810 = vmatpush1.bf16.msra.mxu0 %v6565_v38  ;;  %v6638_v38 = vcombine.high %v3309_v23, %v3313_v24 }
 0x1ef   : > { %4811 = vmatprep.subr.bf16.mxu0 %v6558_v29  ;;  %4851 = vmatpush1.bf16.msra.mxu1 %v6693_v7  ;;  %v3301_v29 = vld [vmem:[%s10151_s5 + $0x280] sm:$0xff]  ;;  %v1588_v7 = vrot.slane %v9025_v50, %v8210_v10 }
 0x1f0   : > { %4852 = vmatprep.subr.bf16.mxu1 %v6686_v4  ;;  %v6629_v8 = vcombine.low %v3301_v29, %v3305_v30  ;;  %v6766_v4 = vcombine.high %v3437_v0, %v3441_v1 }
 0x1f1   : > { %v2920_v5 = vadd.f32 %v8869_v52, %v1588_v7  ;;  %v2963_v52 = vadd.f32 %v8876_v58, %v2922_v6  ;;  %v3254_v7 = vld [vmem:[%s10151_s5 + $0x108] sm:$0xff] }
 0x1f2   : > { %4812 = vmatpush1.bf16.msra.mxu0 %v6557_v40  ;;  %v6630_v40 = vcombine.high %v3301_v29, %v3305_v30 }
 0x1f3   : > { %4813 = vmatprep.subr.bf16.mxu0 %v6550_v37  ;;  %4853 = vmatpush1.bf16.msra.mxu1 %v6685_v3  ;;  %v3293_v37 = vld [vmem:[%s10151_s5 + $0x240] sm:$0xff]  ;;  %v6765_v3 = vcombine.low %v3437_v0, %v3441_v1  ;;  %v3250_v0 = vld [vmem:[%s10151_s5 + $0xe8] sm:$0xff] }
 0x1f4   : > { %4854 = vmatprep.subr.bf16.mxu1 %v6678_v22  ;;  %v6621_v51 = vcombine.low %v3293_v37, %v3297_v34 }
 0x1f6   : > { %4814 = vmatpush1.bf16.msra.mxu0 %v6549_v45  ;;  %v6622_v45 = vcombine.high %v3293_v37, %v3297_v34  ;;  %v3270_v37 = vld [vmem:[%s10151_s5 + $0x188] sm:$0xff] }
 0x1f7   : > { %4815 = vmatprep.subr.bf16.mxu0 %v6670_v48  ;;  %4855 = vmatpush1.bf16.msra.mxu1 %v6677_v21  ;;  %v3285_v48 = vld [vmem:[%s10151_s5 + $0x200] sm:$0xff]  ;;  %v2961_v21 = vadd.f32 %v8872_v53, %v2920_v5  ;;  %v3274_v34 = vld [vmem:[%s10151_s5 + $0x1a8] sm:$0xff] }
 0x1f8   : > { %4856 = vmatprep.subr.bf16.mxu1 %v6798_v28  ;;  %v6614_v59 = vcombine.high %v3285_v48, %v3289_v49 }
 0x1fa   : > { %4816 = vmatpush2.bf16.msra.mxu0 %v6669_v56  ;;  %v3449_v56 = vld [vmem:[%s10151_s5 + $0x720] sm:$0xff] }
 0x1fb   : > { %4817 = vmatprep.subr.bf16.mxu0 %v6662_v11  ;;  %4857 = vmatpush2.bf16.msra.mxu1 %v6797_v27  ;;  %v6773_v13 = vcombine.low %v3445_v54, %v3449_v56  ;;  %v6774_v11 = vcombine.high %v3445_v54, %v3449_v56  ;;  %v3266_v54 = vld [vmem:[%s10151_s5 + $0x168] sm:$0xff] }
 0x1fc   : > { %4858 = vmatprep.subr.bf16.mxu1 %v6790_v43 }
 0x1fe   : > { %4818 = vmatpush2.bf16.msra.mxu0 %v6661_v63  ;;  %v6613_v63 = vcombine.low %v3285_v48, %v3289_v49  ;;  %v9092_v48 = vld [vmem:[%s10151_s5 + $0x5c8] sm:$0xff] }
 0x1ff   : > { %4819 = vmatprep.subr.bf16.mxu0 %v6654_v2  ;;  %4859 = vmatpush2.bf16.msra.mxu1 %v6789_v41  ;;  %v6608_v2 = vcombine.high %v9038_v60, %v9043_v61  ;;  %v9097_v49 = vld [vmem:[%s10151_s5 + $0x5e8] sm:$0xff] }
 0x200   : > { %4860 = vmatprep.subr.bf16.mxu1 %v6782_v47  ;;  %v6600_v47 = vcombine.high %v3270_v37, %v3274_v34  ;;  %v6735_v56 = vcombine.low %v9092_v48, %v9097_v49 }
 0x202   : > { %4820 = vmatpush2.bf16.msra.mxu0 %v6653_v16  ;;  %v3429_v16 = vld [vmem:[%s10151_s5 + $0x680] sm:$0xff] }
 0x203   : > { %4821 = vmatprep.subr.bf16.mxu0 %v6646_v20  ;;  %4861 = vmatpush2.bf16.msra.mxu1 %v6781_v46  ;;  %v6757_v19 = vcombine.low %v3429_v16, %v3433_v17  ;;  %v6758_v20 = vcombine.high %v3429_v16, %v3433_v17  ;;  %v3230_v16 = vld [vmem:[%s10151_s5 + $0x48] sm:$0xff] }
 0x204   : > { %4862 = vmatprep.subr.bf16.mxu1 %v6774_v11  ;;  %v3234_v17 = vld [vmem:[%s10151_s5 + $0x68] sm:$0xff] }
 0x206   : > { %4822 = vmatpush2.bf16.msra.mxu0 %v6645_v25  ;;  %v3421_v25 = vld [vmem:[%s10151_s5 + $0x640] sm:$0xff] }
 0x207   : > { %4823 = vmatprep.subr.bf16.mxu0 %v6638_v38  ;;  %4863 = vmatpush2.bf16.msra.mxu1 %v6773_v13  ;;  %v6750_v53 = vcombine.high %v3421_v25, %v3425_v35  ;;  %v6749_v29 = vcombine.low %v3421_v25, %v3425_v35  ;;  %v6599_v13 = vcombine.low %v3270_v37, %v3274_v34 }
 0x208   : > { %4864 = vmatprep.subr.bf16.mxu1 %v6766_v4  ;;  %v3242_v4 = vld [vmem:[%s10151_s5 + $0xa8] sm:$0xff] }
 0x20a   : > { %4824 = vmatpush2.bf16.msra.mxu0 %v6637_v31 }
 0x20b   : > { %4825 = vmatprep.subr.bf16.mxu0 %v6630_v40  ;;  %4865 = vmatpush2.bf16.msra.mxu1 %v6765_v3  ;;  %v3417_v40 = vld [vmem:[%s10151_s5 + $0x620] sm:$0xff]  ;;  %v3238_v3 = vld [vmem:[%s10151_s5 + $0x88] sm:$0xff] }
 0x20c   : > { %4866 = vmatprep.subr.bf16.mxu1 %v6758_v20  ;;  %v6741_v44 = vcombine.low %v3413_v57, %v3417_v40  ;;  %v6568_v6 = vcombine.high %v3238_v3, %v3242_v4  ;;  %v6560_v20 = vcombine.high %v3230_v16, %v3234_v17 }
 0x20e   : > { %4826 = vmatpush2.bf16.msra.mxu0 %v6629_v8  ;;  %v6742_v8 = vcombine.high %v3413_v57, %v3417_v40 }
 0x20f   : > { %4827 = vmatprep.subr.bf16.mxu0 %v6622_v45  ;;  %4867 = vmatpush2.bf16.msra.mxu1 %v6757_v19  ;;  %v6607_v45 = vcombine.low %v9038_v60, %v9043_v61  ;;  %v3258_v60 = vld [vmem:[%s10151_s5 + $0x128] sm:$0xff]  ;;  %v6567_v19 = vcombine.low %v3238_v3, %v3242_v4  ;;  %v3283_v3 = vld [vmem:[%s10151_s5 + $0x1f0] sm:$0xff] }
 0x210   : > { %4868 = vmatprep.subr.bf16.mxu1 %v6750_v53  ;;  %v6584_v62 = vcombine.high %v3254_v7, %v3258_v60  ;;  %v6583_v1 = vcombine.low %v3254_v7, %v3258_v60  ;;  %v3290_v7 = vld [vmem:[%s10151_s5 + $0x228] sm:$0xff] }
 0x212   : > { %4828 = vmatpush2.bf16.msra.mxu0 %v6621_v51  ;;  %v3262_v51 = vld [vmem:[%s10151_s5 + $0x148] sm:$0xff] }
 0x213   : > { %4829 = vmatprep.subr.bf16.mxu0 %v6614_v59  ;;  %4869 = vmatpush2.bf16.msra.mxu1 %v6749_v29  ;;  %v6736_v59 = vcombine.high %v9092_v48, %v9097_v49  ;;  %v6592_v11 = vcombine.high %v3262_v51, %v3266_v54  ;;  %v6591_v61 = vcombine.low %v3262_v51, %v3266_v54  ;;  %v3330_v29 = vld [vmem:[%s10151_s5 + $0x368] sm:$0xff]  ;;  %v3256_v49 = vld [vmem:[%s10151_s5 + $0x118] sm:$0xff] }
 0x214   : > { %4870 = vmatprep.subr.bf16.mxu1 %v6742_v8  ;;  %v3302_v8 = vld [vmem:[%s10151_s5 + $0x288] sm:$0xff] }
 0x215   : > { %v3294_v51 = vld [vmem:[%s10151_s5 + $0x248] sm:$0xff] }
 0x216   : > { %4830 = vmatpush2.bf16.msra.mxu0 %v6613_v63  ;;  %v3246_v63 = vld [vmem:[%s10151_s5 + $0xc8] sm:$0xff] }
 0x217   : > { %4881 = vmatprep.subr.bf16.mxu0 %v6608_v2  ;;  %4871 = vmatpush2.bf16.msra.mxu1 %v6741_v44  ;;  %v6576_v2 = vcombine.high %v3246_v63, %v3250_v0  ;;  %v6575_v5 = vcombine.low %v3246_v63, %v3250_v0  ;;  %v3306_v44 = vld [vmem:[%s10151_s5 + $0x2a8] sm:$0xff] }
 0x218   : > { %4922 = vmatprep.subr.bf16.mxu1 %v6736_v59  ;;  %v3298_v54 = vld [vmem:[%s10151_s5 + $0x268] sm:$0xff]  ;;  %v6631_v59 = vcombine.low %v3302_v8, %v3306_v44 }
 0x219   : > { %v3001_v22 = vpop.f32.mrf.mxu0  ;;  %v3042_v23 = vpop.f32.mrf.mxu1  ;;  %v3386_v48 = vld [vmem:[%s10151_s5 + $0x528] sm:$0xff] }
 0x21a   : > { %v3002_v55 = vadd.f32 %v3001_v22, %v2961_v21  ;;  %v3222_v21 = vld [vmem:[%s10151_s5 + $0x8] sm:$0xff] }
 0x21b   : > { %v3003_v24 = vpop.f32.mrf.mxu0  ;;  %v3044_v27 = vpop.f32.mrf.mxu1  ;;  %v3226_v22 = vld [vmem:[%s10151_s5 + $0x28] sm:$0xff] }
 0x21c   : > { %v3043_v26 = vadd.f32 %v3042_v23, %v3002_v55  ;;  %v3004_v38 = vadd.f32 %v3003_v24, %v2963_v52  ;;  %v6559_v52 = vcombine.low %v3230_v16, %v3234_v17  ;;  %v6552_v55 = vcombine.high %v3222_v21, %v3226_v22  ;;  %v3342_v23 = vld [vmem:[%s10151_s5 + $0x3c8] sm:$0xff] }
 0x21d   : > { %v3005_v28 = vpop.f32.mrf.mxu0  ;;  %v3046_v58 = vpop.f32.mrf.mxu1  ;;  %v3346_v24 = vld [vmem:[%s10151_s5 + $0x3e8] sm:$0xff]  ;;  %v6551_v25 = vcombine.low %v3222_v21, %v3226_v22  ;;  %v3275_v21 = vld [vmem:[%s10151_s5 + $0x1b0] sm:$0xff] }
 0x21e   : > { %v3045_v30 = vadd.f32 %v3044_v27, %v3004_v38  ;;  %v3213_v31 = vmax.f32 %v3043_v26, 0.0  ;;  %v6672_v35 = vcombine.high %v3342_v23, %v3346_v24  ;;  %v3334_v26 = vld [vmem:[%s10151_s5 + $0x388] sm:$0xff]  ;;  %v6671_v27 = vcombine.low %v3342_v23, %v3346_v24  ;;  %v3267_v23 = vld [vmem:[%s10151_s5 + $0x170] sm:$0xff] }
 0x21f   : > { %v3006_v32 = vpop.f32.mrf.mxu0  ;;  %v3047_v43 = vpop.f32.mrf.mxu1  ;;  %v3338_v38 = vld [vmem:[%s10151_s5 + $0x3a8] sm:$0xff] }
 0x220   : > { %v3214_v41 = vmax.f32 %v3045_v30, 0.0  ;;  %v9087_v46 = vpack.c.bf16 %v3213_v31, %v3213_v31  ;;  %v6664_v53 = vcombine.high %v3334_v26, %v3338_v38  ;;  %v3326_v28 = vld [vmem:[%s10151_s5 + $0x348] sm:$0xff]  ;;  %v6663_v30 = vcombine.low %v3334_v26, %v3338_v38  ;;  %v3259_v26 = vld [vmem:[%s10151_s5 + $0x130] sm:$0xff] }
 0x221   : > { %v6656_v58 = vcombine.high %v3326_v28, %v3330_v29  ;;  %v3318_v31 = vld [vmem:[%s10151_s5 + $0x308] sm:$0xff]  ;;  %v6655_v57 = vcombine.low %v3326_v28, %v3330_v29  ;;  %v3251_v28 = vld [vmem:[%s10151_s5 + $0xf0] sm:$0xff] }
 0x222   : > { %v9083_v18 = vpack.c.bf16 %v3214_v41, %v3214_v41  ;;  %v3322_v32 = vld [vmem:[%s10151_s5 + $0x328] sm:$0xff] }
 0x223   : > { %v6648_v40 = vcombine.high %v3318_v31, %v3322_v32  ;;  %v3310_v41 = vld [vmem:[%s10151_s5 + $0x2c8] sm:$0xff]  ;;  %v6647_v37 = vcombine.low %v3318_v31, %v3322_v32  ;;  %v3243_v31 = vld [vmem:[%s10151_s5 + $0xb0] sm:$0xff] }
 0x224   : > { %4831 = vmatprep.mubr.bf16.mxu0 %v9083_v18  ;;  %v3314_v43 = vld [vmem:[%s10151_s5 + $0x2e8] sm:$0xff] }
 0x225   : > { %4832 = vmatmul.mubr.bf16.vlgmr.msra.gmra.mxu0 %v9087_v46  ;;  %v6640_v34 = vcombine.high %v3310_v41, %v3314_v43 }
 0x226   : > { %4882 = vmatpush1.bf16.msra.mxu0 %v6607_v45  ;;  %4913 = vmatprep.mubr.bf16.mxu0 %v9083_v18  ;;  %v6639_v45 = vcombine.low %v3310_v41, %v3314_v43  ;;  %v3235_v41 = vld [vmem:[%s10151_s5 + $0x70] sm:$0xff] }
 0x227   : > { %4883 = vmatprep.subr.bf16.mxu0 %v6600_v47  ;;  %v6632_v47 = vcombine.high %v3302_v8, %v3306_v44  ;;  %v3227_v8 = vld [vmem:[%s10151_s5 + $0x30] sm:$0xff] }
 0x22a   : > { %4884 = vmatpush1.bf16.msra.mxu0 %v6599_v13  ;;  %v6624_v13 = vcombine.high %v3294_v51, %v3298_v54 }
 0x22b   : > { %4885 = vmatprep.subr.bf16.mxu0 %v6592_v11  ;;  %v3286_v11 = vld [vmem:[%s10151_s5 + $0x208] sm:$0xff] }
 0x22c   : > { %v6616_v0 = vcombine.high %v3286_v11, %v3290_v7 }
 0x22e   : > { %4886 = vmatpush1.bf16.msra.mxu0 %v6591_v61 }
 0x22f   : > { %4887 = vmatprep.subr.bf16.mxu0 %v6584_v62  ;;  %v6623_v62 = vcombine.low %v3294_v51, %v3298_v54  ;;  %v3347_v51 = vld [vmem:[%s10151_s5 + $0x3f0] sm:$0xff] }
 0x232   : > { %4888 = vmatpush1.bf16.msra.mxu0 %v6583_v1 }
 0x233   : > { %4889 = vmatprep.subr.bf16.mxu0 %v6576_v2  ;;  %v3279_v2 = vld [vmem:[%s10151_s5 + $0x1d0] sm:$0xff] }
 0x234   : > { %v6610_v17 = vcombine.high %v3279_v2, %v3283_v3  ;;  %v6609_v22 = vcombine.low %v3279_v2, %v3283_v3  ;;  %v3331_v2 = vld [vmem:[%s10151_s5 + $0x370] sm:$0xff] }
 0x236   : > { %4890 = vmatpush1.bf16.msra.mxu0 %v6575_v5 }
 0x237   : > { %4891 = vmatprep.subr.bf16.mxu0 %v6568_v6  ;;  %v6615_v6 = vcombine.low %v3286_v11, %v3290_v7  ;;  %v3339_v11 = vld [vmem:[%s10151_s5 + $0x3b0] sm:$0xff] }
 0x23a   : > { %4892 = vmatpush1.bf16.msra.mxu0 %v6567_v19 }
 0x23b   : > { %4893 = vmatprep.subr.bf16.mxu0 %v6560_v20  ;;  %v3271_v20 = vld [vmem:[%s10151_s5 + $0x190] sm:$0xff] }
 0x23c   : > { %v6601_v24 = vcombine.low %v3271_v20, %v3275_v21 }
 0x23e   : > { %4894 = vmatpush1.bf16.msra.mxu0 %v6559_v52  ;;  %v6602_v52 = vcombine.high %v3271_v20, %v3275_v21  ;;  %v3315_v20 = vld [vmem:[%s10151_s5 + $0x2f0] sm:$0xff] }
 0x23f   : > { %4895 = vmatprep.subr.bf16.mxu0 %v6552_v55  ;;  %v3263_v55 = vld [vmem:[%s10151_s5 + $0x150] sm:$0xff] }
 0x240   : > { %v6593_v38 = vcombine.low %v3263_v55, %v3267_v23 }
 0x242   : > { %4896 = vmatpush1.bf16.msra.mxu0 %v6551_v25  ;;  %v6594_v25 = vcombine.high %v3263_v55, %v3267_v23  ;;  %v3303_v55 = vld [vmem:[%s10151_s5 + $0x290] sm:$0xff] }
 0x243   : > { %4897 = vmatprep.subr.bf16.mxu0 %v6672_v35  ;;  %v3255_v35 = vld [vmem:[%s10151_s5 + $0x110] sm:$0xff] }
 0x244   : > { %v6585_v29 = vcombine.low %v3255_v35, %v3259_v26  ;;  %v3307_v23 = vld [vmem:[%s10151_s5 + $0x2b0] sm:$0xff] }
 0x246   : > { %4898 = vmatpush2.bf16.msra.mxu0 %v6671_v27  ;;  %v6586_v27 = vcombine.high %v3255_v35, %v3259_v26  ;;  %v6634_v35 = vcombine.high %v3303_v55, %v3307_v23 }
 0x247   : > { %4899 = vmatprep.subr.bf16.mxu0 %v6664_v53  ;;  %v3247_v53 = vld [vmem:[%s10151_s5 + $0xd0] sm:$0xff] }
 0x248   : > { %v6577_v32 = vcombine.low %v3247_v53, %v3251_v28 }
 0x24a   : > { %4900 = vmatpush2.bf16.msra.mxu0 %v6663_v30  ;;  %v6578_v30 = vcombine.high %v3247_v53, %v3251_v28  ;;  %v6633_v28 = vcombine.low %v3303_v55, %v3307_v23 }
 0x24b   : > { %4901 = vmatprep.subr.bf16.mxu0 %v6656_v58  ;;  %v3239_v58 = vld [vmem:[%s10151_s5 + $0x90] sm:$0xff] }
 0x24c   : > { %v6569_v43 = vcombine.low %v3239_v58, %v3243_v31 }
 0x24e   : > { %4902 = vmatpush2.bf16.msra.mxu0 %v6655_v57  ;;  %v6570_v57 = vcombine.high %v3239_v58, %v3243_v31 }
 0x24f   : > { %4903 = vmatprep.subr.bf16.mxu0 %v6648_v40  ;;  %v3231_v40 = vld [vmem:[%s10151_s5 + $0x50] sm:$0xff] }
 0x250   : > { %v6561_v44 = vcombine.low %v3231_v40, %v3235_v41 }
 0x252   : > { %4904 = vmatpush2.bf16.msra.mxu0 %v6647_v37  ;;  %v6562_v37 = vcombine.high %v3231_v40, %v3235_v41 }
 0x253   : > { %4905 = vmatprep.subr.bf16.mxu0 %v6640_v34  ;;  %v3223_v34 = vld [vmem:[%s10151_s5 + $0x10] sm:$0xff] }
 0x254   : > { %v6553_v54 = vcombine.low %v3223_v34, %v3227_v8 }
 0x256   : > { %4906 = vmatpush2.bf16.msra.mxu0 %v6639_v45  ;;  %v6554_v45 = vcombine.high %v3223_v34, %v3227_v8  ;;  %v3280_v34 = vld [vmem:[%s10151_s5 + $0x1d8] sm:$0xff] }
 0x257   : > { %4907 = vmatprep.subr.bf16.mxu0 %v6632_v47  ;;  %v3343_v47 = vld [vmem:[%s10151_s5 + $0x3d0] sm:$0xff]  ;;  %v3284_v8 = vld [vmem:[%s10151_s5 + $0x1f8] sm:$0xff] }
 0x258   : > { %v6673_v7 = vcombine.low %v3343_v47, %v3347_v51 }
 0x259   : > { %v9190_v60 = vpop.f32.mrf.mxu0  ;;  %v9192_v61 = vpop.f32.mrf.mxu1 }
 0x25a   : > { %4908 = vmatpush2.bf16.msra.mxu0 %v6631_v59  ;;  %v6674_v59 = vcombine.high %v3343_v47, %v3347_v51 }
 0x25b   : > { %v9194_v63 = vpop.f32.mrf.mxu0  ;;  %4909 = vmatprep.subr.bf16.mxu0 %v6624_v13  ;;  %v9196_v1 = vpop.f32.mrf.mxu1  ;;  %v3335_v13 = vld [vmem:[%s10151_s5 + $0x390] sm:$0xff] }
 0x25c   : > { %v6665_v3 = vcombine.low %v3335_v13, %v3339_v11 }
 0x25d   : > { %v3087_v4 = vpop.f32.mrf.mxu0  ;;  %v3128_v5 = vpop.f32.mrf.mxu1 }
 0x25e   : > { %4910 = vmatpush2.bf16.msra.mxu0 %v6623_v62  ;;  %v6666_v62 = vcombine.high %v3335_v13, %v3339_v11  ;;  %v3319_v5 = vld [vmem:[%s10151_s5 + $0x310] sm:$0xff] }
 0x25f   : > { %v3088_v16 = vpop.f32.mrf.mxu0  ;;  %4911 = vmatprep.subr.bf16.mxu0 %v6616_v0  ;;  %v3129_v19 = vpop.f32.mrf.mxu1  ;;  %v3327_v0 = vld [vmem:[%s10151_s5 + $0x350] sm:$0xff] }
 0x260   : > { %v6658_v4 = vcombine.high %v3327_v0, %v3331_v2  ;;  %v6657_v16 = vcombine.low %v3327_v0, %v3331_v2  ;;  %v3311_v19 = vld [vmem:[%s10151_s5 + $0x2d0] sm:$0xff]  ;;  %v3272_v0 = vld [vmem:[%s10151_s5 + $0x198] sm:$0xff] }
 0x261   : > { %v3276_v2 = vld [vmem:[%s10151_s5 + $0x1b8] sm:$0xff] }
 0x262   : > { %4912 = vmatpush2.bf16.msra.mxu0 %v6615_v6  ;;  %v3323_v6 = vld [vmem:[%s10151_s5 + $0x330] sm:$0xff] }
 0x263   : > { %4963 = vmatprep.subr.bf16.mxu0 %v6610_v17  ;;  %v6650_v17 = vcombine.high %v3319_v5, %v3323_v6  ;;  %v6649_v21 = vcombine.low %v3319_v5, %v3323_v6  ;;  %v6611_v5 = vcombine.low %v3280_v34, %v3284_v8 }
 0x265   : > { %4914 = vmatmul.mubr.bf16.vlgmr.msra.gmra.mxu0 %v9087_v46 }
 0x266   : > { %4964 = vmatpush1.bf16.msra.mxu0 %v6609_v22  ;;  %4995 = vmatprep.mubr.bf16.mxu0 %v9083_v18  ;;  %v6642_v22 = vcombine.high %v3311_v19, %v3315_v20 }
 0x267   : > { %4965 = vmatprep.subr.bf16.mxu0 %v6602_v52  ;;  %v1596_v52 = vrot.slane %v9025_v50, %v8218_v12 }
 0x269   : > { %v3084_v26 = vadd.f32 %v9190_v60, %v1596_v52  ;;  %v3287_v60 = vld [vmem:[%s10151_s5 + $0x210] sm:$0xff]  ;;  %v6603_v52 = vcombine.low %v3272_v0, %v3276_v2 }
 0x26a   : > { %4966 = vmatpush1.bf16.msra.mxu0 %v6601_v24  ;;  %v1600_v24 = vrot.slane %v9025_v50, %v8224_v15 }
 0x26b   : > { %4967 = vmatprep.subr.bf16.mxu0 %v6594_v25  ;;  %v6641_v25 = vcombine.low %v3311_v19, %v3315_v20  ;;  %v3394_v19 = vld [vmem:[%s10151_s5 + $0x568] sm:$0xff]  ;;  %v3264_v20 = vld [vmem:[%s10151_s5 + $0x158] sm:$0xff] }
 0x26c   : > { %v3086_v53 = vadd.f32 %v9194_v63, %v1600_v24  ;;  %v3382_v24 = vld [vmem:[%s10151_s5 + $0x508] sm:$0xff] }
 0x26e   : > { %4968 = vmatpush1.bf16.msra.mxu0 %v6593_v38  ;;  %v3295_v38 = vld [vmem:[%s10151_s5 + $0x250] sm:$0xff]  ;;  %v3127_v31 = vadd.f32 %v9196_v1, %v3086_v53  ;;  %v3248_v53 = vld [vmem:[%s10151_s5 + $0xd8] sm:$0xff] }
 0x26f   : > { %4969 = vmatprep.subr.bf16.mxu0 %v6586_v27  ;;  %v3299_v27 = vld [vmem:[%s10151_s5 + $0x270] sm:$0xff] }
 0x270   : > { %v6626_v50 = vcombine.high %v3295_v38, %v3299_v27  ;;  %v6625_v63 = vcombine.low %v3295_v38, %v3299_v27  ;;  %v3374_v38 = vld [vmem:[%s10151_s5 + $0x4c8] sm:$0xff] }
 0x271   : > { %v3378_v27 = vld [vmem:[%s10151_s5 + $0x4e8] sm:$0xff] }
 0x272   : > { %4970 = vmatpush1.bf16.msra.mxu0 %v6585_v29  ;;  %v3125_v29 = vadd.f32 %v9192_v61, %v3084_v26 }
 0x273   : > { %4971 = vmatprep.subr.bf16.mxu0 %v6578_v30  ;;  %v3291_v30 = vld [vmem:[%s10151_s5 + $0x230] sm:$0xff] }
 0x274   : > { %v6618_v41 = vcombine.high %v3287_v60, %v3291_v30  ;;  %v6617_v47 = vcombine.low %v3287_v60, %v3291_v30  ;;  %v6704_v60 = vcombine.high %v3374_v38, %v3378_v27 }
 0x276   : > { %4972 = vmatpush1.bf16.msra.mxu0 %v6577_v32 }
 0x277   : > { %4973 = vmatprep.subr.bf16.mxu0 %v6570_v57 }
 0x27a   : > { %4974 = vmatpush1.bf16.msra.mxu0 %v6569_v43 }
 0x27b   : > { %4975 = vmatprep.subr.bf16.mxu0 %v6562_v37 }
 0x27e   : > { %4976 = vmatpush1.bf16.msra.mxu0 %v6561_v44 }
 0x27f   : > { %4977 = vmatprep.subr.bf16.mxu0 %v6554_v45 }
 0x282   : > { %4978 = vmatpush1.bf16.msra.mxu0 %v6553_v54 }
 0x283   : > { %4979 = vmatprep.subr.bf16.mxu0 %v6674_v59  ;;  %v6612_v59 = vcombine.high %v3280_v34, %v3284_v8  ;;  %v3232_v34 = vld [vmem:[%s10151_s5 + $0x58] sm:$0xff] }
 0x284   : > { %v3236_v8 = vld [vmem:[%s10151_s5 + $0x78] sm:$0xff] }
 0x286   : > { %4980 = vmatpush2.bf16.msra.mxu0 %v6673_v7  ;;  %v3398_v7 = vld [vmem:[%s10151_s5 + $0x588] sm:$0xff] }
 0x287   : > { %4981 = vmatprep.subr.bf16.mxu0 %v6666_v62  ;;  %v3402_v62 = vld [vmem:[%s10151_s5 + $0x5a8] sm:$0xff] }
 0x288   : > { %v6728_v6 = vcombine.high %v3398_v7, %v3402_v62 }
 0x28a   : > { %4982 = vmatpush2.bf16.msra.mxu0 %v6665_v3 }
 0x28b   : > { %4983 = vmatprep.subr.bf16.mxu0 %v6658_v4 }
 0x28e   : > { %4984 = vmatpush2.bf16.msra.mxu0 %v6657_v16  ;;  %v6604_v16 = vcombine.high %v3272_v0, %v3276_v2  ;;  %v3470_v2 = vld [vmem:[%s10151_s5 + $0x7c8] sm:$0xff] }
 0x28f   : > { %4985 = vmatprep.subr.bf16.mxu0 %v6650_v17  ;;  %v3390_v17 = vld [vmem:[%s10151_s5 + $0x548] sm:$0xff] }
 0x290   : > { %v6720_v55 = vcombine.high %v3390_v17, %v3394_v19 }
 0x292   : > { %4986 = vmatpush2.bf16.msra.mxu0 %v6649_v21  ;;  %v3268_v21 = vld [vmem:[%s10151_s5 + $0x178] sm:$0xff] }
 0x293   : > { %4987 = vmatprep.subr.bf16.mxu0 %v6642_v22  ;;  %v6727_v22 = vcombine.low %v3398_v7, %v3402_v62  ;;  %v6596_v23 = vcombine.high %v3264_v20, %v3268_v21  ;;  %v6563_v7 = vcombine.low %v3232_v34, %v3236_v8 }
 0x296   : > { %4988 = vmatpush2.bf16.msra.mxu0 %v6641_v25  ;;  %v6595_v25 = vcombine.low %v3264_v20, %v3268_v21 }
 0x297   : > { %4989 = vmatprep.subr.bf16.mxu0 %v6634_v35  ;;  %v6712_v35 = vcombine.high %v3382_v24, %v3386_v48 }
 0x299   : > { %v3165_v58 = vpop.f32.mrf.mxu0 }
 0x29a   : > { %v3166_v32 = vadd.f32 %v3165_v58, %v3125_v29  ;;  %v3206_v57 = vpop.f32.mrf.mxu1  ;;  %4990 = vmatpush2.bf16.msra.mxu0 %v6633_v28  ;;  %v3252_v28 = vld [vmem:[%s10151_s5 + $0xf8] sm:$0xff]  ;;  %v3366_v58 = vld [vmem:[%s10151_s5 + $0x488] sm:$0xff] }
 0x29b   : > { %v3167_v40 = vpop.f32.mrf.mxu0  ;;  %4991 = vmatprep.subr.bf16.mxu0 %v6626_v50  ;;  %v6711_v50 = vcombine.low %v3382_v24, %v3386_v48  ;;  %v6580_v30 = vcombine.high %v3248_v53, %v3252_v28 }
 0x29c   : > { %v3207_v43 = vadd.f32 %v3206_v57, %v3166_v32  ;;  %v3168_v61 = vadd.f32 %v3167_v40, %v3127_v31  ;;  %v3208_v37 = vpop.f32.mrf.mxu1  ;;  %v3370_v31 = vld [vmem:[%s10151_s5 + $0x4a8] sm:$0xff]  ;;  %v3240_v32 = vld [vmem:[%s10151_s5 + $0x98] sm:$0xff]  ;;  %v6579_v40 = vcombine.low %v3248_v53, %v3252_v28 }
 0x29d   : > { %v3169_v44 = vpop.f32.mrf.mxu0  ;;  %v3244_v57 = vld [vmem:[%s10151_s5 + $0xb8] sm:$0xff] }
 0x29e   : > { %v3209_v1 = vadd.f32 %v3208_v37, %v3168_v61  ;;  %v3210_v45 = vpop.f32.mrf.mxu1  ;;  %4992 = vmatpush2.bf16.msra.mxu0 %v6625_v63  ;;  %v3215_v51 = vmax.f32 %v3207_v43, 0.0  ;;  %v6703_v63 = vcombine.low %v3374_v38, %v3378_v27  ;;  %v6572_v43 = vcombine.high %v3240_v32, %v3244_v57  ;;  %v3358_v61 = vld [vmem:[%s10151_s5 + $0x448] sm:$0xff] }
 0x29f   : > { %v3170_v54 = vpop.f32.mrf.mxu0  ;;  %4993 = vmatprep.subr.bf16.mxu0 %v6618_v41  ;;  %v6696_v41 = vcombine.high %v3366_v58, %v3370_v31  ;;  %v3362_v37 = vld [vmem:[%s10151_s5 + $0x468] sm:$0xff]  ;;  %v6695_v44 = vcombine.low %v3366_v58, %v3370_v31 }
 0x2a0   : > { %v3216_v13 = vmax.f32 %v3209_v1, 0.0  ;;  %v3211_v11 = vpop.f32.mrf.mxu1  ;;  %v9324_v4 = vpack.c.bf16 %v3215_v51, %v3215_v51  ;;  %v6571_v1 = vcombine.low %v3240_v32, %v3244_v57  ;;  %v6688_v45 = vcombine.high %v3358_v61, %v3362_v37  ;;  %v3350_v51 = vld [vmem:[%s10151_s5 + $0x408] sm:$0xff] }
 0x2a1   : > { %v3354_v54 = vld [vmem:[%s10151_s5 + $0x428] sm:$0xff]  ;;  %v6687_v11 = vcombine.low %v3358_v61, %v3362_v37 }
 0x2a2   : > { %v9322_v3 = vpack.c.bf16 %v3216_v13, %v3216_v13  ;;  %4994 = vmatpush2.bf16.msra.mxu0 %v6617_v47  ;;  %v6564_v47 = vcombine.high %v3232_v34, %v3236_v8  ;;  %v3228_v13 = vld [vmem:[%s10151_s5 + $0x38] sm:$0xff]  ;;  %v6680_v62 = vcombine.high %v3350_v51, %v3354_v54 }
 0x2a3   : > { %5045 = vmatprep.subr.bf16.mxu0 %v6612_v59  ;;  %v3224_v59 = vld [vmem:[%s10151_s5 + $0x18] sm:$0xff] }
 0x2a4   : > { %4872 = vmatprep.mubr.bf16.mxu1 %v9322_v3  ;;  %v6556_v0 = vcombine.high %v3224_v59, %v3228_v13 }
 0x2a5   : > { %4873 = vmatmul.mubr.bf16.vlgmr.msra.gmra.mxu1 %v9324_v4  ;;  %4996 = vmatmul.mubr.bf16.vlgmr.msra.gmra.mxu0 %v9087_v46 }
 0x2a6   : > { %4923 = vmatpush1.bf16.msra.mxu1 %v6735_v56  ;;  %4954 = vmatprep.mubr.bf16.mxu1 %v9322_v3  ;;  %v6719_v56 = vcombine.low %v3390_v17, %v3394_v19  ;;  %v6679_v17 = vcombine.low %v3350_v51, %v3354_v54  ;;  %v6555_v19 = vcombine.low %v3224_v59, %v3228_v13 }
 0x2a7   : > { %5046 = vmatpush1.bf16.msra.mxu0 %v6611_v5  ;;  %5077 = vmatprep.mubr.bf16.mxu0 %v9083_v18  ;;  %v3260_v18 = vld [vmem:[%s10151_s5 + $0x138] sm:$0xff]  ;;  %v3474_v5 = vld [vmem:[%s10151_s5 + $0x7e8] sm:$0xff] }
 0x2a8   : > { %4924 = vmatprep.subr.bf16.mxu1 %v6728_v6  ;;  %5047 = vmatprep.subr.bf16.mxu0 %v6604_v16  ;;  %v6588_v26 = vcombine.high %v3256_v49, %v3260_v18  ;;  %v6587_v29 = vcombine.low %v3256_v49, %v3260_v18  ;;  %v3344_v6 = vld [vmem:[%s10151_s5 + $0x3d8] sm:$0xff]  ;;  %v6800_v20 = vcombine.high %v3470_v2, %v3474_v5 }
 0x2a9   : > { %v3348_v16 = vld [vmem:[%s10151_s5 + $0x3f8] sm:$0xff]  ;;  %v6799_v24 = vcombine.low %v3470_v2, %v3474_v5 }
 0x2aa   : > { %4925 = vmatpush1.bf16.msra.mxu1 %v6727_v22  ;;  %v6676_v21 = vcombine.high %v3344_v6, %v3348_v16  ;;  %v3462_v22 = vld [vmem:[%s10151_s5 + $0x788] sm:$0xff]  ;;  %v6675_v48 = vcombine.low %v3344_v6, %v3348_v16 }
 0x2ab   : > { %5048 = vmatpush1.bf16.msra.mxu0 %v6603_v52  ;;  %4926 = vmatprep.subr.bf16.mxu1 %v6720_v55  ;;  %v3466_v52 = vld [vmem:[%s10151_s5 + $0x7a8] sm:$0xff]  ;;  %v3336_v55 = vld [vmem:[%s10151_s5 + $0x398] sm:$0xff] }
 0x2ac   : > { %5049 = vmatprep.subr.bf16.mxu0 %v6596_v23  ;;  %v3340_v23 = vld [vmem:[%s10151_s5 + $0x3b8] sm:$0xff]  ;;  %v6792_v49 = vcombine.high %v3462_v22, %v3466_v52  ;;  %v6791_v38 = vcombine.low %v3462_v22, %v3466_v52 }
 0x2ad   : > { %v6668_v18 = vcombine.high %v3336_v55, %v3340_v23  ;;  %v6667_v27 = vcombine.low %v3336_v55, %v3340_v23 }
 0x2ae   : > { %4927 = vmatpush1.bf16.msra.mxu1 %v6719_v56  ;;  %v3454_v56 = vld [vmem:[%s10151_s5 + $0x748] sm:$0xff] }
 0x2af   : > { %5050 = vmatpush1.bf16.msra.mxu0 %v6595_v25  ;;  %4928 = vmatprep.subr.bf16.mxu1 %v6712_v35  ;;  %v3458_v25 = vld [vmem:[%s10151_s5 + $0x768] sm:$0xff]  ;;  %v3328_v35 = vld [vmem:[%s10151_s5 + $0x358] sm:$0xff] }
 0x2b0   : > { %5051 = vmatprep.subr.bf16.mxu0 %v6588_v26  ;;  %v3332_v26 = vld [vmem:[%s10151_s5 + $0x378] sm:$0xff]  ;;  %v6784_v53 = vcombine.high %v3454_v56, %v3458_v25  ;;  %v6783_v58 = vcombine.low %v3454_v56, %v3458_v25  ;;  %v3399_v25 = vld [vmem:[%s10151_s5 + $0x590] sm:$0xff] }
 0x2b1   : > { %v6660_v28 = vcombine.high %v3328_v35, %v3332_v26  ;;  %v6659_v31 = vcombine.low %v3328_v35, %v3332_v26  ;;  %v3403_v35 = vld [vmem:[%s10151_s5 + $0x5b0] sm:$0xff] }
 0x2b2   : > { %4929 = vmatpush1.bf16.msra.mxu1 %v6711_v50  ;;  %v3446_v50 = vld [vmem:[%s10151_s5 + $0x708] sm:$0xff]  ;;  %v7333_v26 = vld [vmem:[%s10153_s7 + $0x74] ss:$8 sps:$4 sm:$0xff]  }
 0x2b3   : > { %5052 = vmatpush1.bf16.msra.mxu0 %v6587_v29  ;;  %4930 = vmatprep.subr.bf16.mxu1 %v6704_v60  ;;  %v3450_v29 = vld [vmem:[%s10151_s5 + $0x728] sm:$0xff]  ;;  %v3320_v60 = vld [vmem:[%s10151_s5 + $0x318] sm:$0xff] }
 0x2b4   : > { %5053 = vmatprep.subr.bf16.mxu0 %v6580_v30  ;;  %v3324_v30 = vld [vmem:[%s10151_s5 + $0x338] sm:$0xff]  ;;  %v6776_v32 = vcombine.high %v3446_v50, %v3450_v29  ;;  %v6775_v61 = vcombine.low %v3446_v50, %v3450_v29 }
 0x2b5   : > { %v6652_v57 = vcombine.high %v3320_v60, %v3324_v30  ;;  %v6651_v37 = vcombine.low %v3320_v60, %v3324_v30  ;;  %v7331_v50 = vld [vmem:[%s10153_s7 + $0x70] ss:$8 sps:$4 sm:$0xff]   ;;  %v7336_v60 = vld [vmem:[%s10153_s7 + $0x64] ss:$8 sps:$4 sm:$0xff]   ;;  %v6729_v30 = vcombine.low %v3399_v25, %v3403_v35 }
 0x2b6   : > { %4931 = vmatpush1.bf16.msra.mxu1 %v6703_v63  ;;  %v3438_v63 = vld [vmem:[%s10151_s5 + $0x6c8] sm:$0xff] }
 0x2b7   : > { %5054 = vmatpush1.bf16.msra.mxu0 %v6579_v40  ;;  %4932 = vmatprep.subr.bf16.mxu1 %v6696_v41  ;;  %v3442_v40 = vld [vmem:[%s10151_s5 + $0x6e8] sm:$0xff]  ;;  %v3312_v41 = vld [vmem:[%s10151_s5 + $0x2d8] sm:$0xff] }
 0x2b8   : > { %5055 = vmatprep.subr.bf16.mxu0 %v6572_v43  ;;  %v3316_v43 = vld [vmem:[%s10151_s5 + $0x2f8] sm:$0xff]  ;;  %v6768_v34 = vcombine.high %v3438_v63, %v3442_v40  ;;  %v6767_v51 = vcombine.low %v3438_v63, %v3442_v40  ;;  %v7334_v63 = vld [vmem:[%s10153_s7 + $0x60] ss:$8 sps:$4 sm:$0xff]  }
 0x2b9   : > { %v6644_v8 = vcombine.high %v3312_v41, %v3316_v43  ;;  %v6643_v54 = vcombine.low %v3312_v41, %v3316_v43 }
 0x2ba   : > { %4933 = vmatpush1.bf16.msra.mxu1 %v6695_v44  ;;  %v3430_v44 = vld [vmem:[%s10151_s5 + $0x688] sm:$0xff] }
 0x2bb   : > { %5056 = vmatpush1.bf16.msra.mxu0 %v6571_v1  ;;  %4934 = vmatprep.subr.bf16.mxu1 %v6688_v45  ;;  %v3434_v1 = vld [vmem:[%s10151_s5 + $0x6a8] sm:$0xff]  ;;  %v3304_v45 = vld [vmem:[%s10151_s5 + $0x298] sm:$0xff] }
 0x2bc   : > { %5057 = vmatprep.subr.bf16.mxu0 %v6564_v47  ;;  %v3308_v47 = vld [vmem:[%s10151_s5 + $0x2b8] sm:$0xff]  ;;  %v6760_v59 = vcombine.high %v3430_v44, %v3434_v1  ;;  %v6759_v2 = vcombine.low %v3430_v44, %v3434_v1  ;;  %v7342_v44 = vld [vmem:[%s10153_s7 + $0x44] ss:$8 sps:$4 sm:$0xff]  }
 0x2bd   : > { %v6636_v13 = vcombine.high %v3304_v45, %v3308_v47  ;;  %v6635_v5 = vcombine.low %v3304_v45, %v3308_v47  ;;  %v3367_v47 = vld [vmem:[%s10151_s5 + $0x490] sm:$0xff] }
 0x2be   : > { %4935 = vmatpush1.bf16.msra.mxu1 %v6687_v11  ;;  %v3422_v11 = vld [vmem:[%s10151_s5 + $0x648] sm:$0xff] }
 0x2bf   : > { %5058 = vmatpush1.bf16.msra.mxu0 %v6563_v7  ;;  %4936 = vmatprep.subr.bf16.mxu1 %v6680_v62  ;;  %v3426_v7 = vld [vmem:[%s10151_s5 + $0x668] sm:$0xff]  ;;  %v3296_v62 = vld [vmem:[%s10151_s5 + $0x258] sm:$0xff] }
 0x2c0   : > { %5059 = vmatprep.subr.bf16.mxu0 %v6556_v0  ;;  %v3300_v0 = vld [vmem:[%s10151_s5 + $0x278] sm:$0xff]  ;;  %v6752_v6 = vcombine.high %v3422_v11, %v3426_v7  ;;  %v6751_v22 = vcombine.low %v3422_v11, %v3426_v7  ;;  %v3359_v7 = vld [vmem:[%s10151_s5 + $0x450] sm:$0xff] }
 0x2c1   : > { %v6628_v16 = vcombine.high %v3296_v62, %v3300_v0  ;;  %v6627_v52 = vcombine.low %v3296_v62, %v3300_v0  ;;  %v3363_v62 = vld [vmem:[%s10151_s5 + $0x470] sm:$0xff] }
 0x2c2   : > { %4937 = vmatpush1.bf16.msra.mxu1 %v6679_v17  ;;  %v3414_v17 = vld [vmem:[%s10151_s5 + $0x608] sm:$0xff]  ;;  %v7343_v0 = vld [vmem:[%s10153_s7 + $0x30] ss:$8 sps:$4 sm:$0xff]  }
 0x2c3   : > { %5060 = vmatpush1.bf16.msra.mxu0 %v6555_v19  ;;  %4938 = vmatprep.subr.bf16.mxu1 %v6800_v20  ;;  %v3418_v19 = vld [vmem:[%s10151_s5 + $0x628] sm:$0xff]  ;;  %v3288_v20 = vld [vmem:[%s10151_s5 + $0x218] sm:$0xff] }
 0x2c4   : > { %5061 = vmatprep.subr.bf16.mxu0 %v6676_v21  ;;  %v3292_v21 = vld [vmem:[%s10151_s5 + $0x238] sm:$0xff]  ;;  %v6744_v55 = vcombine.high %v3414_v17, %v3418_v19 }
 0x2c5   : > { %v6620_v23 = vcombine.high %v3288_v20, %v3292_v21 }
 0x2c6   : > { %4939 = vmatpush2.bf16.msra.mxu1 %v6799_v24  ;;  %v3407_v24 = vld [vmem:[%s10151_s5 + $0x5d0] sm:$0xff] }
 0x2c7   : > { %5062 = vmatpush2.bf16.msra.mxu0 %v6675_v48  ;;  %4940 = vmatprep.subr.bf16.mxu1 %v6792_v49  ;;  %v3411_v48 = vld [vmem:[%s10151_s5 + $0x5f0] sm:$0xff]  ;;  %v6743_v49 = vcombine.low %v3414_v17, %v3418_v19  ;;  %v7346_v19 = vld [vmem:[%s10153_s7 + $0x20] ss:$8 sps:$4 sm:$0xff]  }
 0x2c8   : > { %5063 = vmatprep.subr.bf16.mxu0 %v6668_v18  ;;  %v6619_v18 = vcombine.low %v3288_v20, %v3292_v21  ;;  %v6738_v56 = vcombine.high %v3407_v24, %v3411_v48  ;;  %v3355_v17 = vld [vmem:[%s10151_s5 + $0x430] sm:$0xff]  ;;  %v6689_v21 = vcombine.low %v3359_v7, %v3363_v62 }
 0x2c9   : > { %v7351_v20 = vld [vmem:[%s10153_s7 + $0x14] ss:$8 sps:$4 sm:$0xff]  }
 0x2ca   : > { %4941 = vmatpush2.bf16.msra.mxu1 %v6791_v38  ;;  %v6737_v38 = vcombine.low %v3407_v24, %v3411_v48  ;;  %v7354_v24 = vld [vmem:[%s10153_s7 + $0x4] ss:$8 sps:$4 sm:$0xff]  }
 0x2cb   : > { %5064 = vmatpush2.bf16.msra.mxu0 %v6667_v27  ;;  %4942 = vmatprep.subr.bf16.mxu1 %v6784_v53  ;;  %v6730_v27 = vcombine.high %v3399_v25, %v3403_v35  ;;  %v3391_v53 = vld [vmem:[%s10151_s5 + $0x550] sm:$0xff]  ;;  %v7352_v25 = vld [vmem:[%s10153_s7] ss:$8 sps:$4 sm:$0xff]  }
 0x2cc   : > { %5065 = vmatprep.subr.bf16.mxu0 %v6660_v28  ;;  %v3395_v28 = vld [vmem:[%s10151_s5 + $0x570] sm:$0xff] }
 0x2cd   : > { %v6721_v41 = vcombine.low %v3391_v53, %v3395_v28  ;;  %v7357_v35 = vld [vmem:[%s10153_s7 + $0xf4] ss:$8 sps:$4 sm:$0xff]  }
 0x2ce   : > { %4943 = vmatpush2.bf16.msra.mxu1 %v6783_v58 }
 0x2cf   : > { %5066 = vmatpush2.bf16.msra.mxu0 %v6659_v31  ;;  %4944 = vmatprep.subr.bf16.mxu1 %v6776_v32  ;;  %v6722_v31 = vcombine.high %v3391_v53, %v3395_v28  ;;  %v3383_v32 = vld [vmem:[%s10151_s5 + $0x510] sm:$0xff] }
 0x2d0   : > { %5067 = vmatprep.subr.bf16.mxu0 %v6652_v57  ;;  %v3387_v57 = vld [vmem:[%s10151_s5 + $0x530] sm:$0xff] }
 0x2d1   : > { %v6713_v1 = vcombine.low %v3383_v32, %v3387_v57  ;;  %v3459_v53 = vld [vmem:[%s10151_s5 + $0x770] sm:$0xff] }
 0x2d2   : > { %4945 = vmatpush2.bf16.msra.mxu1 %v6775_v61  ;;  %v6714_v61 = vcombine.high %v3383_v32, %v3387_v57  ;;  %v7355_v28 = vld [vmem:[%s10153_s7 + $0xf0] ss:$8 sps:$4 sm:$0xff]   ;;  %v7358_v57 = vld [vmem:[%s10153_s7 + $0xe0] ss:$8 sps:$4 sm:$0xff]  }
 0x2d3   : > { %5068 = vmatpush2.bf16.msra.mxu0 %v6651_v37  ;;  %4946 = vmatprep.subr.bf16.mxu1 %v6768_v34  ;;  %v3375_v37 = vld [vmem:[%s10151_s5 + $0x4d0] sm:$0xff] }
 0x2d4   : > { %5069 = vmatprep.subr.bf16.mxu0 %v6644_v8  ;;  %v3379_v34 = vld [vmem:[%s10151_s5 + $0x4f0] sm:$0xff] }
 0x2d5   : > { %v7337_v8 = vld [vmem:[%s10153_s7 + $0x50] ss:$8 sps:$4 sm:$0xff]   ;;  %v6706_v45 = vcombine.high %v3375_v37, %v3379_v34 }
 0x2d6   : > { %4947 = vmatpush2.bf16.msra.mxu1 %v6767_v51  ;;  %v3371_v51 = vld [vmem:[%s10151_s5 + $0x4b0] sm:$0xff] }
 0x2d7   : > { %5070 = vmatpush2.bf16.msra.mxu0 %v6643_v54  ;;  %4948 = vmatprep.subr.bf16.mxu1 %v6760_v59  ;;  %v7340_v54 = vld [vmem:[%s10153_s7 + $0x40] ss:$8 sps:$4 sm:$0xff]   ;;  %v7345_v59 = vld [vmem:[%s10153_s7 + $0x34] ss:$8 sps:$4 sm:$0xff]   ;;  %v6698_v11 = vcombine.high %v3367_v47, %v3371_v51 }
 0x2d8   : > { %5071 = vmatprep.subr.bf16.mxu0 %v6636_v13  ;;  %v6705_v13 = vcombine.low %v3375_v37, %v3379_v34  ;;  %v3451_v32 = vld [vmem:[%s10151_s5 + $0x730] sm:$0xff]  ;;  %v7366_v37 = vld [vmem:[%s10153_s7 + $0xc4] ss:$8 sps:$4 sm:$0xff]  }
 0x2da   : > { %4949 = vmatpush2.bf16.msra.mxu1 %v6759_v2  ;;  %v7348_v2 = vld [vmem:[%s10153_s7 + $0x24] ss:$8 sps:$4 sm:$0xff]  }
 0x2db   : > { %5072 = vmatpush2.bf16.msra.mxu0 %v6635_v5  ;;  %4950 = vmatprep.subr.bf16.mxu1 %v6752_v6  ;;  %v6697_v5 = vcombine.low %v3367_v47, %v3371_v51  ;;  %v6690_v6 = vcombine.high %v3359_v7, %v3363_v62  ;;  %v7369_v47 = vld [vmem:[%s10153_s7 + $0xb4] ss:$8 sps:$4 sm:$0xff]   ;;  %v7372_v7 = vld [vmem:[%s10153_s7 + $0xa4] ss:$8 sps:$4 sm:$0xff]  }
 0x2dc   : > { %5073 = vmatprep.subr.bf16.mxu0 %v6628_v16  ;;  %v3351_v16 = vld [vmem:[%s10151_s5 + $0x410] sm:$0xff] }
 0x2dd   : > { %v6681_v48 = vcombine.low %v3351_v16, %v3355_v17 }
 0x2de   : > { %4951 = vmatpush2.bf16.msra.mxu1 %v6751_v22  ;;  %v6682_v22 = vcombine.high %v3351_v16, %v3355_v17  ;;  %v7375_v16 = vld [vmem:[%s10153_s7 + $0x94] ss:$8 sps:$4 sm:$0xff]  }
 0x2df   : > { %5074 = vmatpush2.bf16.msra.mxu0 %v6627_v52  ;;  %4952 = vmatprep.subr.bf16.mxu1 %v6744_v55  ;;  %v3471_v52 = vld [vmem:[%s10151_s5 + $0x7d0] sm:$0xff] }
 0x2e0   : > { %5075 = vmatprep.subr.bf16.mxu0 %v6620_v23  ;;  %v3475_v55 = vld [vmem:[%s10151_s5 + $0x7f0] sm:$0xff] }
 0x2e1   : > { %v7349_v23 = vld [vmem:[%s10153_s7 + $0x10] ss:$8 sps:$4 sm:$0xff]  }
 0x2e2   : > { %4953 = vmatpush2.bf16.msra.mxu1 %v6743_v49  ;;  %v6802_v49 = vcombine.high %v3471_v52, %v3475_v55 }
 0x2e3   : > { %5076 = vmatpush2.bf16.msra.mxu0 %v6619_v18  ;;  %5004 = vmatprep.subr.bf16.mxu1 %v6738_v56  ;;  %v3463_v18 = vld [vmem:[%s10151_s5 + $0x790] sm:$0xff] }
 0x2e4   : > { %5923 = vmatprep.subr.bf16.mxu0 %v7333_v26  ;;  %v3467_v56 = vld [vmem:[%s10151_s5 + $0x7b0] sm:$0xff]  ;;  %v6801_v26 = vcombine.low %v3471_v52, %v3475_v55  ;;  %v7378_v52 = vld [vmem:[%s10153_s7 + $0x84] ss:$8 sps:$4 sm:$0xff]  }
 0x2e5   : > { %4955 = vmatmul.mubr.bf16.vlgmr.msra.gmra.mxu1 %v9324_v4  ;;  %v9527_v29 = vpop.f32.mrf.mxu0 }
 0x2e6   : > { %5005 = vmatpush1.bf16.msra.mxu1 %v6737_v38  ;;  %5036 = vmatprep.mubr.bf16.mxu1 %v9322_v3  ;;  %v6794_v38 = vcombine.high %v3463_v18, %v3467_v56 }
 0x2e7   : > { %5078 = vmatmul.mubr.bf16.vlgmr.msra.gmra.mxu0 %v9087_v46  ;;  %v9534_v58 = vpop.f32.mrf.mxu0  ;;  %5006 = vmatprep.subr.bf16.mxu1 %v6730_v27  ;;  %v7339_v46 = vld [vmem:[%s10153_s7 + $0x54] ss:$8 sps:$4 sm:$0xff]  }
 0x2e8   : > { %5924 = vmatpush1.bf16.msra.mxu0 %v7331_v50  ;;  %v3455_v27 = vld [vmem:[%s10151_s5 + $0x750] sm:$0xff]  ;;  %v7360_v50 = vld [vmem:[%s10153_s7 + $0xe4] ss:$8 sps:$4 sm:$0xff]  }
 0x2e9   : > { %v4837_v40 = vpop.f32.mrf.mxu0  ;;  %5925 = vmatprep.subr.bf16.mxu0 %v7336_v60  ;;  %v6793_v60 = vcombine.low %v3463_v18, %v3467_v56 }
 0x2ea   : > { %5007 = vmatpush1.bf16.msra.mxu1 %v6729_v30  ;;  %v6786_v30 = vcombine.high %v3455_v27, %v3459_v53  ;;  %v6785_v40 = vcombine.low %v3455_v27, %v3459_v53 }
 0x2eb   : > { %v4838_v43 = vpop.f32.mrf.mxu0  ;;  %5008 = vmatprep.subr.bf16.mxu1 %v6722_v31  ;;  %v3447_v31 = vld [vmem:[%s10151_s5 + $0x710] sm:$0xff] }
 0x2ec   : > { %5926 = vmatpush1.bf16.msra.mxu0 %v7334_v63  ;;  %v7363_v63 = vld [vmem:[%s10153_s7 + $0xd4] ss:$8 sps:$4 sm:$0xff]   ;;  %v6777_v34 = vcombine.low %v3447_v31, %v3451_v32 }
 0x2ed   : > { %5927 = vmatprep.subr.bf16.mxu0 %v7339_v46  ;;  %v6778_v46 = vcombine.high %v3447_v31, %v3451_v32  ;;  %v3443_v43 = vld [vmem:[%s10151_s5 + $0x6f0] sm:$0xff] }
 0x2ee   : > { %5009 = vmatpush1.bf16.msra.mxu1 %v6721_v41  ;;  %v3439_v41 = vld [vmem:[%s10151_s5 + $0x6d0] sm:$0xff] }
 0x2ef   : > { %5010 = vmatprep.subr.bf16.mxu1 %v6714_v61  ;;  %v7361_v61 = vld [vmem:[%s10153_s7 + $0xd0] ss:$8 sps:$4 sm:$0xff]   ;;  %v6769_v51 = vcombine.low %v3439_v41, %v3443_v43 }
 0x2f0   : > { %5928 = vmatpush1.bf16.msra.mxu0 %v7337_v8  ;;  %v6770_v8 = vcombine.high %v3439_v41, %v3443_v43  ;;  %v3368_v41 = vld [vmem:[%s10151_s5 + $0x498] sm:$0xff] }
 0x2f1   : > { %5929 = vmatprep.subr.bf16.mxu0 %v7342_v44  ;;  %v3431_v44 = vld [vmem:[%s10151_s5 + $0x690] sm:$0xff]  ;;  %v3372_v43 = vld [vmem:[%s10151_s5 + $0x4b8] sm:$0xff] }
 0x2f2   : > { %5011 = vmatpush1.bf16.msra.mxu1 %v6713_v1  ;;  %v3435_v1 = vld [vmem:[%s10151_s5 + $0x6b0] sm:$0xff] }
 0x2f3   : > { %5012 = vmatprep.subr.bf16.mxu1 %v6706_v45  ;;  %v7364_v45 = vld [vmem:[%s10153_s7 + $0xc0] ss:$8 sps:$4 sm:$0xff]   ;;  %v6761_v62 = vcombine.low %v3431_v44, %v3435_v1 }
 0x2f4   : > { %5930 = vmatpush1.bf16.msra.mxu0 %v7340_v54  ;;  %v6762_v54 = vcombine.high %v3431_v44, %v3435_v1  ;;  %v6699_v44 = vcombine.low %v3368_v41, %v3372_v43 }
 0x2f5   : > { %5931 = vmatprep.subr.bf16.mxu0 %v7345_v59  ;;  %v3423_v59 = vld [vmem:[%s10151_s5 + $0x650] sm:$0xff] }
 0x2f6   : > { %5013 = vmatpush1.bf16.msra.mxu1 %v6705_v13  ;;  %v3427_v13 = vld [vmem:[%s10151_s5 + $0x670] sm:$0xff] }
 0x2f7   : > { %5014 = vmatprep.subr.bf16.mxu1 %v6698_v11  ;;  %v7367_v11 = vld [vmem:[%s10153_s7 + $0xb0] ss:$8 sps:$4 sm:$0xff]   ;;  %v6753_v17 = vcombine.low %v3423_v59, %v3427_v13 }
 0x2f8   : > { %5932 = vmatpush1.bf16.msra.mxu0 %v7343_v0  ;;  %v6754_v0 = vcombine.high %v3423_v59, %v3427_v13  ;;  %v3472_v59 = vld [vmem:[%s10151_s5 + $0x7d8] sm:$0xff] }
 0x2f9   : > { %5933 = vmatprep.subr.bf16.mxu0 %v7348_v2  ;;  %v3415_v2 = vld [vmem:[%s10151_s5 + $0x610] sm:$0xff]  ;;  %v3476_v13 = vld [vmem:[%s10151_s5 + $0x7f8] sm:$0xff] }
 0x2fa   : > { %5015 = vmatpush1.bf16.msra.mxu1 %v6697_v5  ;;  %v3419_v5 = vld [vmem:[%s10151_s5 + $0x630] sm:$0xff] }
 0x2fb   : > { %5016 = vmatprep.subr.bf16.mxu1 %v6690_v6  ;;  %v7370_v6 = vld [vmem:[%s10153_s7 + $0xa0] ss:$8 sps:$4 sm:$0xff]   ;;  %v6745_v55 = vcombine.low %v3415_v2, %v3419_v5 }
 0x2fc   : > { %5934 = vmatpush1.bf16.msra.mxu0 %v7346_v19  ;;  %v6746_v19 = vcombine.high %v3415_v2, %v3419_v5  ;;  %v6803_v2 = vcombine.low %v3472_v59, %v3476_v13 }
 0x2fd   : > { %5935 = vmatprep.subr.bf16.mxu0 %v7351_v20  ;;  %v3408_v20 = vld [vmem:[%s10151_s5 + $0x5d8] sm:$0xff] }
 0x2fe   : > { %5017 = vmatpush1.bf16.msra.mxu1 %v6689_v21  ;;  %v3412_v21 = vld [vmem:[%s10151_s5 + $0x5f8] sm:$0xff] }
 0x2ff   : > { %5018 = vmatprep.subr.bf16.mxu1 %v6682_v22  ;;  %v7373_v22 = vld [vmem:[%s10153_s7 + $0x90] ss:$8 sps:$4 sm:$0xff]   ;;  %v6739_v18 = vcombine.low %v3408_v20, %v3412_v21 }
 0x300   : > { %5936 = vmatpush1.bf16.msra.mxu0 %v7349_v23  ;;  %v6740_v23 = vcombine.high %v3408_v20, %v3412_v21  ;;  %v3448_v20 = vld [vmem:[%s10151_s5 + $0x718] sm:$0xff] }
 0x301   : > { %5937 = vmatprep.subr.bf16.mxu0 %v7354_v24  ;;  %v3400_v24 = vld [vmem:[%s10151_s5 + $0x598] sm:$0xff] }
 0x302   : > { %5019 = vmatpush1.bf16.msra.mxu1 %v6681_v48  ;;  %v3404_v48 = vld [vmem:[%s10151_s5 + $0x5b8] sm:$0xff] }
 0x303   : > { %5020 = vmatprep.subr.bf16.mxu1 %v6802_v49  ;;  %v7376_v49 = vld [vmem:[%s10153_s7 + $0x80] ss:$8 sps:$4 sm:$0xff]   ;;  %v6732_v56 = vcombine.high %v3400_v24, %v3404_v48  ;;  %v3452_v21 = vld [vmem:[%s10151_s5 + $0x738] sm:$0xff] }
 0x304   : > { %5938 = vmatpush1.bf16.msra.mxu0 %v7352_v25  ;;  %v3392_v25 = vld [vmem:[%s10151_s5 + $0x558] sm:$0xff] }
 0x305   : > { %5939 = vmatprep.subr.bf16.mxu0 %v7357_v35  ;;  %v3396_v35 = vld [vmem:[%s10151_s5 + $0x578] sm:$0xff] }
 0x306   : > { %5021 = vmatpush2.bf16.msra.mxu1 %v6801_v26  ;;  %v6724_v53 = vcombine.high %v3392_v25, %v3396_v35 }
 0x307   : > { %5022 = vmatprep.subr.bf16.mxu1 %v6794_v38  ;;  %v6731_v38 = vcombine.low %v3400_v24, %v3404_v48  ;;  %v6779_v24 = vcombine.low %v3448_v20, %v3452_v21 }
 0x308   : > { %5940 = vmatpush2.bf16.msra.mxu0 %v7355_v28  ;;  %v3384_v28 = vld [vmem:[%s10151_s5 + $0x518] sm:$0xff] }
 0x309   : > { %5941 = vmatprep.subr.bf16.mxu0 %v7360_v50  ;;  %v3388_v50 = vld [vmem:[%s10151_s5 + $0x538] sm:$0xff] }
 0x30a   : > { %5023 = vmatpush2.bf16.msra.mxu1 %v6793_v60  ;;  %v6716_v32 = vcombine.high %v3384_v28, %v3388_v50 }
 0x30b   : > { %5024 = vmatprep.subr.bf16.mxu1 %v6786_v30  ;;  %v6723_v30 = vcombine.low %v3392_v25, %v3396_v35  ;;  %v3424_v35 = vld [vmem:[%s10151_s5 + $0x658] sm:$0xff] }
 0x30c   : > { %5942 = vmatpush2.bf16.msra.mxu0 %v7358_v57  ;;  %v3380_v57 = vld [vmem:[%s10151_s5 + $0x4f8] sm:$0xff] }
 0x30d   : > { %5943 = vmatprep.subr.bf16.mxu0 %v7363_v63  ;;  %v6715_v63 = vcombine.low %v3384_v28, %v3388_v50  ;;  %v3416_v50 = vld [vmem:[%s10151_s5 + $0x618] sm:$0xff] }
 0x30e   : > { %5025 = vmatpush2.bf16.msra.mxu1 %v6785_v40  ;;  %v7429_v40 = vld [vmem:[%s10153_s7 + $0x274] ss:$8 sps:$4 sm:$0xff]  }
 0x30f   : > { %5026 = vmatprep.subr.bf16.mxu1 %v6778_v46 }
 0x310   : > { %5944 = vmatpush2.bf16.msra.mxu0 %v7361_v61 }
 0x311   : > { %5945 = vmatprep.subr.bf16.mxu0 %v7366_v37  ;;  %v6700_v37 = vcombine.high %v3368_v41, %v3372_v43  ;;  %v7384_v41 = vld [vmem:[%s10153_s7 + $0x164] ss:$8 sps:$4 sm:$0xff]  }
 0x312   : > { %5027 = vmatpush2.bf16.msra.mxu1 %v6777_v34  ;;  %v3360_v34 = vld [vmem:[%s10151_s5 + $0x458] sm:$0xff] }
 0x313   : > { %5028 = vmatprep.subr.bf16.mxu1 %v6770_v8  ;;  %v3364_v8 = vld [vmem:[%s10151_s5 + $0x478] sm:$0xff] }
 0x314   : > { %5946 = vmatpush2.bf16.msra.mxu0 %v7364_v45  ;;  %v6692_v1 = vcombine.high %v3360_v34, %v3364_v8  ;;  %v3352_v45 = vld [vmem:[%s10151_s5 + $0x418] sm:$0xff] }
 0x315   : > { %5947 = vmatprep.subr.bf16.mxu0 %v7369_v47  ;;  %v3356_v47 = vld [vmem:[%s10151_s5 + $0x438] sm:$0xff] }
 0x316   : > { %5029 = vmatpush2.bf16.msra.mxu1 %v6769_v51  ;;  %v6691_v51 = vcombine.low %v3360_v34, %v3364_v8 }
 0x317   : > { %5030 = vmatprep.subr.bf16.mxu1 %v6762_v54  ;;  %v6684_v54 = vcombine.high %v3352_v45, %v3356_v47 }
 0x318   : > { %5948 = vmatpush2.bf16.msra.mxu0 %v7367_v11  ;;  %v6683_v11 = vcombine.low %v3352_v45, %v3356_v47 }
 0x319   : > { %5949 = vmatprep.subr.bf16.mxu0 %v7372_v7  ;;  %v6804_v7 = vcombine.high %v3472_v59, %v3476_v13 }
 0x31a   : > { %5031 = vmatpush2.bf16.msra.mxu1 %v6761_v62  ;;  %v3464_v62 = vld [vmem:[%s10151_s5 + $0x798] sm:$0xff] }
 0x31b   : > { %5032 = vmatprep.subr.bf16.mxu1 %v6754_v0  ;;  %v3468_v0 = vld [vmem:[%s10151_s5 + $0x7b8] sm:$0xff] }
 0x31c   : > { %5950 = vmatpush2.bf16.msra.mxu0 %v7370_v6  ;;  %v6796_v5 = vcombine.high %v3464_v62, %v3468_v0  ;;  %v3456_v6 = vld [vmem:[%s10151_s5 + $0x758] sm:$0xff] }
 0x31d   : > { %5951 = vmatprep.subr.bf16.mxu0 %v7375_v16  ;;  %v3460_v16 = vld [vmem:[%s10151_s5 + $0x778] sm:$0xff] }
 0x31e   : > { %5033 = vmatpush2.bf16.msra.mxu1 %v6753_v17  ;;  %v6795_v17 = vcombine.low %v3464_v62, %v3468_v0  ;;  %v7427_v0 = vld [vmem:[%s10153_s7 + $0x270] ss:$8 sps:$4 sm:$0xff]  }
 0x31f   : > { %5034 = vmatprep.subr.bf16.mxu1 %v6746_v19  ;;  %v6788_v19 = vcombine.high %v3456_v6, %v3460_v16 }
 0x320   : > { %5952 = vmatpush2.bf16.msra.mxu0 %v7373_v22  ;;  %v6787_v22 = vcombine.low %v3456_v6, %v3460_v16  ;;  %v7388_v6 = vld [vmem:[%s10153_s7 + $0x140] ss:$8 sps:$4 sm:$0xff]   ;;  %v7393_v16 = vld [vmem:[%s10153_s7 + $0x134] ss:$8 sps:$4 sm:$0xff]  }
 0x321   : > { %5953 = vmatprep.subr.bf16.mxu0 %v7378_v52  ;;  %v6780_v52 = vcombine.high %v3448_v20, %v3452_v21  ;;  %v7391_v20 = vld [vmem:[%s10153_s7 + $0x130] ss:$8 sps:$4 sm:$0xff]   ;;  %v7396_v21 = vld [vmem:[%s10153_s7 + $0x124] ss:$8 sps:$4 sm:$0xff]  }
 0x322   : > { %5035 = vmatpush2.bf16.msra.mxu1 %v6745_v55  ;;  %v3440_v55 = vld [vmem:[%s10151_s5 + $0x6d8] sm:$0xff] }
 0x323   : > { %5086 = vmatprep.subr.bf16.mxu1 %v6740_v23  ;;  %v3444_v23 = vld [vmem:[%s10151_s5 + $0x6f8] sm:$0xff] }
 0x324   : > { %5954 = vmatpush2.bf16.msra.mxu0 %v7376_v49  ;;  %v6772_v48 = vcombine.high %v3440_v55, %v3444_v23  ;;  %v3432_v49 = vld [vmem:[%s10151_s5 + $0x698] sm:$0xff] }
 0x325   : > { %5037 = vmatmul.mubr.bf16.vlgmr.msra.gmra.mxu1 %v9324_v4  ;;  %v9720_v26 = vpop.f32.mrf.mxu0  ;;  %6005 = vmatprep.subr.bf16.mxu0 %v7429_v40 }
 0x326   : > { %5087 = vmatpush1.bf16.msra.mxu1 %v6739_v18  ;;  %5118 = vmatprep.mubr.bf16.mxu1 %v9322_v3  ;;  %v3376_v3 = vld [vmem:[%s10151_s5 + $0x4d8] sm:$0xff] }
 0x327   : > { %v9723_v27 = vpop.f32.mrf.mxu0  ;;  %5088 = vmatprep.subr.bf16.mxu1 %v6732_v56  ;;  %v6708_v46 = vcombine.high %v3376_v3, %v3380_v57  ;;  %v6707_v61 = vcombine.low %v3376_v3, %v3380_v57  ;;  %v3436_v18 = vld [vmem:[%s10151_s5 + $0x6b8] sm:$0xff]  ;;  %v6771_v56 = vcombine.low %v3440_v55, %v3444_v23  ;;  %v7394_v55 = vld [vmem:[%s10153_s7 + $0x120] ss:$8 sps:$4 sm:$0xff]  }
 0x328   : > { %v6764_v25 = vcombine.high %v3432_v49, %v3436_v18  ;;  %v7381_v57 = vld [vmem:[%s10153_s7 + $0x174] ss:$8 sps:$4 sm:$0xff]  }
 0x329   : > { %v4919_v60 = vpop.f32.mrf.mxu0  ;;  %v7399_v23 = vld [vmem:[%s10153_s7 + $0x114] ss:$8 sps:$4 sm:$0xff]  }
 0x32a   : > { %5089 = vmatpush1.bf16.msra.mxu1 %v6731_v38  ;;  %v3428_v38 = vld [vmem:[%s10151_s5 + $0x678] sm:$0xff] }
 0x32b   : > { %v4920_v31 = vpop.f32.mrf.mxu0  ;;  %5090 = vmatprep.subr.bf16.mxu1 %v6724_v53  ;;  %v6763_v53 = vcombine.low %v3432_v49, %v3436_v18  ;;  %v6756_v28 = vcombine.high %v3424_v35, %v3428_v38  ;;  %v3420_v60 = vld [vmem:[%s10151_s5 + $0x638] sm:$0xff]  ;;  %v7402_v18 = vld [vmem:[%s10153_s7 + $0x104] ss:$8 sps:$4 sm:$0xff]  }
 0x32c   : > { %v6748_v31 = vcombine.high %v3416_v50, %v3420_v60  ;;  %v6747_v3 = vcombine.low %v3416_v50, %v3420_v60  ;;  %v7397_v49 = vld [vmem:[%s10153_s7 + $0x110] ss:$8 sps:$4 sm:$0xff]   ;;  %v7408_v60 = vld [vmem:[%s10153_s7 + $0x1e4] ss:$8 sps:$4 sm:$0xff]  }
 0x32d   : > { %v7403_v50 = vld [vmem:[%s10153_s7 + $0x1f0] ss:$8 sps:$4 sm:$0xff]  }
 0x32e   : > { %5091 = vmatpush1.bf16.msra.mxu1 %v6723_v30  ;;  %v6755_v30 = vcombine.low %v3424_v35, %v3428_v38  ;;  %v7400_v35 = vld [vmem:[%s10153_s7 + $0x100] ss:$8 sps:$4 sm:$0xff]   ;;  %v7405_v38 = vld [vmem:[%s10153_s7 + $0x1f4] ss:$8 sps:$4 sm:$0xff]  }
 0x32f   : > { %5092 = vmatprep.subr.bf16.mxu1 %v6716_v32  ;;  %v9809_v32 = vld [vmem:[%s10152_s6] sm:$0xff] }
 0x330   : > { %v3486_v40 = vrot.slane %v9809_v32, %v8221_v14 }
 0x332   : > { %5093 = vmatpush1.bf16.msra.mxu1 %v6715_v63  ;;  %v3482_v63 = vrot.slane %v9809_v32, %v8210_v10  ;;  %v4836_v34 = vadd.f32 %v9534_v58, %v3486_v40  ;;  %v7385_v58 = vld [vmem:[%s10153_s7 + $0x150] ss:$8 sps:$4 sm:$0xff]   ;;  %v7453_v40 = vld [vmem:[%s10153_s7 + $0x2f4] ss:$8 sps:$4 sm:$0xff]  }
 0x333   : > { %5094 = vmatprep.subr.bf16.mxu1 %v6708_v46  ;;  %v7379_v46 = vld [vmem:[%s10153_s7 + $0x170] ss:$8 sps:$4 sm:$0xff]  }
 0x334   : > { %v4834_v43 = vadd.f32 %v9527_v29, %v3482_v63  ;;  %v7387_v29 = vld [vmem:[%s10153_s7 + $0x154] ss:$8 sps:$4 sm:$0xff]   ;;  %v7448_v63 = vld [vmem:[%s10153_s7 + $0x200] ss:$8 sps:$4 sm:$0xff]  }
 0x336   : > { %5095 = vmatpush1.bf16.msra.mxu1 %v6707_v61 }
 0x337   : > { %5096 = vmatprep.subr.bf16.mxu1 %v6700_v37 }
 0x33a   : > { %5097 = vmatpush1.bf16.msra.mxu1 %v6699_v44  ;;  %v7382_v44 = vld [vmem:[%s10153_s7 + $0x160] ss:$8 sps:$4 sm:$0xff]  }
 0x33b   : > { %5098 = vmatprep.subr.bf16.mxu1 %v6692_v1 }
 0x33e   : > { %5099 = vmatpush1.bf16.msra.mxu1 %v6691_v51 }
 0x33f   : > { %5100 = vmatprep.subr.bf16.mxu1 %v6684_v54 }
 0x342   : > { %5101 = vmatpush1.bf16.msra.mxu1 %v6683_v11 }
 0x343   : > { %5102 = vmatprep.subr.bf16.mxu1 %v6804_v7  ;;  %v7390_v7 = vld [vmem:[%s10153_s7 + $0x144] ss:$8 sps:$4 sm:$0xff]  }
 0x346   : > { %5103 = vmatpush2.bf16.msra.mxu1 %v6803_v2 }
 0x347   : > { %5104 = vmatprep.subr.bf16.mxu1 %v6796_v5  ;;  %v7432_v5 = vld [vmem:[%s10153_s7 + $0x264] ss:$8 sps:$4 sm:$0xff]  }
 0x34a   : > { %5105 = vmatpush2.bf16.msra.mxu1 %v6795_v17  ;;  %v7430_v17 = vld [vmem:[%s10153_s7 + $0x260] ss:$8 sps:$4 sm:$0xff]  }
 0x34b   : > { %5106 = vmatprep.subr.bf16.mxu1 %v6788_v19  ;;  %v7435_v19 = vld [vmem:[%s10153_s7 + $0x254] ss:$8 sps:$4 sm:$0xff]  }
 0x34e   : > { %5107 = vmatpush2.bf16.msra.mxu1 %v6787_v22  ;;  %v7433_v22 = vld [vmem:[%s10153_s7 + $0x250] ss:$8 sps:$4 sm:$0xff]  }
 0x34f   : > { %5108 = vmatprep.subr.bf16.mxu1 %v6780_v52  ;;  %v7438_v52 = vld [vmem:[%s10153_s7 + $0x244] ss:$8 sps:$4 sm:$0xff]  }
 0x352   : > { %5109 = vmatpush2.bf16.msra.mxu1 %v6779_v24  ;;  %v7436_v24 = vld [vmem:[%s10153_s7 + $0x240] ss:$8 sps:$4 sm:$0xff]  }
 0x353   : > { %5110 = vmatprep.subr.bf16.mxu1 %v6772_v48  ;;  %v7441_v48 = vld [vmem:[%s10153_s7 + $0x234] ss:$8 sps:$4 sm:$0xff]  }
 0x356   : > { %5111 = vmatpush2.bf16.msra.mxu1 %v6771_v56  ;;  %v7439_v56 = vld [vmem:[%s10153_s7 + $0x230] ss:$8 sps:$4 sm:$0xff]  }
 0x357   : > { %5112 = vmatprep.subr.bf16.mxu1 %v6764_v25  ;;  %v7444_v25 = vld [vmem:[%s10153_s7 + $0x224] ss:$8 sps:$4 sm:$0xff]  }
 0x35a   : > { %5113 = vmatpush2.bf16.msra.mxu1 %v6763_v53  ;;  %v7442_v53 = vld [vmem:[%s10153_s7 + $0x220] ss:$8 sps:$4 sm:$0xff]  }
 0x35b   : > { %5114 = vmatprep.subr.bf16.mxu1 %v6756_v28  ;;  %v7447_v28 = vld [vmem:[%s10153_s7 + $0x214] ss:$8 sps:$4 sm:$0xff]  }
 0x35e   : > { %5115 = vmatpush2.bf16.msra.mxu1 %v6755_v30  ;;  %v7445_v30 = vld [vmem:[%s10153_s7 + $0x210] ss:$8 sps:$4 sm:$0xff]  }
 0x35f   : > { %5116 = vmatprep.subr.bf16.mxu1 %v6748_v31  ;;  %v7450_v31 = vld [vmem:[%s10153_s7 + $0x204] ss:$8 sps:$4 sm:$0xff]  }
 0x362   : > { %5117 = vmatpush2.bf16.msra.mxu1 %v6747_v3  ;;  %v7406_v3 = vld [vmem:[%s10153_s7 + $0x1e0] ss:$8 sps:$4 sm:$0xff]  }
 0x363   : > { %5964 = vmatprep.subr.bf16.mxu1 %v7381_v57  ;;  %v7411_v57 = vld [vmem:[%s10153_s7 + $0x1d4] ss:$8 sps:$4 sm:$0xff]  }
 0x365   : > { %5119 = vmatmul.mubr.bf16.vlgmr.msra.gmra.mxu1 %v9324_v4  ;;  %v4874_v61 = vpop.f32.mrf.mxu1  ;;  %v9826_v37 = vpop.f32.mrf.mxu0 }
 0x366   : > { %v4875_v8 = vadd.f32 %v4874_v61, %v4834_v43  ;;  %5965 = vmatpush1.bf16.msra.mxu1 %v7379_v46  ;;  %v7409_v46 = vld [vmem:[%s10153_s7 + $0x1d0] ss:$8 sps:$4 sm:$0xff]   ;;  %v7456_v61 = vld [vmem:[%s10153_s7 + $0x2e4] ss:$8 sps:$4 sm:$0xff]  }
 0x367   : > { %v4876_v1 = vpop.f32.mrf.mxu1  ;;  %v9832_v45 = vpop.f32.mrf.mxu0  ;;  %5966 = vmatprep.subr.bf16.mxu1 %v7384_v41  ;;  %v7414_v41 = vld [vmem:[%s10153_s7 + $0x1c4] ss:$8 sps:$4 sm:$0xff]   ;;  %v7451_v43 = vld [vmem:[%s10153_s7 + $0x2f0] ss:$8 sps:$4 sm:$0xff]  }
 0x368   : > { %v4877_v4 = vadd.f32 %v4876_v1, %v4836_v34  ;;  %v5127_v47 = vmax.f32 %v4875_v8, 0.0  ;;  %v7412_v34 = vld [vmem:[%s10153_s7 + $0x1c0] ss:$8 sps:$4 sm:$0xff]   ;;  %v7417_v8 = vld [vmem:[%s10153_s7 + $0x1b4] ss:$8 sps:$4 sm:$0xff]  }
 0x369   : > { %v4878_v51 = vpop.f32.mrf.mxu1  ;;  %v5001_v54 = vpop.f32.mrf.mxu0  ;;  %v7459_v1 = vld [vmem:[%s10153_s7 + $0x2d4] ss:$8 sps:$4 sm:$0xff]  }
 0x36a   : > { %v5128_v59 = vmax.f32 %v4877_v4, 0.0  ;;  %5967 = vmatpush1.bf16.msra.mxu1 %v7382_v44  ;;  %v5135_v2 = vpack.c.bf16 %v5127_v47, %v5127_v47  ;;  %v7454_v44 = vld [vmem:[%s10153_s7 + $0x2e0] ss:$8 sps:$4 sm:$0xff]   ;;  %v7420_v4 = vld [vmem:[%s10153_s7 + $0x1a4] ss:$8 sps:$4 sm:$0xff]  }
 0x36b   : > { %v4879_v13 = vpop.f32.mrf.mxu1  ;;  %v5002_v11 = vpop.f32.mrf.mxu0  ;;  %5968 = vmatprep.subr.bf16.mxu1 %v7387_v29  ;;  %v7415_v29 = vld [vmem:[%s10153_s7 + $0x1b0] ss:$8 sps:$4 sm:$0xff]   ;;  %v7462_v51 = vld [vmem:[%s10153_s7 + $0x2c4] ss:$8 sps:$4 sm:$0xff]   ;;  %v7418_v54 = vld [vmem:[%s10153_s7 + $0x1a0] ss:$8 sps:$4 sm:$0xff]  }
 0x36c   : > { %v5136_v62 = vpack.c.bf16 %v5128_v59, %v5128_v59  ;;  %v7457_v47 = vld [vmem:[%s10153_s7 + $0x2d0] ss:$8 sps:$4 sm:$0xff]   ;;  %v7423_v59 = vld [vmem:[%s10153_s7 + $0x194] ss:$8 sps:$4 sm:$0xff]  }
 0x36d   : > { %v7465_v13 = vld [vmem:[%s10153_s7 + $0x2b4] ss:$8 sps:$4 sm:$0xff]   ;;  %v7421_v11 = vld [vmem:[%s10153_s7 + $0x190] ss:$8 sps:$4 sm:$0xff]  }
 0x36e   : > { %5955 = vmatprep.mubr.bf16.mxu0 %v5136_v62  ;;  %5969 = vmatpush1.bf16.msra.mxu1 %v7385_v58  ;;  %v7460_v58 = vld [vmem:[%s10153_s7 + $0x2c0] ss:$8 sps:$4 sm:$0xff]   ;;  %v7463_v62 = vld [vmem:[%s10153_s7 + $0x2b0] ss:$8 sps:$4 sm:$0xff]  }
 0x36f   : > { %5956 = vmatmul.mubr.bf16.vlgmr.msra.gmra.mxu0 %v5135_v2  ;;  %5970 = vmatprep.subr.bf16.mxu1 %v7390_v7  ;;  %v7426_v7 = vld [vmem:[%s10153_s7 + $0x184] ss:$8 sps:$4 sm:$0xff]   ;;  %v7424_v2 = vld [vmem:[%s10153_s7 + $0x180] ss:$8 sps:$4 sm:$0xff]  }
 0x370   : > { %6006 = vmatpush1.bf16.msra.mxu0 %v7427_v0  ;;  %v7468_v0 = vld [vmem:[%s10153_s7 + $0x2a4] ss:$8 sps:$4 sm:$0xff]  }
 0x371   : > { %6007 = vmatprep.subr.bf16.mxu0 %v7432_v5  ;;  %v7477_v5 = vld [vmem:[%s10153_s7 + $0x374] ss:$8 sps:$4 sm:$0xff]  }
 0x372   : > { %5971 = vmatpush1.bf16.msra.mxu1 %v7388_v6  ;;  %v3490_v6 = vrot.slane %v9809_v32, %v8218_v12  ;;  %v7469_v12 = vld [vmem:[%s10153_s7 + $0x290] ss:$8 sps:$4 sm:$0xff]  }
 0x373   : > { %5972 = vmatprep.subr.bf16.mxu1 %v7393_v16  ;;  %v7466_v16 = vld [vmem:[%s10153_s7 + $0x2a0] ss:$8 sps:$4 sm:$0xff]  }
 0x374   : > { %6008 = vmatpush1.bf16.msra.mxu0 %v7430_v17  ;;  %v7471_v17 = vld [vmem:[%s10153_s7 + $0x294] ss:$8 sps:$4 sm:$0xff]  }
 0x375   : > { %6009 = vmatprep.subr.bf16.mxu0 %v7435_v19  ;;  %v3494_v19 = vrot.slane %v9809_v32, %v8224_v15 }
 0x376   : > { %5973 = vmatpush1.bf16.msra.mxu1 %v7391_v20  ;;  %v4916_v20 = vadd.f32 %v9720_v26, %v3490_v6  ;;  %v7472_v26 = vld [vmem:[%s10153_s7 + $0x280] ss:$8 sps:$4 sm:$0xff]  }
 0x377   : > { %5974 = vmatprep.subr.bf16.mxu1 %v7396_v21 }
 0x378   : > { %6010 = vmatpush1.bf16.msra.mxu0 %v7433_v22  ;;  %v7474_v22 = vld [vmem:[%s10153_s7 + $0x284] ss:$8 sps:$4 sm:$0xff]  }
 0x379   : > { %6011 = vmatprep.subr.bf16.mxu0 %v7438_v52  ;;  %v4918_v52 = vadd.f32 %v9723_v27, %v3494_v19  ;;  %v7475_v27 = vld [vmem:[%s10153_s7 + $0x370] ss:$8 sps:$4 sm:$0xff]  }
 0x37a   : > { %5975 = vmatpush1.bf16.msra.mxu1 %v7394_v55 }
 0x37b   : > { %5976 = vmatprep.subr.bf16.mxu1 %v7399_v23 }
 0x37c   : > { %6012 = vmatpush1.bf16.msra.mxu0 %v7436_v24 }
 0x37d   : > { %6013 = vmatprep.subr.bf16.mxu0 %v7441_v48 }
 0x37e   : > { %5977 = vmatpush1.bf16.msra.mxu1 %v7397_v49 }
 0x37f   : > { %5978 = vmatprep.subr.bf16.mxu1 %v7402_v18 }
 0x380   : > { %6014 = vmatpush1.bf16.msra.mxu0 %v7439_v56 }
 0x381   : > { %6015 = vmatprep.subr.bf16.mxu0 %v7444_v25 }
 0x382   : > { %5979 = vmatpush1.bf16.msra.mxu1 %v7400_v35 }
 0x383   : > { %5980 = vmatprep.subr.bf16.mxu1 %v7405_v38 }
 0x384   : > { %6016 = vmatpush1.bf16.msra.mxu0 %v7442_v53 }
 0x385   : > { %6017 = vmatprep.subr.bf16.mxu0 %v7447_v28 }
 0x386   : > { %5981 = vmatpush2.bf16.msra.mxu1 %v7403_v50  ;;  %v7480_v50 = vld [vmem:[%s10153_s7 + $0x364] ss:$8 sps:$4 sm:$0xff]  }
 0x387   : > { %5982 = vmatprep.subr.bf16.mxu1 %v7408_v60  ;;  %v7478_v60 = vld [vmem:[%s10153_s7 + $0x360] ss:$8 sps:$4 sm:$0xff]  }
 0x388   : > { %6018 = vmatpush1.bf16.msra.mxu0 %v7445_v30  ;;  %v7483_v30 = vld [vmem:[%s10153_s7 + $0x354] ss:$8 sps:$4 sm:$0xff]  }
 0x389   : > { %6019 = vmatprep.subr.bf16.mxu0 %v7450_v31  ;;  %v7481_v31 = vld [vmem:[%s10153_s7 + $0x350] ss:$8 sps:$4 sm:$0xff]  }
 0x38a   : > { %5983 = vmatpush2.bf16.msra.mxu1 %v7406_v3  ;;  %v7486_v3 = vld [vmem:[%s10153_s7 + $0x344] ss:$8 sps:$4 sm:$0xff]  }
 0x38b   : > { %5984 = vmatprep.subr.bf16.mxu1 %v7411_v57  ;;  %v7484_v57 = vld [vmem:[%s10153_s7 + $0x340] ss:$8 sps:$4 sm:$0xff]  }
 0x38c   : > { %6020 = vmatpush1.bf16.msra.mxu0 %v7448_v63  ;;  %v7489_v63 = vld [vmem:[%s10153_s7 + $0x334] ss:$8 sps:$4 sm:$0xff]  }
 0x38d   : > { %6021 = vmatprep.subr.bf16.mxu0 %v7453_v40  ;;  %v7487_v40 = vld [vmem:[%s10153_s7 + $0x330] ss:$8 sps:$4 sm:$0xff]  }
 0x38e   : > { %5985 = vmatpush2.bf16.msra.mxu1 %v7409_v46  ;;  %v7492_v46 = vld [vmem:[%s10153_s7 + $0x324] ss:$8 sps:$4 sm:$0xff]  }
 0x38f   : > { %5986 = vmatprep.subr.bf16.mxu1 %v7414_v41  ;;  %v7490_v41 = vld [vmem:[%s10153_s7 + $0x320] ss:$8 sps:$4 sm:$0xff]  }
 0x390   : > { %6022 = vmatpush2.bf16.msra.mxu0 %v7451_v43  ;;  %v7495_v43 = vld [vmem:[%s10153_s7 + $0x314] ss:$8 sps:$4 sm:$0xff]  }
 0x391   : > { %6023 = vmatprep.subr.bf16.mxu0 %v7456_v61  ;;  %v7493_v61 = vld [vmem:[%s10153_s7 + $0x310] ss:$8 sps:$4 sm:$0xff]  }
 0x392   : > { %5987 = vmatpush2.bf16.msra.mxu1 %v7412_v34  ;;  %v7498_v34 = vld [vmem:[%s10153_s7 + $0x304] ss:$8 sps:$4 sm:$0xff]  }
 0x393   : > { %5988 = vmatprep.subr.bf16.mxu1 %v7417_v8  ;;  %v7496_v8 = vld [vmem:[%s10153_s7 + $0x300] ss:$8 sps:$4 sm:$0xff]  }
 0x394   : > { %6024 = vmatpush2.bf16.msra.mxu0 %v7454_v44  ;;  %v7501_v44 = vld [vmem:[%s10153_s7 + $0x3f4] ss:$8 sps:$4 sm:$0xff]  }
 0x395   : > { %6025 = vmatprep.subr.bf16.mxu0 %v7459_v1  ;;  %v7499_v1 = vld [vmem:[%s10153_s7 + $0x3f0] ss:$8 sps:$4 sm:$0xff]  }
 0x396   : > { %5989 = vmatpush2.bf16.msra.mxu1 %v7415_v29  ;;  %v7504_v29 = vld [vmem:[%s10153_s7 + $0x3e4] ss:$8 sps:$4 sm:$0xff]  }
 0x397   : > { %5990 = vmatprep.subr.bf16.mxu1 %v7420_v4  ;;  %v7502_v4 = vld [vmem:[%s10153_s7 + $0x3e0] ss:$8 sps:$4 sm:$0xff]  }
 0x398   : > { %6026 = vmatpush2.bf16.msra.mxu0 %v7457_v47  ;;  %v7507_v47 = vld [vmem:[%s10153_s7 + $0x3d4] ss:$8 sps:$4 sm:$0xff]  }
 0x399   : > { %6027 = vmatprep.subr.bf16.mxu0 %v7462_v51  ;;  %v7505_v51 = vld [vmem:[%s10153_s7 + $0x3d0] ss:$8 sps:$4 sm:$0xff]  }
 0x39a   : > { %5991 = vmatpush2.bf16.msra.mxu1 %v7418_v54  ;;  %v7510_v54 = vld [vmem:[%s10153_s7 + $0x3c4] ss:$8 sps:$4 sm:$0xff]  }
 0x39b   : > { %5992 = vmatprep.subr.bf16.mxu1 %v7423_v59  ;;  %v7508_v59 = vld [vmem:[%s10153_s7 + $0x3c0] ss:$8 sps:$4 sm:$0xff]  }
 0x39c   : > { %6028 = vmatpush2.bf16.msra.mxu0 %v7460_v58  ;;  %v7513_v58 = vld [vmem:[%s10153_s7 + $0x3b4] ss:$8 sps:$4 sm:$0xff]  }
 0x39d   : > { %6029 = vmatprep.subr.bf16.mxu0 %v7465_v13  ;;  %v7511_v13 = vld [vmem:[%s10153_s7 + $0x3b0] ss:$8 sps:$4 sm:$0xff]  }
 0x39e   : > { %5993 = vmatpush2.bf16.msra.mxu1 %v7421_v11  ;;  %v7516_v11 = vld [vmem:[%s10153_s7 + $0x3a4] ss:$8 sps:$4 sm:$0xff]  }
 0x39f   : > { %5994 = vmatprep.subr.bf16.mxu1 %v7426_v7  ;;  %v3498_v7 = vrot.slane %v9809_v32, %v485_v33  ;;  %v7517_v33 = vld [vmem:[%s10153_s7 + $0x390] ss:$8 sps:$4 sm:$0xff]  }
 0x3a0   : > { %6030 = vmatpush2.bf16.msra.mxu0 %v7463_v62  ;;  %v7514_v62 = vld [vmem:[%s10153_s7 + $0x3a0] ss:$8 sps:$4 sm:$0xff]  }
 0x3a1   : > { %6031 = vmatprep.subr.bf16.mxu0 %v7468_v0  ;;  %v7519_v0 = vld [vmem:[%s10153_s7 + $0x394] ss:$8 sps:$4 sm:$0xff]  }
 0x3a2   : > { %5995 = vmatpush2.bf16.msra.mxu1 %v7424_v2  ;;  %v3502_v2 = vrot.slane %v9809_v32, %v489_v39  ;;  %v7520_v39 = vld [vmem:[%s10153_s7 + $0x380] ss:$8 sps:$4 sm:$0xff]  }
 0x3a3   : > { %6046 = vmatprep.subr.bf16.mxu1 %v7477_v5  ;;  %v4998_v5 = vadd.f32 %v9826_v37, %v3498_v7 }
 0x3a4   : > { %6032 = vmatpush2.bf16.msra.mxu0 %v7466_v16  ;;  %v7522_v16 = vld [vmem:[%s10153_s7 + $0x384] ss:$8 sps:$4 sm:$0xff]  }
 0x3a5   : > { %v4956_v21 = vpop.f32.mrf.mxu1  ;;  %6033 = vmatprep.subr.bf16.mxu0 %v7471_v17  ;;  %v5000_v17 = vadd.f32 %v9832_v45, %v3502_v2  ;;  %v3506_v45 = vrot.slane %v9809_v32, %v493_v36 }
 0x3a6   : > { %v4957_v55 = vadd.f32 %v4956_v21, %v4916_v20 }
 0x3a7   : > { %v10017_v23 = vpop.f32.mrf.mxu0  ;;  %v4958_v15 = vpop.f32.mrf.mxu1 }
 0x3a8   : > { %v4959_v24 = vadd.f32 %v4958_v15, %v4918_v52  ;;  %6034 = vmatpush2.bf16.msra.mxu0 %v7469_v12  ;;  %v5129_v48 = vmax.f32 %v4957_v55, 0.0 }
 0x3a9   : > { %v10022_v49 = vpop.f32.mrf.mxu0  ;;  %v4960_v18 = vpop.f32.mrf.mxu1  ;;  %6035 = vmatprep.subr.bf16.mxu0 %v7474_v22 }
 0x3aa   : > { %v5130_v56 = vmax.f32 %v4959_v24, 0.0  ;;  %v5137_v53 = vpack.c.bf16 %v5129_v48, %v5129_v48  ;;  %v3510_v24 = vrot.slane %v9809_v32, %v497_v42  ;;  %v5271_v32 = vld [vmem:[%s10154_s8] sm:$0x3] }
 0x3ab   : > { %v5083_v25 = vpop.f32.mrf.mxu0  ;;  %v4961_v35 = vpop.f32.mrf.mxu1 }
 0x3ac   : > { %v5138_v38 = vpack.c.bf16 %v5130_v56, %v5130_v56  ;;  %6036 = vmatpush2.bf16.msra.mxu0 %v7472_v26  ;;  %v5080_v26 = vadd.f32 %v10017_v23, %v3506_v45  ;;  %v5082_v18 = vadd.f32 %v10022_v49, %v3510_v24  ;;  %v5276_v23 = vrot.slane %v5271_v32, %v8210_v10 }
 0x3ad   : > { %v5084_v28 = vpop.f32.mrf.mxu0  ;;  %v5280_v49 = vrot.slane %v5271_v32, %v8221_v14 }
 0x3ae   : > { %5996 = vmatprep.mubr.bf16.mxu1 %v5138_v38 }
 0x3af   : > { %5997 = vmatmul.mubr.bf16.vlgmr.msra.gmra.mxu1 %v5137_v53 }
 0x3b0   : > { %6047 = vmatpush1.bf16.msra.mxu1 %v7475_v27 }
 0x3b1   : > { %6048 = vmatprep.subr.bf16.mxu1 %v7480_v50 }
 0x3b4   : > { %6049 = vmatpush1.bf16.msra.mxu1 %v7478_v60 }
 0x3b5   : > { %6050 = vmatprep.subr.bf16.mxu1 %v7483_v30 }
 0x3b8   : > { %6051 = vmatpush1.bf16.msra.mxu1 %v7481_v31 }
 0x3b9   : > { %6052 = vmatprep.subr.bf16.mxu1 %v7486_v3 }
 0x3bc   : > { %6053 = vmatpush1.bf16.msra.mxu1 %v7484_v57 }
 0x3bd   : > { %6054 = vmatprep.subr.bf16.mxu1 %v7489_v63 }
 0x3c0   : > { %6055 = vmatpush1.bf16.msra.mxu1 %v7487_v40 }
 0x3c1   : > { %6056 = vmatprep.subr.bf16.mxu1 %v7492_v46 }
 0x3c4   : > { %6057 = vmatpush1.bf16.msra.mxu1 %v7490_v41 }
 0x3c5   : > { %6058 = vmatprep.subr.bf16.mxu1 %v7495_v43 }
 0x3c8   : > { %6059 = vmatpush1.bf16.msra.mxu1 %v7493_v61 }
 0x3c9   : > { %6060 = vmatprep.subr.bf16.mxu1 %v7498_v34 }
 0x3cc   : > { %6061 = vmatpush1.bf16.msra.mxu1 %v7496_v8 }
 0x3cd   : > { %6062 = vmatprep.subr.bf16.mxu1 %v7501_v44 }
 0x3d0   : > { %6063 = vmatpush2.bf16.msra.mxu1 %v7499_v1 }
 0x3d1   : > { %6064 = vmatprep.subr.bf16.mxu1 %v7504_v29 }
 0x3d4   : > { %6065 = vmatpush2.bf16.msra.mxu1 %v7502_v4 }
 0x3d5   : > { %6066 = vmatprep.subr.bf16.mxu1 %v7507_v47 }
 0x3d8   : > { %6067 = vmatpush2.bf16.msra.mxu1 %v7505_v51 }
 0x3d9   : > { %6068 = vmatprep.subr.bf16.mxu1 %v7510_v54 }
 0x3dc   : > { %6069 = vmatpush2.bf16.msra.mxu1 %v7508_v59 }
 0x3dd   : > { %6070 = vmatprep.subr.bf16.mxu1 %v7513_v58 }
 0x3e0   : > { %6071 = vmatpush2.bf16.msra.mxu1 %v7511_v13 }
 0x3e1   : > { %6072 = vmatprep.subr.bf16.mxu1 %v7516_v11 }
 0x3e4   : > { %6073 = vmatpush2.bf16.msra.mxu1 %v7514_v62 }
 0x3e5   : > { %v5038_v6 = vpop.f32.mrf.mxu1  ;;  %6074 = vmatprep.subr.bf16.mxu1 %v7519_v0 }
 0x3e6   : > { %v5039_v19 = vadd.f32 %v5038_v6, %v4998_v5 }
 0x3e7   : > { %v5040_v20 = vpop.f32.mrf.mxu1 }
 0x3e8   : > { %v5041_v12 = vadd.f32 %v5040_v20, %v5000_v17  ;;  %6075 = vmatpush2.bf16.msra.mxu1 %v7517_v33  ;;  %v5131_v37 = vmax.f32 %v5039_v19, 0.0 }
 0x3e9   : > { %v5042_v21 = vpop.f32.mrf.mxu1  ;;  %6076 = vmatprep.subr.bf16.mxu1 %v7522_v16 }
 0x3ea   : > { %v5132_v22 = vmax.f32 %v5041_v12, 0.0  ;;  %v5139_v15 = vpack.c.bf16 %v5131_v37, %v5131_v37 }
 0x3eb   : > { %v5043_v52 = vpop.f32.mrf.mxu1 }
 0x3ec   : > { %v5140_v55 = vpack.c.bf16 %v5132_v22, %v5132_v22  ;;  %6077 = vmatpush2.bf16.msra.mxu1 %v7520_v39 }
 0x3ee   : > { %6037 = vmatprep.mubr.bf16.mxu0 %v5140_v55 }
 0x3ef   : > { %6038 = vmatmul.mubr.bf16.vlgmr.msra.gmra.mxu0 %v5139_v15 }
 0x425   : > { %v5120_v48 = vpop.f32.mrf.mxu1 }
 0x426   : > { %v5121_v56 = vadd.f32 %v5120_v48, %v5080_v26 }
 0x427   : > { %v5122_v25 = vpop.f32.mrf.mxu1 }
 0x428   : > { %v5123_v35 = vadd.f32 %v5122_v25, %v5082_v18  ;;  %v5133_v38 = vmax.f32 %v5121_v56, 0.0 }
 0x429   : > { %v5124_v27 = vpop.f32.mrf.mxu1 }
 0x42a   : > { %v5134_v53 = vmax.f32 %v5123_v35, 0.0  ;;  %v5141_v60 = vpack.c.bf16 %v5133_v38, %v5133_v38 }
 0x42b   : > { %v5125_v28 = vpop.f32.mrf.mxu1 }
 0x42c   : > { %v5142_v50 = vpack.c.bf16 %v5134_v53, %v5134_v53 }
 0x42e   : > { %6078 = vmatprep.mubr.bf16.mxu1 %v5142_v50 }
 0x42f   : > { %6079 = vmatmul.mubr.bf16.vlgmr.msra.gmra.mxu1 %v5141_v60  ;;  %v5957_v36 = vpop.f32.mrf.mxu0 }
 0x430   : > { %v5958_v31 = vadd.f32 %v5957_v36, %v5276_v23 }
 0x431   : > { %v5959_v9 = vpop.f32.mrf.mxu0 }
 0x432   : > { %v5960_v57 = vadd.f32 %v5959_v9, %v5280_v49 }
 0x433   : > { %v5961_v30 = vpop.f32.mrf.mxu0 }
 0x435   : > { %v5962_v42 = vpop.f32.mrf.mxu0 }
 0x46f   : > { %v5998_v3 = vpop.f32.mrf.mxu1 }
 0x470   : > { %v5999_v63 = vadd.f32 %v5998_v3, %v5958_v31 }
 0x471   : > { %v6000_v40 = vpop.f32.mrf.mxu1 }
 0x472   : > { %v6001_v46 = vadd.f32 %v6000_v40, %v5960_v57 }
 0x473   : > { %v6002_v41 = vpop.f32.mrf.mxu1 }
 0x475   : > { %v6003_v43 = vpop.f32.mrf.mxu1 }
 0x4af   : > { %v6039_v61 = vpop.f32.mrf.mxu0 }
 0x4b0   : > { %v6040_v1 = vadd.f32 %v6039_v61, %v5999_v63 }
 0x4b1   : > { %v6041_v34 = vpop.f32.mrf.mxu0 }
 0x4b2   : > { %v6042_v4 = vadd.f32 %v6041_v34, %v6001_v46 }
 0x4b3   : > { %v6043_v8 = vpop.f32.mrf.mxu0 }
 0x4b5   : > { %v6044_v44 = vpop.f32.mrf.mxu0 }
 0x4ef   : > { %v6080_v29 = vpop.f32.mrf.mxu1 }
 0x4f0   : > { %v6081_v47 = vadd.f32 %v6080_v29, %v6040_v1 }
 0x4f1   : > { %v6082_v10 = vpop.f32.mrf.mxu1 }
 0x4f2   : > { %v6933_v51 = vmul.f32 -1.442695, %v6081_v47  ;;  %v6083_v14 = vadd.f32 %v6082_v10, %v6042_v4 }
 0x4f3   : > { %v6084_v54 = vpop.f32.mrf.mxu1 }
 0x4f4   : > { %7523 = vpow2.f32 %v6933_v51  ;;  %v6934_v59 = vmul.f32 -1.442695, %v6083_v14 }
 0x4f5   : > { %v6085_v58 = vpop.f32.mrf.mxu1 }
 0x4f6   : > { %7525 = vpow2.f32 %v6934_v59 }
 0x501   : > { %v7524_v13 = vpop.eup %7523 }
 0x502   : > { %v6093_v11 = vadd.f32 1.0, %v7524_v13 }
 0x503   : > { %v7526_v7 = vpop.eup %7525 }
 0x504   : > { %7527 = vrcp.f32 %v6093_v11  ;;  %v6094_v62 = vadd.f32 1.0, %v7526_v7 }
 0x506   : > { %7529 = vrcp.f32 %v6094_v62 }
 0x511   : > { %v7528_v0 = vpop.eup %7527 }
 0x512   : > { %6099 = vst [vmem:[%s332_s28] sm:$0xff] %v7528_v0 }
 0x513   : > { %v7530_v2 = vpop.eup %7529 }
 0x514   : > { %6100 = vst [vmem:[%s332_s28 + $0x8] sm:$0xff] %v7530_v2 }
 0x515 PF: > { %s19_s30 = sadd.s32 1, %s7537_s30  }
 0x516   : > { %p16_p4 = scmp.ge.s32.totalorder %s19_s30, 4  }
 0x518   :  { %18 = sbr.rel (!%p16_p4) target bundleno = 1 (0x1), region = 86 }

</bundles_post_ra>
